<compile_context>
chip_gen: v5e
topology: v5e:2x2
jax: 0.10.0
libtpu: 0.0.40
codegen_flags: <defaults>
</compile_context>

<pallas_src>
import functools
from math import ceil

import jax
import jax.numpy as jnp
from jax import lax
from jax.experimental import pallas as pl
from jax.experimental.pallas import tpu as pltpu


_WINDOW = 8
_CONV_COMPUTE_DTYPE = jnp.bfloat16   # jnp.float32 for exact f32 backbone math


# =============================================================================
# Pallas kernel: fused, tiled symmetric-KL + weighted-L2 distance.
#
#   For each column (all layers concatenated along M):
#     p = softmax(x, axis=0), q = softmax(y, axis=0)   (log-softmax form)
#     kld  = 0.5 * sum_0 (p - q) * (logp - logq)
#     L2   = sum_0 (x - y)^2
#     w    = exp(0.5/(kld+10)) / (kld+10)^2
#     contrib = (kld + L2 * w) * col_weight        (col_weight = 1/M_layer)
#   out[0,0] = sum over all columns of contrib  (== sum_k KL_distance_k)
# =============================================================================
def _kld_kernel(x_ref, y_ref, w_ref, out_ref, acc_ref):
    @pl.when(pl.program_id(0) == 0)
    def _init():
        acc_ref[...] = jnp.zeros_like(acc_ref)

    x = x_ref[...]                                   # (R, TM) f32
    y = y_ref[...]
    ones_row = jnp.ones((1, x.shape[0]), jnp.float32)

    def col_sum(a):                                  # axis-0 sum on the MXU
        return jnp.dot(ones_row, a, preferred_element_type=jnp.float32)

    def softmax_and_log(a):
        amax = jnp.max(a, axis=0, keepdims=True)     # (1, TM), XLU
        s = a - amax
        e = jnp.exp(s)                               # 1 EUP exp / element
        se = col_sum(e)                              # (1, TM), MXU
        return e / se, s - jnp.log(se)               # p, log p

    p, logp = softmax_and_log(x)
    q, logq = softmax_and_log(y)

    # Symmetric KL in log-softmax form (the reference's log(q + 1e-17) epsilon
    # is negligible for softmax outputs).
    kld = 0.5 * col_sum((p - q) * (logp - logq))     # (1, TM)
    d = x - y
    l2 = col_sum(d * d)                              # (1, TM)

    k10 = kld + 10.0
    # w = 1 / (sqrt(exp(-1/(kld+10))) * (kld+10)^2) = exp(0.5/k10) / k10^2
    w = jnp.exp(0.5 / k10) / (k10 * k10)
    acc_ref[...] += (kld + l2 * w) * w_ref[...]      # per-column 1/M_layer mean

    @pl.when(pl.program_id(0) == pl.num_programs(0) - 1)
    def _finalize():
        out_ref[0, 0] = jnp.sum(acc_ref[...])


# =============================================================================
# Wrapper: concatenate all layers along M, pick tile, launch ONE pallas_call.
# =============================================================================
def _round_up(v, m):
    return ((v + m - 1) // m) * m


def _zero_pad(f, win=_WINDOW):
    h, w = f.shape[2], f.shape[3]
    row_padding = ceil(h / win) * win - h
    col_padding = ceil(w / win) * win - w
    # nn.ZeroPad2d((col_padding, 0, 0, row_padding)): pad left + bottom.
    return jnp.pad(f, ((0, 0), (0, 0), (0, row_padding), (col_padding, 0)))


def _vmem_capacity_bytes():
    try:
        return int(pltpu.get_tpu_info().vmem_capacity_bytes)
    except Exception:
        return 64 * 1024 * 1024            # conservative fallback (v7x per-TC)


def _select_tile_m(r, m_total, budget_bytes):
    """Lane-dense tile width: one tile when it fits, else biggest low-waste tile."""
    per_col_bytes = 4 * (4 * r + 3)        # x,y double-buffered + wcol(x2) + acc
    m128 = _round_up(m_total, 128)
    if m128 * per_col_bytes <= budget_bytes:
        return m128                        # single grid step
    max_tm = max(128, (budget_bytes // per_col_bytes) // 128 * 128)
    lo = 512 if max_tm >= 512 else 128     # don't drop below 512 unless forced
    best_tm, best_key = None, None
    for tm in range(lo, max_tm + 1, 128):
        m_pad = _round_up(m128, tm)
        key = (m_pad - m_total, m_pad // tm)   # minimize pad waste, then steps
        if best_key is None or key < best_key:
            best_key, best_tm = key, tm
    return best_tm


def fused_kl_distance(feats0, feats1, win=_WINDOW):
    """Sum over layers of KL_distance(pad(f0_k), pad(f1_k), win) — one launch."""
    xs, ys, ws = [], [], []
    r = None
    for f0, f1 in zip(feats0, feats1):
        f0 = _zero_pad(f0, win)
        f1 = _zero_pad(f1, win)
        n, c, h, w = f0.shape
        m = c * (h // win) * (w // win)
        r_k = n * win * win
        # The reference's chained plain row-major reshapes collapse to a single
        # (N*win*win, C*(H/win)*(W/win)) reshape of the NCHW tensor.
        assert r is None or r == r_k, "all layers must share R = N*win*win"
        r = r_k
        xs.append(jnp.reshape(f0, (r_k, m)).astype(jnp.float32))
        ys.append(jnp.reshape(f1, (r_k, m)).astype(jnp.float32))
        ws.append(jnp.full((1, m), 1.0 / m, jnp.float32))   # per-layer mean

    x1d = jnp.concatenate(xs, axis=1)
    y1d = jnp.concatenate(ys, axis=1)
    wcol = jnp.concatenate(ws, axis=1)
    m_total = x1d.shape[1]

    cap = _vmem_capacity_bytes()
    tm = _select_tile_m(r, m_total, cap // 4)
    m_pad = _round_up(m_total, tm)
    pad = m_pad - m_total
    if pad:
        # Pad columns: x = y = 0 -> kld = L2 = 0 and wcol = 0 -> contribute 0.
        x1d = jnp.pad(x1d, ((0, 0), (0, pad)))
        y1d = jnp.pad(y1d, ((0, 0), (0, pad)))
        wcol = jnp.pad(wcol, ((0, 0), (0, pad)))

    needed = 4 * (4 * r + 3) * tm
    vmem_limit = int(min(cap * 3 // 4, max(needed + (4 << 20), 32 << 20)))

    out = pl.pallas_call(
        _kld_kernel,
        out_shape=jax.ShapeDtypeStruct((1, 1), jnp.float32),
        grid=(m_pad // tm,),
        in_specs=[
            pl.BlockSpec((r, tm), lambda j: (0, j)),
            pl.BlockSpec((r, tm), lambda j: (0, j)),
            pl.BlockSpec((1, tm), lambda j: (0, j)),
        ],
        out_specs=pl.BlockSpec((1, 1), lambda j: (0, 0),
                               memory_space=pltpu.MemorySpace.SMEM),
        scratch_shapes=[pltpu.VMEM((1, tm), jnp.float32)],
        compiler_params=pltpu.CompilerParams(
            dimension_semantics=("arbitrary",),
            vmem_limit_bytes=vmem_limit),
    )(x1d, y1d, wcol)
    return out[0, 0]


# =============================================================================
# MobileNetV3-small feature backbone (plain JAX, NHWC, deterministic weights)
# =============================================================================
def _conv2d(x, w, stride=1, padding=0, groups=1):
    return lax.conv_general_dilated(
        x.astype(_CONV_COMPUTE_DTYPE), w.astype(_CONV_COMPUTE_DTYPE),
        window_strides=(stride, stride),
        padding=[(padding, padding), (padding, padding)],
        dimension_numbers=('NHWC', 'HWIO', 'NHWC'),
        feature_group_count=groups,
        preferred_element_type=jnp.float32)


def _batchnorm(x, p, eps=1e-3):
    gamma, beta, mean, var = p
    inv = gamma / jnp.sqrt(var + eps)
    return x * inv + (beta - mean * inv)   # broadcast on channel-last axis


def _hardswish(x):
    return x * jnp.clip(x + 3.0, 0.0, 6.0) / 6.0


def _hardsigmoid(x):
    return jnp.clip(x + 3.0, 0.0, 6.0) / 6.0


def _relu(x):
    return jnp.maximum(x, 0.0)


def _make_divisible(v, divisor=8, min_value=None):
    if min_value is None:
        min_value = divisor
    new_v = max(min_value, int(v + divisor / 2) // divisor * divisor)
    if new_v < 0.9 * v:
        new_v += divisor
    return new_v


class _ParamGen:
    def __init__(self, key):
        self.key = key

    def conv(self, out_c, in_c_per_group, kh, kw):
        self.key, sub = jax.random.split(self.key)
        fan_in = in_c_per_group * kh * kw
        std = (2.0 / fan_in) ** 0.5
        # HWIO layout
        return std * jax.random.normal(sub, (kh, kw, in_c_per_group, out_c),
                                       jnp.float32)

    def bn(self, c):
        return (jnp.ones((c,), jnp.float32), jnp.zeros((c,), jnp.float32),
                jnp.zeros((c,), jnp.float32), jnp.ones((c,), jnp.float32))


# (in_c, kernel, expanded_c, out_c, use_se, activation, stride) for features[1..11]
_MBV3_SMALL_CFGS = [
    (16, 3, 16, 16, True,  'RE', 2),
    (16, 3, 72, 24, False, 'RE', 2),
    (24, 3, 88, 24, False, 'RE', 1),
    (24, 5, 96, 40, True,  'HS', 2),
    (40, 5, 240, 40, True, 'HS', 1),
    (40, 5, 240, 40, True, 'HS', 1),
    (40, 5, 120, 48, True, 'HS', 1),
    (48, 5, 144, 48, True, 'HS', 1),
    (48, 5, 288, 96, True, 'HS', 2),
    (96, 5, 576, 96, True, 'HS', 1),
    (96, 5, 576, 96, True, 'HS', 1),
]


def _conv_bn_params(gen, in_c, out_c, k, groups=1):
    return {'w': gen.conv(out_c, in_c // groups, k, k), 'bn': gen.bn(out_c)}


def _conv_bn_act(x, p, stride, k, groups=1, act=_hardswish):
    pad = (k - 1) // 2
    x = _conv2d(x, p['w'], stride=stride, padding=pad, groups=groups)
    x = _batchnorm(x, p['bn'])
    return act(x) if act is not None else x


def _se_params(gen, c, squeeze_c):
    return {'fc1_w': gen.conv(squeeze_c, c, 1, 1),
            'fc1_b': jnp.zeros((squeeze_c,), jnp.float32),
            'fc2_w': gen.conv(c, squeeze_c, 1, 1),
            'fc2_b': jnp.zeros((c,), jnp.float32)}


def _se_forward(x, p):
    s = jnp.mean(x, axis=(1, 2), keepdims=True)          # NHWC global pool
    s = _conv2d(s, p['fc1_w']) + p['fc1_b']
    s = _relu(s)
    s = _conv2d(s, p['fc2_w']) + p['fc2_b']
    return x * _hardsigmoid(s)


def _inverted_residual_params(gen, cfg):
    in_c, k, exp_c, out_c, use_se, _act, _stride = cfg
    p = {}
    if exp_c != in_c:
        p['expand'] = _conv_bn_params(gen, in_c, exp_c, 1)
    p['dw'] = _conv_bn_params(gen, exp_c, exp_c, k, groups=exp_c)
    if use_se:
        p['se'] = _se_params(gen, exp_c, _make_divisible(exp_c // 4, 8))
    p['project'] = _conv_bn_params(gen, exp_c, out_c, 1)
    return p


def _inverted_residual(x, p, cfg):
    in_c, k, exp_c, out_c, use_se, act_name, stride = cfg
    act = _hardswish if act_name == 'HS' else _relu
    h = x
    if 'expand' in p:
        h = _conv_bn_act(h, p['expand'], 1, 1, act=act)
    h = _conv_bn_act(h, p['dw'], stride, k, groups=exp_c, act=act)
    if use_se:
        h = _se_forward(h, p['se'])
    h = _conv_bn_act(h, p['project'], 1, 1, act=None)
    if stride == 1 and in_c == out_c:
        h = h + x
    return h


def init_params(key):
    gen = _ParamGen(key)
    return {
        'stem':   _conv_bn_params(gen, 3, 16, 3),                        # features[0]
        'blocks': [_inverted_residual_params(gen, c) for c in _MBV3_SMALL_CFGS],
        'last':   _conv_bn_params(gen, 96, 576, 1),                      # features[12]
    }


def forward_once(params, x_nchw):
    """Mirrors DeepKLD_mobileV3.forward_once -> [x, h1, h2, h3, h4, h5] (NCHW)."""
    blocks, cfgs = params['blocks'], _MBV3_SMALL_CFGS
    to_nchw = lambda t: jnp.transpose(t, (0, 3, 1, 2))
    h = jnp.transpose(x_nchw, (0, 2, 3, 1))                              # -> NHWC
    h = _conv_bn_act(h, params['stem'], 2, 3, act=_hardswish)            # features[0]
    for i in range(0, 3):                                                # features[1..3]
        h = _inverted_residual(h, blocks[i], cfgs[i])
    h1 = h
    for i in range(3, 6):                                                # features[4..6]
        h = _inverted_residual(h, blocks[i], cfgs[i])
    h2 = h
    for i in range(6, 8):                                                # features[7..8]
        h = _inverted_residual(h, blocks[i], cfgs[i])
    h3 = h
    for i in range(8, 11):                                               # features[9..11]
        h = _inverted_residual(h, blocks[i], cfgs[i])
    h4 = h
    h5 = _conv_bn_act(h, params['last'], 1, 1, act=_hardswish)           # features[12]
    return [x_nchw, to_nchw(h1), to_nchw(h2), to_nchw(h3),
            to_nchw(h4), to_nchw(h5)]


# =============================================================================
# DeepKLD forward
# =============================================================================
def deep_kld_forward(params, x, y, as_loss=False):
    assert x.shape == y.shape
    # Single backbone pass on batch [x; y] (BN uses fixed stats and SE pools
    # per-sample, so this is mathematically identical to two separate passes).
    n = x.shape[0]
    feats = forward_once(params, jnp.concatenate([x, y], axis=0))
    feats0 = [f[:n] for f in feats]
    feats1 = [f[n:] for f in feats]
    # One fused Pallas launch computes sum over layers of KL_distance_k.
    score = fused_kl_distance(feats0, feats1, win=_WINDOW) / len(feats)
    if as_loss:
        return score
    return jnp.log(score + 1.0) ** 0.25


if __name__ == "__main__":
    key = jax.random.PRNGKey(0)
    kp, kx, ky = jax.random.split(key, 3)
    params = init_params(kp)

    x = jax.random.uniform(kx, (1, 3, 64, 64), jnp.float32)
    y = jax.random.uniform(ky, (1, 3, 64, 64), jnp.float32)

    fwd = jax.jit(functools.partial(deep_kld_forward, as_loss=False))
    out = jax.block_until_ready(fwd(params, x, y))
    assert out.shape == () and bool(jnp.isfinite(out)), out
    print("KERNEL_OK")
</pallas_src>

<mosaic_0001>
module attributes {stable_mosaic.version = 11 : i64} {
  func.func @_kld_kernel(%arg0: i32, %arg1: memref<64x1024xf32, #tpu.memory_space<vmem>>, %arg2: memref<64x1024xf32, #tpu.memory_space<vmem>>, %arg3: memref<1x1024xf32, #tpu.memory_space<vmem>>, %arg4: memref<1x1xf32, #tpu.memory_space<smem>>, %arg5: memref<1x1024xf32, #tpu.memory_space<vmem>>) attributes {dimension_semantics = [#tpu.dimension_semantics<arbitrary>], iteration_bounds = array<i64: 1>, scalar_prefetch = 0 : i64, scratch_operands = 1 : i64, tpu.core_type = #tpu.core_type<tc>, window_params = [{transform_indices = @transform_0, window_bounds = array<i64: 64, 1024>}, {transform_indices = @transform_1, window_bounds = array<i64: 64, 1024>}, {transform_indices = @transform_2, window_bounds = array<i64: 1, 1024>}, {transform_indices = @transform_3, window_bounds = array<i64: 1, 1>}]} {
    %c0_i32 = arith.constant 0 : i32
    %0 = arith.cmpi eq, %arg0, %c0_i32 : i32
    %1 = arith.extui %0 : i1 to i32
    %c0_i32_0 = arith.constant 0 : i32
    %2 = arith.cmpi ne, %1, %c0_i32_0 : i32
    scf.if %2 {
      %cst_21 = arith.constant 0.000000e+00 : f32
      %54 = vector.broadcast %cst_21 : f32 to vector<1x1024xf32>
      %c0_22 = arith.constant 0 : index
      %c0_23 = arith.constant 0 : index
      %55 = vector.load %arg5[%c0_22, %c0_23] : memref<1x1024xf32, #tpu.memory_space<vmem>>, vector<1x1024xf32>
      tpu.vector_store %arg5[%c0_22, %c0_23], %54 {strides = array<i32>} : memref<1x1024xf32, #tpu.memory_space<vmem>>, vector<1x1024xf32>,
    } else {
    }
    %c0 = arith.constant 0 : index
    %c0_1 = arith.constant 0 : index
    %3 = vector.load %arg1[%c0, %c0_1] : memref<64x1024xf32, #tpu.memory_space<vmem>>, vector<64x1024xf32>
    %c0_2 = arith.constant 0 : index
    %c0_3 = arith.constant 0 : index
    %4 = vector.load %arg2[%c0_2, %c0_3] : memref<64x1024xf32, #tpu.memory_space<vmem>>, vector<64x1024xf32>
    %cst = arith.constant 1.000000e+00 : f32
    %5 = vector.broadcast %cst : f32 to vector<1x64xf32>
    %cst_4 = arith.constant dense<0xFF800000> : vector<1024xf32>
    %6 = vector.multi_reduction <maximumf>, %3, %cst_4 [0] : vector<64x1024xf32> to vector<1024xf32>
    %7 = vector.shape_cast %6 : vector<1024xf32> to vector<1x1024xf32>
    %8 = vector.broadcast %7 : vector<1x1024xf32> to vector<64x1024xf32>
    %9 = arith.subf %3, %8 : vector<64x1024xf32>
    %10 = math.exp %9 : vector<64x1024xf32>
    %cst_5 = arith.constant dense<0.000000e+00> : vector<1x1024xf32>
    %11 = tpu.matmul %5, %10, %cst_5 {dimension_numbers = #tpu.dot_dimension_numbers<[1], [0], [0], [1], [0, 0, 1, 1], [], []>} : vector<1x64xf32>, vector<64x1024xf32>, vector<1x1024xf32> -> vector<1x1024xf32>
    %12 = vector.broadcast %11 : vector<1x1024xf32> to vector<64x1024xf32>
    %13 = arith.divf %10, %12 : vector<64x1024xf32>
    %14 = math.log %11 : vector<1x1024xf32>
    %15 = vector.broadcast %14 : vector<1x1024xf32> to vector<64x1024xf32>
    %16 = arith.subf %9, %15 : vector<64x1024xf32>
    %cst_6 = arith.constant dense<0xFF800000> : vector<1024xf32>
    %17 = vector.multi_reduction <maximumf>, %4, %cst_6 [0] : vector<64x1024xf32> to vector<1024xf32>
    %18 = vector.shape_cast %17 : vector<1024xf32> to vector<1x1024xf32>
    %19 = vector.broadcast %18 : vector<1x1024xf32> to vector<64x1024xf32>
    %20 = arith.subf %4, %19 : vector<64x1024xf32>
    %21 = math.exp %20 : vector<64x1024xf32>
    %cst_7 = arith.constant dense<0.000000e+00> : vector<1x1024xf32>
    %22 = tpu.matmul %5, %21, %cst_7 {dimension_numbers = #tpu.dot_dimension_numbers<[1], [0], [0], [1], [0, 0, 1, 1], [], []>} : vector<1x64xf32>, vector<64x1024xf32>, vector<1x1024xf32> -> vector<1x1024xf32>
    %23 = vector.broadcast %22 : vector<1x1024xf32> to vector<64x1024xf32>
    %24 = arith.divf %21, %23 : vector<64x1024xf32>
    %25 = math.log %22 : vector<1x1024xf32>
    %26 = vector.broadcast %25 : vector<1x1024xf32> to vector<64x1024xf32>
    %27 = arith.subf %20, %26 : vector<64x1024xf32>
    %28 = arith.subf %13, %24 : vector<64x1024xf32>
    %29 = arith.subf %16, %27 : vector<64x1024xf32>
    %30 = arith.mulf %28, %29 : vector<64x1024xf32>
    %cst_8 = arith.constant dense<0.000000e+00> : vector<1x1024xf32>
    %31 = tpu.matmul %5, %30, %cst_8 {dimension_numbers = #tpu.dot_dimension_numbers<[1], [0], [0], [1], [0, 0, 1, 1], [], []>} : vector<1x64xf32>, vector<64x1024xf32>, vector<1x1024xf32> -> vector<1x1024xf32>
    %cst_9 = arith.constant 5.000000e-01 : f32
    %32 = vector.broadcast %cst_9 : f32 to vector<1x1024xf32>
    %33 = arith.mulf %32, %31 : vector<1x1024xf32>
    %34 = arith.subf %3, %4 : vector<64x1024xf32>
    %35 = arith.mulf %34, %34 : vector<64x1024xf32>
    %cst_10 = arith.constant dense<0.000000e+00> : vector<1x1024xf32>
    %36 = tpu.matmul %5, %35, %cst_10 {dimension_numbers = #tpu.dot_dimension_numbers<[1], [0], [0], [1], [0, 0, 1, 1], [], []>} : vector<1x64xf32>, vector<64x1024xf32>, vector<1x1024xf32> -> vector<1x1024xf32>
    %cst_11 = arith.constant 1.000000e+01 : f32
    %37 = vector.broadcast %cst_11 : f32 to vector<1x1024xf32>
    %38 = arith.addf %33, %37 : vector<1x1024xf32>
    %cst_12 = arith.constant 5.000000e-01 : f32
    %39 = vector.broadcast %cst_12 : f32 to vector<1x1024xf32>
    %40 = arith.divf %39, %38 : vector<1x1024xf32>
    %41 = math.exp %40 : vector<1x1024xf32>
    %42 = arith.mulf %38, %38 : vector<1x1024xf32>
    %43 = arith.divf %41, %42 : vector<1x1024xf32>
    %c0_13 = arith.constant 0 : index
    %c0_14 = arith.constant 0 : index
    %44 = vector.load %arg5[%c0_13, %c0_14] : memref<1x1024xf32, #tpu.memory_space<vmem>>, vector<1x1024xf32>
    %45 = arith.mulf %36, %43 : vector<1x1024xf32>
    %46 = arith.addf %33, %45 : vector<1x1024xf32>
    %c0_15 = arith.constant 0 : index
    %c0_16 = arith.constant 0 : index
    %47 = vector.load %arg3[%c0_15, %c0_16] : memref<1x1024xf32, #tpu.memory_space<vmem>>, vector<1x1024xf32>
    %48 = arith.mulf %46, %47 : vector<1x1024xf32>
    %49 = arith.addf %44, %48 : vector<1x1024xf32>
    %c0_17 = arith.constant 0 : index
    %c0_18 = arith.constant 0 : index
    %50 = vector.load %arg5[%c0_17, %c0_18] : memref<1x1024xf32, #tpu.memory_space<vmem>>, vector<1x1024xf32>
    tpu.vector_store %arg5[%c0_17, %c0_18], %49 {strides = array<i32>} : memref<1x1024xf32, #tpu.memory_space<vmem>>, vector<1x1024xf32>,
    %c0_i32_19 = arith.constant 0 : i32
    %51 = arith.cmpi eq, %arg0, %c0_i32_19 : i32
    %52 = arith.extui %51 : i1 to i32
    %c0_i32_20 = arith.constant 0 : i32
    %53 = arith.cmpi ne, %52, %c0_i32_20 : i32
    scf.if %53 {
      %c0_21 = arith.constant 0 : index
      %c0_22 = arith.constant 0 : index
      %54 = vector.load %arg5[%c0_21, %c0_22] : memref<1x1024xf32, #tpu.memory_space<vmem>>, vector<1x1024xf32>
      %55 = vector.shape_cast %54 : vector<1x1024xf32> to vector<1x1x1024xf32>
      %cst_23 = arith.constant dense<0.000000e+00> : vector<1xf32>
      %56 = vector.multi_reduction <add>, %55, %cst_23 [1, 2] : vector<1x1x1024xf32> to vector<1xf32>
      %57 = vector.shape_cast %56 : vector<1xf32> to vector<1x1x1xf32>
      %58 = vector.extract %57[0, 0, 0] : f32 from vector<1x1x1xf32>
      %c0_24 = arith.constant 0 : index
      %c0_25 = arith.constant 0 : index
      %59 = memref.load %arg4[%c0_24, %c0_25] : memref<1x1xf32, #tpu.memory_space<smem>>
      memref.store %58, %arg4[%c0_24, %c0_25] : memref<1x1xf32, #tpu.memory_space<smem>>
    } else {
    }
    return
  }
  func.func @transform_0(%arg0: i32) -> (i32, i32) {
    %c0_i32 = arith.constant 0 : i32
    %c0_i32_0 = arith.constant 0 : i32
    return %c0_i32, %arg0 : i32, i32
  }
  func.func @transform_1(%arg0: i32) -> (i32, i32) {
    %c0_i32 = arith.constant 0 : i32
    %c0_i32_0 = arith.constant 0 : i32
    return %c0_i32, %arg0 : i32, i32
  }
  func.func @transform_2(%arg0: i32) -> (i32, i32) {
    %c0_i32 = arith.constant 0 : i32
    %c0_i32_0 = arith.constant 0 : i32
    return %c0_i32, %arg0 : i32, i32
  }
  func.func @transform_3(%arg0: i32) -> (i32, i32) {
    %c0_i32 = arith.constant 0 : i32
    %c0_i32_0 = arith.constant 0 : i32
    %c0_i32_1 = arith.constant 0 : i32
    return %c0_i32, %c0_i32_0 : i32, i32
  }
}

</mosaic_0001>

<bundles_post_ra>
// kernel: deep_kld_forward.1
= control target key start
LH: loop header
LB: loop body
LE: loop exit
PB: predicated region body
PF: predicated region fallthrough
CT: control target
= control target key end

     0   :  { %s7060_s0 = inlined_call_operand.vmem [shape: f32[64,1024], index: 0, kind: input, shape index: {}]   ;;  %s7061_s1 = inlined_call_operand.vmem [shape: f32[64,1024], index: 1, kind: input, shape index: {}]   ;;  %s7062_s2 = inlined_call_operand.vmem [shape: f32[1,1024], index: 2, kind: input, shape index: {}]   ;;  %s7063_s3 = inlined_call_operand.hbm [shape: f32[1,1], index: 3, kind: output, shape index: {}]  }
   0x1   :  { %v3236_v0 = vld [vmem:[%s7060_s0] sm:$0xff]  ;;  %v3258_v5 = vld [vmem:[%s7060_s0 + $0x8] sm:$0xff]  ;;  %v3287_v13 = vld [vmem:[%s7060_s0 + $0x10] sm:$0xff] }
   0x2   :  { %v3241_v1 = vld [vmem:[%s7060_s0 + $0x40] sm:$0xff]  ;;  %v3264_v7 = vld [vmem:[%s7060_s0 + $0x48] sm:$0xff]  ;;  %v3292_v14 = vld [vmem:[%s7060_s0 + $0x50] sm:$0xff] }
   0x3   :  { %v3246_v2 = vld [vmem:[%s7060_s0 + $0x80] sm:$0xff]  ;;  %v148_v3 = vmax.f32 %v3236_v0, %v3241_v1  ;;  %v3269_v8 = vld [vmem:[%s7060_s0 + $0x88] sm:$0xff]  ;;  %v161_v10 = vmax.f32 %v3258_v5, %v3264_v7  ;;  %v3303_v17 = vld [vmem:[%s7060_s0 + $0x90] sm:$0xff]  ;;  %v174_v18 = vmax.f32 %v3287_v13, %v3292_v14 }
   0x4   :  { %v3253_v4 = vld [vmem:[%s7060_s0 + $0xc0] sm:$0xff]  ;;  %v3282_v12 = vld [vmem:[%s7060_s0 + $0xc8] sm:$0xff]  ;;  %v3321_v22 = vld [vmem:[%s7060_s0 + $0xd0] sm:$0xff] }
   0x5   :  { %v149_v6 = vmax.f32 %v148_v3, %v3246_v2  ;;  %v3274_v9 = vld [vmem:[%s7060_s0 + $0x100] sm:$0xff]  ;;  %v162_v16 = vmax.f32 %v161_v10, %v3269_v8  ;;  %v3316_v21 = vld [vmem:[%s7060_s0 + $0x108] sm:$0xff]  ;;  %v175_v24 = vmax.f32 %v174_v18, %v3303_v17  ;;  %v3328_v25 = vld [vmem:[%s7060_s0 + $0x18] sm:$0xff] }
   0x6   :  { %v3297_v15 = vld [vmem:[%s7060_s0 + $0x140] sm:$0xff]  ;;  %v3333_v26 = vld [vmem:[%s7060_s0 + $0x58] sm:$0xff]  ;;  %v3349_v30 = vld [vmem:[%s7060_s0 + $0x148] sm:$0xff] }
   0x7   :  { %v150_v11 = vmax.f32 %v149_v6, %v3253_v4  ;;  %v3310_v19 = vld [vmem:[%s7060_s0 + $0x180] sm:$0xff]  ;;  %v163_v23 = vmax.f32 %v162_v16, %v3282_v12  ;;  %v3338_v27 = vld [vmem:[%s7060_s0 + $0x98] sm:$0xff]  ;;  %v3354_v31 = vld [vmem:[%s7060_s0 + $0x110] sm:$0xff]  ;;  %v187_v32 = vmax.f32 %v3328_v25, %v3333_v26  ;;  %v176_v35 = vmax.f32 %v175_v24, %v3321_v22 }
   0x8   :  { %v3343_v28 = vld [vmem:[%s7060_s0 + $0x1c0] sm:$0xff]  ;;  %v3361_v33 = vld [vmem:[%s7060_s0 + $0x188] sm:$0xff]  ;;  %v3368_v36 = vld [vmem:[%s7060_s0 + $0xd8] sm:$0xff] }
   0x9   :  { %v151_v20 = vmax.f32 %v150_v11, %v3274_v9  ;;  %v164_v34 = vmax.f32 %v163_v23, %v3316_v21  ;;  %v3373_v37 = vld [vmem:[%s7060_s0 + $0x20] sm:$0xff]  ;;  %v3379_v39 = vld [vmem:[%s7060_s0 + $0x150] sm:$0xff]  ;;  %v188_v40 = vmax.f32 %v187_v32, %v3338_v27  ;;  %v3395_v43 = vld [vmem:[%s7060_s0 + $0x1c8] sm:$0xff]  ;;  %v177_v46 = vmax.f32 %v176_v35, %v3354_v31 }
   0xa   :  { %7360 = vst [vmem:[#allocation6_spill] sm:$0xff] %v3373_v37  ;;  %v3385_v41 = vld [vmem:[%s7060_s0 + $0x60] sm:$0xff]  ;;  %v3401_v45 = vld [vmem:[%s7060_s0 + $0x190] sm:$0xff]  ;;  %v3407_v47 = vld [vmem:[%s7060_s0 + $0x118] sm:$0xff] }
   0xb   :  { %v152_v29 = vmax.f32 %v151_v20, %v3297_v15  ;;  %7361 = vst [vmem:[#allocation7_spill] sm:$0xff] %v3385_v41  ;;  %v3390_v42 = vld [vmem:[%s7060_s0 + $0xa0] sm:$0xff]  ;;  %v165_v44 = vmax.f32 %v164_v34, %v3349_v30  ;;  %v200_v48 = vmax.f32 %v3373_v37, %v3385_v41  ;;  %v189_v50 = vmax.f32 %v188_v40, %v3368_v36  ;;  %v3421_v52 = vld [vmem:[%s7060_s0 + $0x28] sm:$0xff]  ;;  %v3432_v55 = vld [vmem:[%s7060_s0 + $0x1d0] sm:$0xff] }
   0xc   :  { %7362 = vst [vmem:[#allocation8_spill] sm:$0xff] %v3390_v42  ;;  %v3416_v51 = vld [vmem:[%s7060_s0 + $0xe0] sm:$0xff]  ;;  %v3426_v53 = vld [vmem:[%s7060_s0 + $0x68] sm:$0xff]  ;;  %v178_v56 = vmax.f32 %v177_v46, %v3379_v39  ;;  %v3438_v57 = vld [vmem:[%s7060_s0 + $0x158] sm:$0xff] }
   0xd   :  { %v153_v38 = vmax.f32 %v152_v29, %v3310_v19  ;;  %7363 = vst [vmem:[#allocation9_spill] sm:$0xff] %v3421_v52  ;;  %v166_v54 = vmax.f32 %v165_v44, %v3361_v33  ;;  %v201_v58 = vmax.f32 %v200_v48, %v3390_v42  ;;  %v3444_v59 = vld [vmem:[%s7060_s0 + $0xa8] sm:$0xff]  ;;  %v213_v60 = vmax.f32 %v3421_v52, %v3426_v53  ;;  %v3451_v62 = vld [vmem:[%s7060_s0 + $0x198] sm:$0xff]  ;;  %v3457_v3 = vld [vmem:[%s7060_s0 + $0x120] sm:$0xff] }
   0xe   :  { %7364 = vst [vmem:[#allocation10_spill] sm:$0xff] %v3426_v53  ;;  %v190_v63 = vmax.f32 %v189_v50, %v3407_v47  ;;  %v3462_v6 = vld [vmem:[%s7060_s0 + $0xe8] sm:$0xff]  ;;  %v179_v11 = vmax.f32 %v178_v56, %v3401_v45  ;;  %v3471_v20 = vld [vmem:[%s7060_s0 + $0x30] sm:$0xff]  ;;  %v3487_v34 = vld [vmem:[%s7060_s0 + $0x160] sm:$0xff] }
   0xf   :  { %v154_v49 = vmax.f32 %v153_v38, %v3343_v28  ;;  %7365 = vst [vmem:[#allocation11_spill] sm:$0xff] %v3444_v59  ;;  %v167_v10 = vmax.f32 %v166_v54, %v3395_v43  ;;  %v202_v16 = vmax.f32 %v201_v58, %v3416_v51  ;;  %v214_v18 = vmax.f32 %v213_v60, %v3444_v59  ;;  %v3476_v23 = vld [vmem:[%s7060_s0 + $0x70] sm:$0xff]  ;;  %v3492_v35 = vld [vmem:[%s7060_s0 + $0x128] sm:$0xff]  ;;  %v3500_v46 = vld [vmem:[%s7060_s0 + $0x1d8] sm:$0xff] }
  0x10   :  { %7366 = vst [vmem:[#allocation12_spill] sm:$0xff] %v3462_v6  ;;  %v3481_v24 = vld [vmem:[%s7060_s0 + $0xb0] sm:$0xff]  ;;  %v191_v32 = vmax.f32 %v190_v63, %v3438_v57  ;;  %v226_v38 = vmax.f32 %v3471_v20, %v3476_v23  ;;  %v180_v44 = vmax.f32 %v179_v11, %v3432_v55  ;;  %v3512_v54 = vld [vmem:[%s7060_s0 + $0x38] sm:$0xff]  ;;  %v3518_v60 = vld [vmem:[%s7060_s0 + $0x1a0] sm:$0xff] }
  0x11   :  { %v155_v61 = vrot.slane %v154_v49, 4  ;;  %7367 = vst [vmem:[#allocation13_spill] sm:$0xff] %v3471_v20  ;;  %v168_v40 = vrot.slane %v167_v10, 4  ;;  %v203_v48 = vmax.f32 %v202_v16, %v3457_v3  ;;  %v3507_v50 = vld [vmem:[%s7060_s0 + $0xf0] sm:$0xff]  ;;  %v3529_v11 = vld [vmem:[%s7060_s0 + $0x78] sm:$0xff] }
  0x12   :  { %7368 = vst [vmem:[#allocation14_spill] sm:$0xff] %v3476_v23  ;;  %v192_v58 = vmax.f32 %v191_v32, %v3451_v62  ;;  %v227_v63 = vmax.f32 %v226_v38, %v3481_v24  ;;  %v3536_v52 = vld [vmem:[%s7060_s0 + $0x130] sm:$0xff]  ;;  %v3541_v38 = vld [vmem:[%s7060_s0 + $0xb8] sm:$0xff] }
  0x13   :  { %7369 = vst [vmem:[#allocation15_spill] sm:$0xff] %v3481_v24  ;;  %v156_v29 = vmax.f32 %v154_v49, %v155_v61  ;;  %v215_v49 = vmax.f32 %v214_v18, %v3462_v6  ;;  %v3523_v61 = vld [vmem:[%s7060_s0 + $0x168] sm:$0xff]  ;;  %v169_v16 = vmax.f32 %v167_v10, %v168_v40  ;;  %v181_v18 = vrot.slane %v180_v44, 4  ;;  %v3547_v10 = vld [vmem:[%s7060_s0 + $0x1e0] sm:$0xff] }
  0x14   :  { %7370 = vst [vmem:[#allocation16_spill] sm:$0xff] %v3507_v50  ;;  %v204_v32 = vmax.f32 %v203_v48, %v3487_v34  ;;  %v193_v23 = vmax.f32 %v192_v58, %v3500_v46  ;;  %v3552_v40 = vld [vmem:[%s7060_s0 + $0x1a8] sm:$0xff]  ;;  %v228_v48 = vmax.f32 %v227_v63, %v3507_v50 }
  0x15   :  { %7371 = vst [vmem:[#allocation17_spill] sm:$0xff] %v3512_v54  ;;  %v157_v56 = vrot.slane %v156_v29, 2  ;;  %v216_v20 = vmax.f32 %v215_v49, %v3492_v35  ;;  %v239_v49 = vmax.f32 %v3512_v54, %v3529_v11 }
  0x16   :  { %7372 = vst [vmem:[#allocation18_spill] sm:$0xff] %v3529_v11 }
  0x17   :  { %7373 = vst [vmem:[#allocation19_spill] sm:$0xff] %v3541_v38  ;;  %v158_v37 = vmax.f32 %v156_v29, %v157_v56 }
  0x18   :  { %8 = vsyncpa [#allocation4], 0  ;;  %v170_v53 = vrot.slane %v169_v16, 2  ;;  %v182_v29 = vmax.f32 %v180_v44, %v181_v18  ;;  %v205_v56 = vmax.f32 %v204_v32, %v3518_v60  ;;  %v217_v58 = vmax.f32 %v216_v20, %v3523_v61  ;;  %v3562_v41 = vld [vmem:[%s7060_s0 + $0x170] sm:$0xff]  ;;  %v3570_v63 = vld [vmem:[%s7060_s0 + $0xf8] sm:$0xff]  ;;  %s2655_s12 = sshll.u32 %s7063_s3, 4  ;;  %s2656_s12 = int_to_ptr.hbm [resolvable:$true] %s2655_s12 }
  0x19   :  { %v159_v24 = vrot.slane %v158_v37, 1  ;;  %v194_v59 = vrot.slane %v193_v23, 4  ;;  %v3565_v42 = vmax.f32 %v228_v48, %v3536_v52  ;;  %v3573_v44 = vmax.f32 %v239_v49, %v3541_v38  ;;  %v3584_v48 = vld [vmem:[%s7060_s0 + $0x1e8] sm:$0xff]  ;;  %s3212_s14 = smov [#allocation3]  }
  0x1a   :  { %v171_v18 = vmax.f32 %v169_v16, %v170_v53  ;;  %v183_v20 = vrot.slane %v182_v29, 2  ;;  %v3576_v32 = vmax.f32 %v205_v56, %v3547_v10  ;;  %v218_v54 = vmax.f32 %v217_v58, %v3552_v40 }
  0x1b   :  { %v3579_v11 = vmax.f32 %v158_v37, %v159_v24  ;;  %v195_v50 = vmax.f32 %v193_v23, %v194_v59  ;;  %vm444_vm0 = vcmask 523264  }
  0x1c   :  { %v172_v49 = vrot.slane %v171_v18, 1  ;;  %v184_v38 = vmax.f32 %v182_v29, %v183_v20  ;;  %v3610_v20 = vmax.f32 %v218_v54, %v3584_v48 }
  0x1d   :  { %v3593_v37 = vsub.f32 %v3343_v28, %v3579_v11  ;;  %v196_v59 = vrot.slane %v195_v50, 2  ;;  %v3597_v23 = vsub.f32 %v3310_v19, %v3579_v11  ;;  %v3601_v24 = vsub.f32 %v3297_v15, %v3579_v11 }
  0x1e   :  { %v3603_v56 = vmax.f32 %v171_v18, %v172_v49  ;;  %v185_v29 = vrot.slane %v184_v38, 1  ;;  %v3607_v58 = vsub.f32 %v3274_v9, %v3579_v11 }
  0x1f   :  { %7374 = vst [vmem:[#allocation20_spill] sm:$0xff] %v3593_v37  ;;  %v428_v28 = vmul.f32 1.442695, %v3593_v37  ;;  %v197_v16 = vmax.f32 %v195_v50, %v196_v59  ;;  %v412_v19 = vmul.f32 1.442695, %v3597_v23  ;;  %v3632_v59 = vsub.f32 %v3253_v4, %v3579_v11 }
  0x20   :  { %7375 = vst [vmem:[#allocation21_spill] sm:$0xff] %v3597_v23  ;;  %v396_v6 = vmul.f32 1.442695, %v3601_v24  ;;  %v3617_v15 = vsub.f32 %v3395_v43, %v3603_v56  ;;  %v3619_v18 = vmax.f32 %v184_v38, %v185_v29  ;;  %v3623_v9 = vsub.f32 %v3361_v33, %v3603_v56 }
  0x21   :  { %7376 = vst [vmem:[#allocation22_spill] sm:$0xff] %v3601_v24  ;;  %v3627_v54 = vsub.f32 %v3349_v30, %v3603_v56  ;;  %2701 = vpow2.f32 %v428_v28  ;;  %v198_v50 = vrot.slane %v197_v16, 1  ;;  %v380_v49 = vmul.f32 1.442695, %v3607_v58 }
  0x22   :  { %7377 = vst [vmem:[#allocation23_spill] sm:$0xff] %v3607_v58  ;;  %v430_v43 = vmul.f32 1.442695, %v3617_v15  ;;  %v3637_v38 = vsub.f32 %v3432_v55, %v3619_v18  ;;  %2703 = vpow2.f32 %v412_v19  ;;  %v414_v33 = vmul.f32 1.442695, %v3623_v9 }
  0x23   :  { %7378 = vst [vmem:[#allocation24_spill] sm:$0xff] %v3617_v15  ;;  %v3640_v29 = vmax.f32 %v197_v16, %v198_v50  ;;  %v3644_v30 = vsub.f32 %v3401_v45, %v3619_v18  ;;  %2705 = vpow2.f32 %v396_v6  ;;  %v3648_v4 = vsub.f32 %v3316_v21, %v3603_v56 }
  0x24   :  { %7379 = vst [vmem:[#allocation25_spill] sm:$0xff] %v3623_v9  ;;  %2707 = vpow2.f32 %v430_v43  ;;  %v432_v28 = vmul.f32 1.442695, %v3637_v38  ;;  %v398_v55 = vmul.f32 1.442695, %v3627_v54  ;;  %v3654_v19 = vsub.f32 %v3379_v39, %v3619_v18 }
  0x25   :  { %7380 = vst [vmem:[#allocation26_spill] sm:$0xff] %v3627_v54  ;;  %v3658_v16 = vsub.f32 %v3500_v46, %v3640_v29  ;;  %2709 = vpow2.f32 %v414_v33  ;;  %v416_v45 = vmul.f32 1.442695, %v3644_v30  ;;  %v3663_v21 = vsub.f32 %v3451_v62, %v3640_v29 }
  0x26   :  { %7381 = vst [vmem:[#allocation27_spill] sm:$0xff] %v3632_v59  ;;  %2711 = vpow2.f32 %v432_v28  ;;  %v400_v6 = vmul.f32 1.442695, %v3654_v19  ;;  %v3668_v50 = vsub.f32 %v3438_v57, %v3640_v29  ;;  %v3672_v39 = vsub.f32 %v3354_v31, %v3619_v18 }
  0x27   :  { %7382 = vst [vmem:[#allocation28_spill] sm:$0xff] %v3637_v38  ;;  %v3674_v46 = vpop.eup %2701  ;;  %v434_v43 = vmul.f32 1.442695, %v3658_v16  ;;  %2713 = vpow2.f32 %v416_v45  ;;  %v418_v33 = vmul.f32 1.442695, %v3663_v21  ;;  %v3680_v62 = vsub.f32 %v3407_v47, %v3640_v29  ;;  %v4461_v38 = vld [vmem:[%s7061_s1 + $0x1a0] sm:$0xff] }
  0x28   :  { %7383 = vst [vmem:[#allocation29_spill] sm:$0xff] %v3644_v30  ;;  %v3682_v28 = vpop.eup %2703  ;;  %456 = vmatpush.msra.mxu0 %v3674_v46  ;;  %2715 = vpow2.f32 %v398_v55  ;;  %v402_v57 = vmul.f32 1.442695, %v3668_v50  ;;  %v382_v31 = vmul.f32 1.442695, %v3648_v4  ;;  %v3693_v47 = vsub.f32 %v3282_v12, %v3603_v56  ;;  %v4427_v30 = vld [vmem:[%s7061_s1 + $0x160] sm:$0xff] }
  0x29   :  { %7384 = vst [vmem:[#allocation30_spill] sm:$0xff] %v3648_v4  ;;  %v384_v53 = vmul.f32 1.442695, %v3672_v39  ;;  %2717 = vpow2.f32 %v434_v43  ;;  %v364_v45 = vmul.f32 1.442695, %v3632_v59  ;;  %v3708_v43 = vsub.f32 %v3246_v2, %v3579_v11 }
  0x2a   :  { %7385 = vst [vmem:[#allocation31_spill] sm:$0xff] %v3654_v19  ;;  %v3688_v19 = vpop.eup %2705  ;;  %457 = vmatpush.msra.mxu0 %v3682_v28  ;;  %2719 = vpow2.f32 %v418_v33  ;;  %v3712_v12 = vsub.f32 %v3269_v8, %v3603_v56  ;;  %v366_v33 = vmul.f32 1.442695, %v3693_v47 }
  0x2b   :  { %7386 = vst [vmem:[#allocation32_spill] sm:$0xff] %v3658_v16  ;;  %v3699_v55 = vpop.eup %2707  ;;  %2721 = vpow2.f32 %v400_v6  ;;  %v348_v4 = vmul.f32 1.442695, %v3708_v43 }
  0x2c   :  { %7387 = vst [vmem:[#allocation33_spill] sm:$0xff] %v3663_v21  ;;  %v3697_v21 = vsub.f32 %v3321_v22, %v3619_v18  ;;  %476 = vmatpush.msra.mxu1 %v3699_v55  ;;  %v386_v22 = vmul.f32 1.442695, %v3680_v62  ;;  %458 = vmatpush.msra.mxu0 %v3688_v19  ;;  %2723 = vpow2.f32 %v402_v57  ;;  %v3740_v57 = vsub.f32 %v3241_v1, %v3579_v11 }
  0x2d   :  { %7388 = vst [vmem:[#allocation34_spill] sm:$0xff] %v3668_v50  ;;  %v3714_v50 = vpop.eup %2709  ;;  %2725 = vpow2.f32 %v380_v49  ;;  %v3750_v49 = vsub.f32 %v3292_v14, %v3619_v18  ;;  %v3769_v14 = vld [vmem:[%s7060_s0 + $0x1b0] sm:$0xff] }
  0x2e   :  { %7389 = vst [vmem:[#allocation35_spill] sm:$0xff] %v3672_v39  ;;  %v3704_v39 = vsub.f32 %v3368_v36, %v3640_v29  ;;  %v3721_v36 = vsub.f32 %v3303_v17, %v3619_v18  ;;  %v3723_v59 = vpop.eup %2711  ;;  %v368_v2 = vmul.f32 1.442695, %v3697_v21  ;;  %477 = vmatpush.msra.mxu1 %v3714_v50  ;;  %v350_v17 = vmul.f32 1.442695, %v3712_v12 }
  0x2f   :  { %7390 = vst [vmem:[#allocation36_spill] sm:$0xff] %v3674_v46  ;;  %v3729_v6 = vpop.eup %2713  ;;  %496 = vmatpush.msra.mxu2 %v3723_v59  ;;  %2727 = vpow2.f32 %v382_v31  ;;  %v3764_v31 = vsub.f32 %v3236_v0, %v3579_v11 }
  0x30   :  { %7391 = vst [vmem:[#allocation37_spill] sm:$0xff] %v3680_v62  ;;  %v370_v8 = vmul.f32 1.442695, %v3704_v39  ;;  %v3736_v62 = vsub.f32 %v3338_v27, %v3640_v29  ;;  %2729 = vpow2.f32 %v384_v53  ;;  %v352_v1 = vmul.f32 1.442695, %v3721_v36 }
  0x31   :  { %7392 = vst [vmem:[#allocation38_spill] sm:$0xff] %v3682_v28  ;;  %497 = vmatpush.msra.mxu2 %v3729_v6  ;;  %2731 = vpow2.f32 %v386_v22  ;;  %v3775_v53 = vmul.f32 1.442695, %v3740_v57  ;;  %v3794_v22 = vsub.f32 %v3287_v13, %v3619_v18  ;;  %v3811_v13 = vld [vmem:[%s7060_s0 + $0x1f0] sm:$0xff]  ;;  %v3816_v18 = vld [vmem:[%s7060_s0 + $0x138] sm:$0xff] }
  0x32   :  { %7393 = vst [vmem:[#allocation39_spill] sm:$0xff] %v3688_v19  ;;  %2733 = vpow2.f32 %v364_v45  ;;  %v3802_v45 = vsub.f32 %v3328_v25, %v3640_v29  ;;  %v3821_v25 = vmul.f32 1.442695, %v3764_v31 }
  0x33   :  { %7394 = vst [vmem:[#allocation40_spill] sm:$0xff] %v3693_v47  ;;  %2735 = vpow2.f32 %v366_v33  ;;  %v3872_v47 = vld [vmem:[%s7061_s1 + $0x48] sm:$0xff] }
  0x34   :  { %7395 = vst [vmem:[#allocation41_spill] sm:$0xff] %v3697_v21  ;;  %v3746_v21 = vsub.f32 %v3264_v7, %v3603_v56  ;;  %v354_v7 = vmul.f32 1.442695, %v3736_v62  ;;  %2737 = vpow2.f32 %v368_v2  ;;  %v3835_v2 = vmul.f32 1.442695, %v3794_v22 }
  0x35   :  { %7396 = vst [vmem:[#allocation42_spill] sm:$0xff] %v3699_v55  ;;  %2739 = vpow2.f32 %v370_v8  ;;  %v3851_v8 = vld [vmem:[%s7061_s1 + $0x40] sm:$0xff] }
  0x36   :  { %7397 = vst [vmem:[#allocation43_spill] sm:$0xff] %v3704_v39  ;;  %v3742_v39 = vpop.eup %2715  ;;  %2741 = vpow2.f32 %v348_v4  ;;  %v4388_v55 = vld [vmem:[%s7061_s1 + $0x120] sm:$0xff] }
  0x37   :  { %7398 = vst [vmem:[#allocation44_spill] sm:$0xff] %v3708_v43  ;;  %v3756_v27 = vpop.eup %2717  ;;  %478 = vmatpush.msra.mxu1 %v3742_v39  ;;  %v3790_v43 = vsub.f32 %v3258_v5, %v3603_v56  ;;  %v220_v56 = vrot.slane %v3610_v20, 4  ;;  %2743 = vpow2.f32 %v350_v17 }
  0x38   :  { %7399 = vst [vmem:[#allocation45_spill] sm:$0xff] %v3712_v12  ;;  %v3754_v12 = vsub.f32 %v3333_v26, %v3640_v29  ;;  %v3771_v26 = vpop.eup %2719  ;;  %516 = vmatpush.msra.mxu3 %v3756_v27  ;;  %v7420_v29 = vmax.f32 %v3565_v42, %v3562_v41  ;;  %v3846_v42 = vld [vmem:[%s7061_s1] sm:$0xff]  ;;  %2745 = vpow2.f32 %v352_v1  ;;  %v3904_v1 = vld [vmem:[%s7060_s0 + $0x1f8] sm:$0xff] }
  0x39   :  { %7400 = vst [vmem:[#allocation46_spill] sm:$0xff] %v3714_v50  ;;  %v3783_v0 = vpop.eup %2721  ;;  %2747 = vpow2.f32 %v354_v7 }
  0x3a   :  { %7401 = vst [vmem:[#allocation47_spill] sm:$0xff] %v3721_v36  ;;  %v3778_v36 = vmul.f32 1.442695, %v3746_v21  ;;  %v3786_v11 = vmul.f32 1.442695, %v3754_v12  ;;  %517 = vmatpush.msra.mxu3 %v3771_v26  ;;  %498 = vmatpush.msra.mxu2 %v3783_v0  ;;  %2749 = vpow2.f32 %v3775_v53 }
  0x3b   :  { %7402 = vst [vmem:[#allocation48_spill] sm:$0xff] %v3723_v59 }
  0x3c   :  { %7403 = vst [vmem:[#allocation49_spill] sm:$0xff] %v3729_v6  ;;  %2751 = vpow2.f32 %v3778_v36 }
  0x3d   :  { %7404 = vst [vmem:[#allocation50_spill] sm:$0xff] %v3736_v62  ;;  %v3781_v62 = vmul.f32 1.442695, %v3750_v49 }
  0x3e   :  { %7405 = vst [vmem:[#allocation51_spill] sm:$0xff] %v3740_v57  ;;  %v3796_v57 = vpop.eup %2723 }
  0x3f   :  { %7406 = vst [vmem:[#allocation52_spill] sm:$0xff] %v3742_v39  ;;  %v3818_v33 = vpop.eup %2725  ;;  %518 = vmatpush.msra.mxu3 %v3796_v57  ;;  %2753 = vpow2.f32 %v3781_v62 }
  0x40   :  { %7407 = vst [vmem:[#allocation53_spill] sm:$0xff] %v3746_v21  ;;  %459 = vmatpush.msra.mxu0 %v3818_v33  ;;  %v221_v21 = vmax.f32 %v3610_v20, %v220_v56  ;;  %v3857_v20 = vmul.f32 1.442695, %v3802_v45  ;;  %2755 = vpow2.f32 %v3786_v11 }
  0x41   :  { %7408 = vst [vmem:[#allocation54_spill] sm:$0xff] %v3750_v49  ;;  %v3830_v49 = vpop.eup %2727  ;;  %2757 = vpow2.f32 %v3821_v25 }
  0x42   :  { %7409 = vst [vmem:[#allocation55_spill] sm:$0xff] %v3754_v12  ;;  %v7418_v12 = vrot.slane %v3576_v32, 4  ;;  %479 = vmatpush.msra.mxu1 %v3830_v49 }
  0x43   :  { %7410 = vst [vmem:[#allocation56_spill] sm:$0xff] %v3756_v27  ;;  %v4503_v27 = vld [vmem:[%s7061_s1 + $0x1e0] sm:$0xff] }
  0x44   :  { %7411 = vst [vmem:[#allocation57_spill] sm:$0xff] %v3764_v31  ;;  %v208_v5 = vmax.f32 %v3576_v32, %v7418_v12  ;;  %v3824_v32 = vmul.f32 1.442695, %v3790_v43  ;;  %v231_v12 = vmax.f32 %v7420_v29, %v3769_v14  ;;  %v3853_v29 = vpop.eup %2729 }
  0x45   :  { %7412 = vst [vmem:[#allocation58_spill] sm:$0xff] %v3771_v26  ;;  %v3874_v4 = vpop.eup %2731  ;;  %499 = vmatpush.msra.mxu2 %v3853_v29 }
  0x46   :  { %7413 = vst [vmem:[#allocation59_spill] sm:$0xff] %v3783_v0  ;;  %v209_v31 = vrot.slane %v208_v5, 2  ;;  %v232_v56 = vmax.f32 %v231_v12, %v3811_v13  ;;  %v3867_v0 = vld [vmem:[%s7061_s1 + $0x8] sm:$0xff]  ;;  %v3887_v58 = vpop.eup %2733  ;;  %519 = vmatpush.msra.mxu3 %v3874_v4  ;;  %2759 = vpow2.f32 %v3824_v32 }
  0x47   :  { %7414 = vst [vmem:[#allocation60_spill] sm:$0xff] %v3790_v43  ;;  %v3841_v43 = vld [vmem:[%s7060_s0 + $0x178] sm:$0xff]  ;;  %460 = vmatpush.msra.mxu0 %v3887_v58  ;;  %2761 = vpow2.f32 %v3835_v2 }
  0x48   :  { %7415 = vst [vmem:[#allocation61_spill] sm:$0xff] %v3794_v22  ;;  %v7423_v22 = vmax.f32 %v3573_v44, %v3570_v63  ;;  %v210_v12 = vmax.f32 %v208_v5, %v209_v31  ;;  %v3880_v44 = vld [vmem:[%s7060_s0 + $0x1b8] sm:$0xff]  ;;  %v233_v54 = vrot.slane %v232_v56, 4  ;;  %v880_v31 = vmax.f32 %v3846_v42, %v3851_v8  ;;  %v3896_v5 = vld [vmem:[%s7061_s1 + $0x88] sm:$0xff] }
  0x49   :  { %7416 = vst [vmem:[#allocation62_spill] sm:$0xff] %v3796_v57  ;;  %2763 = vpow2.f32 %v3857_v20 }
  0x4a   :  { %7417 = vst [vmem:[#allocation63_spill] sm:$0xff] %v3802_v45  ;;  %v242_v57 = vmax.f32 %v7423_v22, %v3816_v18  ;;  %v222_v45 = vrot.slane %v221_v21, 2  ;;  %v3885_v22 = vld [vmem:[%s7061_s1 + $0x80] sm:$0xff]  ;;  %v211_v24 = vrot.slane %v210_v12, 1 }
  0x4b   :  { %7419 = vst [vmem:[#allocation64_spill] sm:$0xff] %v3818_v33  ;;  %v4348_v33 = vld [vmem:[%s7061_s1 + $0xe0] sm:$0xff] }
  0x4c   :  { %7421 = vst [vmem:[#allocation65_spill] sm:$0xff] %v3830_v49  ;;  %v243_v17 = vmax.f32 %v242_v57, %v3841_v43  ;;  %v223_v9 = vmax.f32 %v221_v21, %v222_v45  ;;  %v3909_v57 = vld [vmem:[%s7061_s1 + $0xc0] sm:$0xff]  ;;  %v234_v21 = vmax.f32 %v232_v56, %v233_v54  ;;  %v3919_v45 = vmax.f32 %v880_v31, %v3885_v22 }
  0x4d   :  { %7422 = vst [vmem:[#allocation66_spill] sm:$0xff] %v3853_v29  ;;  %v3898_v29 = vpop.eup %2735  ;;  %v3925_v37 = vmax.f32 %v210_v12, %v211_v24 }
  0x4e   :  { %7424 = vst [vmem:[#allocation67_spill] sm:$0xff] %v3874_v4  ;;  %v893_v4 = vmax.f32 %v3867_v0, %v3872_v47  ;;  %v3913_v23 = vpop.eup %2737  ;;  %480 = vmatpush.msra.mxu1 %v3898_v29  ;;  %v244_v7 = vmax.f32 %v243_v17, %v3880_v44  ;;  %v235_v54 = vrot.slane %v234_v21, 2 }
  0x4f   :  { %7425 = vst [vmem:[#allocation68_spill] sm:$0xff] %v3887_v58  ;;  %v3921_v15 = vpop.eup %2739  ;;  %500 = vmatpush.msra.mxu2 %v3913_v23  ;;  %v224_v58 = vrot.slane %v223_v9, 1  ;;  %v3943_v24 = vsub.f32 %v3547_v10, %v3925_v37  ;;  %v3949_v62 = vsub.f32 %v3518_v60, %v3925_v37  ;;  %v3957_v11 = vsub.f32 %v3487_v34, %v3925_v37 }
  0x50   :  { %7426 = vst [vmem:[#allocation69_spill] sm:$0xff] %v3898_v29  ;;  %v3928_v49 = vmax.f32 %v893_v4, %v3896_v5  ;;  %v3930_v29 = vpop.eup %2741  ;;  %520 = vmatpush.msra.mxu3 %v3921_v15  ;;  %v245_v53 = vmax.f32 %v244_v7, %v3904_v1  ;;  %v236_v12 = vmax.f32 %v234_v21, %v235_v54 }
  0x51   :  { %7427 = vst [vmem:[#allocation70_spill] sm:$0xff] %v3913_v23  ;;  %v3937_v17 = vpop.eup %2743  ;;  %461 = vmatpush.msra.mxu0 %v3930_v29  ;;  %v3945_v36 = vmax.f32 %v223_v9, %v224_v58  ;;  %v436_v60 = vmul.f32 1.442695, %v3943_v24  ;;  %v420_v9 = vmul.f32 1.442695, %v3949_v62  ;;  %v4318_v23 = vld [vmem:[%s7061_s1 + $0x148] sm:$0xff] }
  0x52   :  { %7428 = vst [vmem:[#allocation71_spill] sm:$0xff] %v3921_v15  ;;  %v3951_v4 = vpop.eup %2745  ;;  %481 = vmatpush.msra.mxu1 %v3937_v17  ;;  %v246_v31 = vrot.slane %v245_v53, 4  ;;  %v237_v34 = vrot.slane %v236_v12, 1  ;;  %v404_v54 = vmul.f32 1.442695, %v3957_v11 }
  0x53   :  { %7429 = vst [vmem:[#allocation72_spill] sm:$0xff] %v3930_v29  ;;  %v3959_v10 = vpop.eup %2747  ;;  %501 = vmatpush.msra.mxu2 %v3951_v4  ;;  %v3966_v58 = vsub.f32 %v3584_v48, %v3945_v36  ;;  %v3975_v7 = vsub.f32 %v3552_v40, %v3945_v36  ;;  %v3985_v56 = vsub.f32 %v3523_v61, %v3945_v36  ;;  %2765 = vpow2.f32 %v436_v60 }
  0x54   :  { %7430 = vst [vmem:[#allocation73_spill] sm:$0xff] %v3937_v17  ;;  %v3969_v25 = vpop.eup %2749  ;;  %521 = vmatpush.msra.mxu3 %v3959_v10  ;;  %v247_v21 = vmax.f32 %v245_v53, %v246_v31  ;;  %v3990_v40 = vmax.f32 %v236_v12, %v237_v34  ;;  %v3999_v61 = vsub.f32 %v3457_v3, %v3925_v37 }
  0x55   :  { %7431 = vst [vmem:[#allocation74_spill] sm:$0xff] %v3943_v24  ;;  %v3977_v32 = vpop.eup %2751  ;;  %462 = vmatpush.msra.mxu0 %v3969_v25  ;;  %v438_v48 = vmul.f32 1.442695, %v3966_v58  ;;  %v422_v31 = vmul.f32 1.442695, %v3975_v7  ;;  %v4235_v24 = vld [vmem:[%s7061_s1 + $0x90] sm:$0xff] }
  0x56   :  { %7432 = vst [vmem:[#allocation75_spill] sm:$0xff] %v3949_v62  ;;  %v3987_v2 = vpop.eup %2753  ;;  %482 = vmatpush.msra.mxu1 %v3977_v32  ;;  %v248_v53 = vrot.slane %v247_v21, 2  ;;  %v406_v20 = vmul.f32 1.442695, %v3985_v56  ;;  %v4010_v60 = vsub.f32 %v3811_v13, %v3990_v40 }
  0x57   :  { %7433 = vst [vmem:[#allocation76_spill] sm:$0xff] %v3951_v4  ;;  %v3993_v62 = vpop.eup %2755  ;;  %502 = vmatpush.msra.mxu2 %v3987_v2  ;;  %2767 = vpow2.f32 %v438_v48  ;;  %v4014_v48 = vsub.f32 %v3769_v14, %v3990_v40  ;;  %v4200_v4 = vld [vmem:[%s7061_s1 + $0x140] sm:$0xff] }
  0x58   :  { %7434 = vst [vmem:[#allocation77_spill] sm:$0xff] %v3957_v11  ;;  %v4003_v11 = vsub.f32 %v3492_v35, %v3945_v36  ;;  %v4005_v12 = vpop.eup %2757  ;;  %522 = vmatpush.msra.mxu3 %v3993_v62  ;;  %v249_v34 = vmax.f32 %v247_v21, %v248_v53  ;;  %2769 = vpow2.f32 %v420_v9  ;;  %v4021_v35 = vsub.f32 %v3562_v41, %v3990_v40 }
  0x59   :  { %7435 = vst [vmem:[#allocation78_spill] sm:$0xff] %v3959_v10  ;;  %v4016_v3 = vpop.eup %2759  ;;  %463 = vmatpush.msra.mxu0 %v4005_v12  ;;  %2771 = vpow2.f32 %v422_v31  ;;  %v440_v14 = vmul.f32 1.442695, %v4010_v60  ;;  %v424_v21 = vmul.f32 1.442695, %v4014_v48  ;;  %v7130_v53 = vmov 1.0  }
  0x5a   :  { %7436 = vst [vmem:[#allocation79_spill] sm:$0xff] %v3966_v58  ;;  %v390_v13 = vmul.f32 1.442695, %v4003_v11  ;;  %483 = vmatpush.msra.mxu1 %v4016_v3  ;;  %v250_v9 = vrot.slane %v249_v34, 1  ;;  %2773 = vpow2.f32 %v404_v54  ;;  %2665 = vmatmul.msk.f32.vlgmr.msra.gmra.mxu0 %vm444_vm0, %v7130_v53  ;;  %v408_v31 = vmul.f32 1.442695, %v4021_v35 }
  0x5b   :  { %7437 = vst [vmem:[#allocation80_spill] sm:$0xff] %v3969_v25  ;;  %2775 = vpow2.f32 %v406_v20  ;;  %2666 = vmatmul.msk.f32.vlgmr.msra.gmra.mxu1 %vm444_vm0, %v7130_v53  ;;  %v7498_v58 = vld [vmem:[#allocation17_spill] sm:$0xff] }
  0x5c   :  { %7438 = vst [vmem:[#allocation81_spill] sm:$0xff] %v3975_v7  ;;  %2777 = vpow2.f32 %v440_v14 }
  0x5d   :  { %7439 = vst [vmem:[#allocation82_spill] sm:$0xff] %v3977_v32  ;;  %2779 = vpow2.f32 %v424_v21  ;;  %v4340_v32 = vld [vmem:[%s7061_s1 + $0x1c0] sm:$0xff] }
  0x5e   :  { %7440 = vst [vmem:[#allocation83_spill] sm:$0xff] %v3985_v56  ;;  %v388_v56 = vmul.f32 1.442695, %v3999_v61  ;;  %2781 = vpow2.f32 %v408_v31 }
  0x5f   :  { %7441 = vst [vmem:[#allocation84_spill] sm:$0xff] %v3987_v2 }
  0x60   :  { %7442 = vst [vmem:[#allocation85_spill] sm:$0xff] %v3993_v62  ;;  %v4025_v62 = vpop.eup %2761  ;;  %2783 = vpow2.f32 %v388_v56 }
  0x61   :  { %7443 = vst [vmem:[#allocation86_spill] sm:$0xff] %v3999_v61  ;;  %v4032_v41 = vpop.eup %2763  ;;  %503 = vmatpush.msra.mxu2 %v4025_v62  ;;  %2785 = vpow2.f32 %v390_v13  ;;  %v7472_v13 = vld [vmem:[#allocation11_spill] sm:$0xff] }
  0x62   :  { %7444 = vst [vmem:[#allocation87_spill] sm:$0xff] %v4003_v11  ;;  %v4038_v11 = vsub.f32 %v3536_v52, %v3990_v40  ;;  %v4046_v54 = vpop.eup %2765  ;;  %523 = vmatpush.msra.mxu3 %v4032_v41  ;;  %2667 = vmatmul.msk.f32.vlgmr.msra.gmra.mxu2 %vm444_vm0, %v7130_v53  ;;  %v7455_v52 = vld [vmem:[#allocation12_spill] sm:$0xff] }
  0x63   :  { %7445 = vst [vmem:[#allocation88_spill] sm:$0xff] %v4005_v12  ;;  %v4055_v20 = vsub.f32 %v7455_v52, %v3945_v36  ;;  %v4061_v61 = vpop.eup %2767  ;;  %536 = vmatpush.msrb.mxu0 %v4046_v54  ;;  %2668 = vmatmul.msk.f32.vlgmr.msra.gmra.mxu3 %vm444_vm0, %v7130_v53  ;;  %v4328_v12 = vld [vmem:[%s7061_s1 + $0xd8] sm:$0xff] }
  0x64   :  { %7446 = vst [vmem:[#allocation89_spill] sm:$0xff] %v4010_v60  ;;  %v4042_v60 = vsub.f32 %v3416_v51, %v3925_v37  ;;  %v7457_v51 = vld [vmem:[#allocation16_spill] sm:$0xff]  ;;  %556 = vmatpush.msrb.mxu1 %v4061_v61 }
  0x65   :  { %7447 = vst [vmem:[#allocation90_spill] sm:$0xff] %v4014_v48  ;;  %v4049_v48 = vmax.f32 %v249_v34, %v250_v9  ;;  %v392_v34 = vmul.f32 1.442695, %v4038_v11  ;;  %v7460_v9 = vld [vmem:[#allocation8_spill] sm:$0xff] }
  0x66   :  { %7448 = vst [vmem:[#allocation91_spill] sm:$0xff] %v4016_v3  ;;  %v372_v14 = vmul.f32 1.442695, %v4042_v60  ;;  %v4070_v52 = vsub.f32 %v7460_v9, %v3925_v37  ;;  %v4323_v3 = vld [vmem:[%s7061_s1 + $0xd0] sm:$0xff] }
  0x67   :  { %7449 = vst [vmem:[#allocation92_spill] sm:$0xff] %v4021_v35  ;;  %v4059_v35 = vsub.f32 %v7457_v51, %v3990_v40  ;;  %v4077_v51 = vsub.f32 %v3904_v1, %v4049_v48  ;;  %v4081_v53 = vsub.f32 %v3880_v44, %v4049_v48  ;;  %v4085_v21 = vsub.f32 %v3841_v43, %v4049_v48 }
  0x68   :  { %7450 = vst [vmem:[#allocation93_spill] sm:$0xff] %v4025_v62  ;;  %v4092_v9 = vsub.f32 %v3816_v18, %v4049_v48  ;;  %v374_v1 = vmul.f32 1.442695, %v4055_v20  ;;  %2787 = vpow2.f32 %v392_v34  ;;  %v7474_v34 = vld [vmem:[#allocation15_spill] sm:$0xff] }
  0x69   :  { %7451 = vst [vmem:[#allocation94_spill] sm:$0xff] %v4032_v41  ;;  %v4072_v41 = vpop.eup %2769  ;;  %v442_v31 = vmul.f32 1.442695, %v4077_v51  ;;  %v426_v43 = vmul.f32 1.442695, %v4081_v53 }
  0x6a   :  { %7452 = vst [vmem:[#allocation95_spill] sm:$0xff] %v4038_v11  ;;  %v4087_v11 = vpop.eup %2771  ;;  %537 = vmatpush.msrb.mxu0 %v4072_v41  ;;  %v410_v62 = vmul.f32 1.442695, %v4085_v21  ;;  %v394_v18 = vmul.f32 1.442695, %v4092_v9 }
  0x6b   :  { %7453 = vst [vmem:[#allocation96_spill] sm:$0xff] %v4042_v60  ;;  %v376_v60 = vmul.f32 1.442695, %v4059_v35  ;;  %v4096_v44 = vpop.eup %2773  ;;  %557 = vmatpush.msrb.mxu1 %v4087_v11  ;;  %2789 = vpow2.f32 %v442_v31 }
  0x6c   :  { %7454 = vst [vmem:[#allocation97_spill] sm:$0xff] %v4046_v54  ;;  %v4102_v56 = vpop.eup %2775  ;;  %538 = vmatpush.msrb.mxu0 %v4096_v44  ;;  %2791 = vpow2.f32 %v426_v43 }
  0x6d   :  { %7456 = vst [vmem:[#allocation12_spill] sm:$0xff] %v4055_v20  ;;  %v4111_v20 = vmul.f32 1.442695, %v4070_v52  ;;  %558 = vmatpush.msrb.mxu1 %v4102_v56  ;;  %2793 = vpow2.f32 %v410_v62 }
  0x6e   :  { %7458 = vst [vmem:[#allocation16_spill] sm:$0xff] %v4059_v35  ;;  %v4108_v35 = vsub.f32 %v3570_v63, %v4049_v48  ;;  %2795 = vpow2.f32 %v394_v18  ;;  %v4180_v18 = vld [vmem:[%s7061_s1 + $0x50] sm:$0xff] }
  0x6f   :  { %7459 = vst [vmem:[#allocation98_spill] sm:$0xff] %v4061_v61  ;;  %2797 = vpow2.f32 %v372_v14  ;;  %v4205_v14 = vld [vmem:[%s7061_s1 + $0x18] sm:$0xff]  ;;  %v4230_v61 = vsub.f32 %v7498_v58, %v4049_v48  ;;  %v4250_v58 = vld [vmem:[%s7061_s1 + $0x68] sm:$0xff] }
  0x70   :  { %7461 = vst [vmem:[#allocation8_spill] sm:$0xff] %v4070_v52  ;;  %v378_v31 = vmul.f32 1.442695, %v4108_v35  ;;  %v7479_v52 = vld [vmem:[#allocation7_spill] sm:$0xff]  ;;  %2799 = vpow2.f32 %v374_v1  ;;  %v4240_v1 = vld [vmem:[%s7061_s1 + $0x60] sm:$0xff] }
  0x71   :  { %7462 = vst [vmem:[#allocation99_spill] sm:$0xff] %v4072_v41  ;;  %v7492_v41 = vld [vmem:[#allocation9_spill] sm:$0xff]  ;;  %2801 = vpow2.f32 %v376_v60  ;;  %v4271_v60 = vmul.f32 1.442695, %v4230_v61 }
  0x72   :  { %7463 = vst [vmem:[#allocation100_spill] sm:$0xff] %v4077_v51  ;;  %v4113_v51 = vpop.eup %2777  ;;  %v4195_v10 = vsub.f32 %v7492_v41, %v3945_v36  ;;  %2803 = vpow2.f32 %v378_v31  ;;  %v4285_v31 = vld [vmem:[%s7061_s1 + $0x98] sm:$0xff] }
  0x73   :  { %7464 = vst [vmem:[#allocation101_spill] sm:$0xff] %v4081_v53  ;;  %v4122_v53 = vsub.f32 %v7474_v34, %v3990_v40  ;;  %576 = vmatpush.msrb.mxu2 %v4113_v51  ;;  %2805 = vpow2.f32 %v4111_v20  ;;  %v4309_v20 = vld [vmem:[%s7061_s1 + $0xa8] sm:$0xff] }
  0x74   :  { %7465 = vst [vmem:[#allocation102_spill] sm:$0xff] %v4085_v21  ;;  %v4118_v21 = vsub.f32 %v7472_v13, %v3945_v36  ;;  %v7481_v13 = vld [vmem:[#allocation10_spill] sm:$0xff] }
  0x75   :  { %7466 = vst [vmem:[#allocation103_spill] sm:$0xff] %v4087_v11  ;;  %v4138_v2 = vsub.f32 %v7481_v13, %v3945_v36  ;;  %v4144_v7 = vmul.f32 1.442695, %v4122_v53 }
  0x76   :  { %7467 = vst [vmem:[#allocation104_spill] sm:$0xff] %v4092_v9  ;;  %v7476_v9 = vld [vmem:[#allocation19_spill] sm:$0xff] }
  0x77   :  { %7468 = vst [vmem:[#allocation105_spill] sm:$0xff] %v4096_v44  ;;  %v4126_v63 = vsub.f32 %v7476_v9, %v4049_v48  ;;  %v4128_v44 = vpop.eup %2779  ;;  %v358_v9 = vmul.f32 1.442695, %v4118_v21  ;;  %v4161_v13 = vmul.f32 1.442695, %v4138_v2 }
  0x78   :  { %7469 = vst [vmem:[#allocation106_spill] sm:$0xff] %v4102_v56  ;;  %v4134_v56 = vsub.f32 %v7479_v52, %v3925_v37  ;;  %v4140_v34 = vpop.eup %2781  ;;  %v4152_v52 = vld [vmem:[%s7061_s1 + $0x100] sm:$0xff]  ;;  %577 = vmatpush.msrb.mxu2 %v4128_v44 }
  0x79   :  { %7470 = vst [vmem:[#allocation107_spill] sm:$0xff] %v4108_v35  ;;  %v4147_v43 = vmul.f32 1.442695, %v4126_v63  ;;  %v4154_v35 = vpop.eup %2783  ;;  %2807 = vpow2.f32 %v358_v9 }
  0x7a   :  { %7471 = vst [vmem:[#allocation108_spill] sm:$0xff] %v4113_v51  ;;  %v4158_v62 = vmul.f32 1.442695, %v4134_v56  ;;  %539 = vmatpush.msrb.mxu0 %v4154_v35  ;;  %v7490_v51 = vld [vmem:[#allocation6_spill] sm:$0xff]  ;;  %578 = vmatpush.msrb.mxu2 %v4140_v34  ;;  %2809 = vpow2.f32 %v4144_v7  ;;  %v4353_v7 = vld [vmem:[%s7061_s1 + $0xe8] sm:$0xff] }
  0x7b   :  { %7473 = vst [vmem:[#allocation11_spill] sm:$0xff] %v4118_v21  ;;  %v4170_v21 = vld [vmem:[%s7061_s1 + $0xc8] sm:$0xff]  ;;  %v4191_v11 = vsub.f32 %v7490_v51, %v3925_v37  ;;  %v4215_v37 = vld [vmem:[%s7061_s1 + $0x20] sm:$0xff]  ;;  %v7496_v51 = vld [vmem:[#allocation13_spill] sm:$0xff]  ;;  %2811 = vpow2.f32 %v4147_v43 }
  0x7c   :  { %7475 = vst [vmem:[#allocation15_spill] sm:$0xff] %v4122_v53  ;;  %v7485_v53 = vld [vmem:[#allocation14_spill] sm:$0xff]  ;;  %v932_v9 = vmax.f32 %v4215_v37, %v4240_v1  ;;  %2813 = vpow2.f32 %v4158_v62  ;;  %v4414_v62 = vld [vmem:[%s7061_s1 + $0x158] sm:$0xff] }
  0x7d   :  { %7477 = vst [vmem:[#allocation19_spill] sm:$0xff] %v4126_v63  ;;  %v4165_v63 = vsub.f32 %v7485_v53, %v3990_v40  ;;  %v7488_v53 = vld [vmem:[#allocation18_spill] sm:$0xff]  ;;  %2815 = vpow2.f32 %v4161_v13 }
  0x7e   :  { %7478 = vst [vmem:[#allocation109_spill] sm:$0xff] %v4128_v44  ;;  %v4175_v44 = vld [vmem:[%s7061_s1 + $0x10] sm:$0xff] }
  0x7f   :  { %7480 = vst [vmem:[#allocation7_spill] sm:$0xff] %v4134_v56  ;;  %v4187_v56 = vsub.f32 %v7488_v53, %v4049_v48  ;;  %v4210_v53 = vld [vmem:[%s7061_s1 + $0x58] sm:$0xff]  ;;  %v4222_v41 = vmul.f32 1.442695, %v4165_v63 }
  0x80   :  { %7482 = vst [vmem:[#allocation10_spill] sm:$0xff] %v4138_v2  ;;  %v4182_v2 = vpop.eup %2785 }
  0x81   :  { %7483 = vst [vmem:[#allocation110_spill] sm:$0xff] %v4140_v34  ;;  %v4217_v36 = vpop.eup %2787  ;;  %559 = vmatpush.msrb.mxu1 %v4182_v2  ;;  %v4255_v48 = vmul.f32 1.442695, %v4187_v56  ;;  %v4261_v34 = vmul.f32 1.442695, %v4195_v10  ;;  %2817 = vpow2.f32 %v4222_v41 }
  0x82   :  { %7484 = vst [vmem:[#allocation111_spill] sm:$0xff] %v4154_v35  ;;  %v4226_v35 = vsub.f32 %v7496_v51, %v3990_v40  ;;  %v4252_v40 = vpop.eup %2789  ;;  %v4258_v51 = vmul.f32 1.442695, %v4191_v11  ;;  %579 = vmatpush.msrb.mxu2 %v4217_v36 }
  0x83   :  { %7486 = vst [vmem:[#allocation14_spill] sm:$0xff] %v4165_v63  ;;  %v4245_v63 = vld [vmem:[%s7061_s1 + $0x28] sm:$0xff]  ;;  %596 = vmatpush.msrb.mxu3 %v4252_v40  ;;  %2819 = vpow2.f32 %v4255_v48 }
  0x84   :  { %7487 = vst [vmem:[#allocation112_spill] sm:$0xff] %v4182_v2  ;;  %v4263_v2 = vpop.eup %2791  ;;  %v4268_v54 = vmul.f32 1.442695, %v4226_v35  ;;  %2821 = vpow2.f32 %v4258_v51 }
  0x85   :  { %7489 = vst [vmem:[#allocation18_spill] sm:$0xff] %v4187_v56  ;;  %v7505_v56 = vmax.f32 %v3919_v45, %v3909_v57  ;;  %v895_v45 = vmax.f32 %v3928_v49, %v4170_v21  ;;  %597 = vmatpush.msrb.mxu3 %v4263_v2  ;;  %2823 = vpow2.f32 %v4261_v34 }
  0x86   :  { %7491 = vst [vmem:[#allocation6_spill] sm:$0xff] %v4191_v11 }
  0x87   :  { %7493 = vst [vmem:[#allocation9_spill] sm:$0xff] %v4195_v10  ;;  %v883_v11 = vmax.f32 %v7505_v56, %v4152_v52  ;;  %v4280_v10 = vld [vmem:[%s7061_s1 + $0x108] sm:$0xff]  ;;  %v906_v56 = vmax.f32 %v4175_v44, %v4180_v18 }
  0x88   :  { %7494 = vst [vmem:[#allocation113_spill] sm:$0xff] %v4215_v37  ;;  %v896_v25 = vmax.f32 %v895_v45, %v4280_v10  ;;  %v4364_v45 = vld [vmem:[%s7061_s1 + $0x188] sm:$0xff] }
  0x89   :  { %7495 = vst [vmem:[#allocation114_spill] sm:$0xff] %v4217_v36  ;;  %v919_v36 = vmax.f32 %v4205_v14, %v4210_v53  ;;  %v884_v49 = vmax.f32 %v883_v11, %v4200_v4  ;;  %v945_v11 = vmax.f32 %v4245_v63, %v4250_v58  ;;  %v907_v17 = vmax.f32 %v906_v56, %v4235_v24  ;;  %v4369_v56 = vld [vmem:[%s7061_s1 + $0x110] sm:$0xff] }
  0x8a   :  { %7497 = vst [vmem:[#allocation13_spill] sm:$0xff] %v4226_v35  ;;  %v4287_v35 = vpop.eup %2793  ;;  %v897_v19 = vmax.f32 %v896_v25, %v4318_v23  ;;  %v4409_v25 = vld [vmem:[%s7061_s1 + $0x150] sm:$0xff]  ;;  %2825 = vpow2.f32 %v4268_v54 }
  0x8b   :  { %7499 = vst [vmem:[#allocation17_spill] sm:$0xff] %v4230_v61  ;;  %v4293_v61 = vld [vmem:[%s7061_s1 + $0x180] sm:$0xff]  ;;  %v4311_v15 = vpop.eup %2795  ;;  %v920_v29 = vmax.f32 %v919_v36, %v4285_v31  ;;  %598 = vmatpush.msrb.mxu3 %v4287_v35  ;;  %v946_v43 = vmax.f32 %v945_v11, %v4309_v20  ;;  %v908_v50 = vmax.f32 %v907_v17, %v4323_v3  ;;  %v4404_v17 = vld [vmem:[%s7061_s1 + $0x1c8] sm:$0xff]  ;;  %2827 = vpow2.f32 %v4271_v60 }
  0x8c   :  { %7500 = vst [vmem:[#allocation115_spill] sm:$0xff] %v4240_v1  ;;  %v885_v36 = vmax.f32 %v884_v49, %v4293_v61 }
  0x8d   :  { %7501 = vst [vmem:[#allocation116_spill] sm:$0xff] %v4245_v63  ;;  %v921_v28 = vmax.f32 %v920_v29, %v4328_v12  ;;  %599 = vmatpush.msrb.mxu3 %v4311_v15  ;;  %v947_v13 = vmax.f32 %v946_v43, %v4353_v7  ;;  %v4541_v63 = vld [vmem:[%s7061_s1 + $0x78] sm:$0xff] }
  0x8e   :  { %7502 = vst [vmem:[#allocation117_spill] sm:$0xff] %v4250_v58  ;;  %v886_v29 = vmax.f32 %v885_v36, %v4340_v32 }
  0x8f   :  { %7503 = vst [vmem:[#allocation118_spill] sm:$0xff] %v4252_v40  ;;  %v4304_v40 = vld [vmem:[%s7061_s1 + $0xa0] sm:$0xff] }
  0x90   :  { %7504 = vst [vmem:[#allocation119_spill] sm:$0xff] %v4263_v2  ;;  %v4334_v2 = vpop.eup %2797 }
  0x91   :  { %7506 = vst [vmem:[#allocation120_spill] sm:$0xff] %v4287_v35  ;;  %v4355_v39 = vpop.eup %2799  ;;  %540 = vmatpush.msrb.mxu0 %v4334_v2  ;;  %v4374_v35 = vld [vmem:[%s7061_s1 + $0x118] sm:$0xff] }
  0x92   :  { %7507 = vst [vmem:[#allocation121_spill] sm:$0xff] %v4304_v40  ;;  %v4378_v49 = vpop.eup %2801  ;;  %560 = vmatpush.msrb.mxu1 %v4355_v39  ;;  %v922_v46 = vmax.f32 %v921_v28, %v4374_v35  ;;  %v4447_v28 = vld [vmem:[%s7061_s1 + $0x198] sm:$0xff] }
  0x93   :  { %7508 = vst [vmem:[#allocation122_spill] sm:$0xff] %v4309_v20  ;;  %v4395_v11 = vpop.eup %2803  ;;  %580 = vmatpush.msrb.mxu2 %v4378_v49  ;;  %v7530_v20 = vmov 1.0  }
  0x94   :  { %7509 = vst [vmem:[#allocation123_spill] sm:$0xff] %v4311_v15  ;;  %v4418_v36 = vpop.eup %2805  ;;  %v898_v15 = vmax.f32 %v897_v19, %v4364_v45  ;;  %600 = vmatpush.msrb.mxu3 %v4395_v11  ;;  %v887_v19 = vrot.slane %v886_v29, 4  ;;  %v923_v26 = vmax.f32 %v922_v46, %v4414_v62 }
  0x95   :  { %7510 = vst [vmem:[#allocation124_spill] sm:$0xff] %v4334_v2  ;;  %v933_v2 = vmax.f32 %v932_v9, %v4304_v40  ;;  %v4393_v9 = vld [vmem:[%s7061_s1 + $0x128] sm:$0xff]  ;;  %v4434_v43 = vpop.eup %2807  ;;  %541 = vmatpush.msrb.mxu0 %v4418_v36 }
  0x96   :  { %7511 = vst [vmem:[#allocation125_spill] sm:$0xff] %v4353_v7  ;;  %v948_v16 = vmax.f32 %v947_v13, %v4393_v9  ;;  %561 = vmatpush.msrb.mxu1 %v4434_v43  ;;  %v899_v48 = vmax.f32 %v898_v15, %v4404_v17  ;;  %v888_v13 = vmax.f32 %v886_v29, %v887_v19  ;;  %v4470_v15 = vld [vmem:[%s7061_s1 + $0x1d0] sm:$0xff] }
  0x97   :  { %7512 = vst [vmem:[#allocation126_spill] sm:$0xff] %v4355_v39  ;;  %v909_v39 = vmax.f32 %v908_v50, %v4369_v56  ;;  %v4442_v50 = vld [vmem:[%s7061_s1 + $0x190] sm:$0xff]  ;;  %v924_v19 = vmax.f32 %v923_v26, %v4447_v28 }
  0x98   :  { %7513 = vst [vmem:[#allocation127_spill] sm:$0xff] %v4378_v49  ;;  %v934_v49 = vmax.f32 %v933_v2, %v4348_v33  ;;  %v4432_v2 = vld [vmem:[%s7061_s1 + $0x168] sm:$0xff]  ;;  %v900_v34 = vrot.slane %v899_v48, 4 }
  0x99   :  { %7514 = vst [vmem:[#allocation128_spill] sm:$0xff] %v4395_v11  ;;  %v4451_v11 = vpop.eup %2809  ;;  %v949_v51 = vmax.f32 %v948_v16, %v4432_v2  ;;  %v889_v16 = vrot.slane %v888_v13, 2 }
  0x9a   :  { %7515 = vst [vmem:[#allocation129_spill] sm:$0xff] %v4418_v36  ;;  %v935_v41 = vmax.f32 %v934_v49, %v4388_v55  ;;  %v910_v36 = vmax.f32 %v909_v39, %v4409_v25  ;;  %v4463_v49 = vpop.eup %2811  ;;  %581 = vmatpush.msrb.mxu2 %v4451_v11  ;;  %v4475_v39 = vld [vmem:[%s7061_s1 + $0x1d8] sm:$0xff] }
  0x9b   :  { %7516 = vst [vmem:[#allocation130_spill] sm:$0xff] %v4434_v43  ;;  %v4479_v43 = vpop.eup %2813  ;;  %601 = vmatpush.msrb.mxu3 %v4463_v49  ;;  %v890_v60 = vmax.f32 %v888_v13, %v889_v16  ;;  %v4525_v13 = vld [vmem:[%s7061_s1 + $0x70] sm:$0xff] }
  0x9c   :  { %7517 = vst [vmem:[#allocation131_spill] sm:$0xff] %v4451_v11  ;;  %v936_v46 = vmax.f32 %v935_v41, %v4427_v30  ;;  %v911_v29 = vmax.f32 %v910_v36, %v4442_v50  ;;  %v4488_v11 = vld [vmem:[%s7061_s1 + $0x1a8] sm:$0xff]  ;;  %v4490_v6 = vpop.eup %2815  ;;  %542 = vmatpush.msrb.mxu0 %v4479_v43  ;;  %v901_v36 = vmax.f32 %v899_v48, %v900_v34 }
  0x9d   :  { %7518 = vst [vmem:[#allocation132_spill] sm:$0xff] %v4463_v49  ;;  %v4495_v54 = vpop.eup %2817  ;;  %562 = vmatpush.msrb.mxu1 %v4490_v6  ;;  %v925_v49 = vmax.f32 %v924_v19, %v4475_v39  ;;  %v4515_v19 = vld [vmem:[%s7061_s1 + $0x1e8] sm:$0xff]  ;;  %v891_v16 = vrot.slane %v890_v60, 1 }
  0x9e   :  { %7519 = vst [vmem:[#allocation133_spill] sm:$0xff] %v4479_v43  ;;  %v937_v41 = vmax.f32 %v936_v46, %v4461_v38  ;;  %v912_v26 = vmax.f32 %v911_v29, %v4470_v15  ;;  %v4505_v43 = vpop.eup %2819  ;;  %582 = vmatpush.msrb.mxu2 %v4495_v54  ;;  %v950_v46 = vmax.f32 %v949_v51, %v4488_v11  ;;  %v902_v48 = vrot.slane %v901_v36, 2 }
  0x9f   :  { %7520 = vst [vmem:[#allocation134_spill] sm:$0xff] %v4490_v6  ;;  %v4509_v59 = vpop.eup %2821  ;;  %602 = vmatpush.msrb.mxu3 %v4505_v43  ;;  %v926_v29 = vrot.slane %v925_v49, 4  ;;  %v4520_v6 = vld [vmem:[%s7061_s1 + $0x30] sm:$0xff]  ;;  %v4551_v40 = vmax.f32 %v890_v60, %v891_v16 }
  0xa0   :  { %7521 = vst [vmem:[#allocation135_spill] sm:$0xff] %v4495_v54  ;;  %v913_v34 = vrot.slane %v912_v26, 4  ;;  %v4527_v51 = vpop.eup %2823  ;;  %543 = vmatpush.msrb.mxu0 %v4509_v59  ;;  %v4536_v54 = vld [vmem:[%s7061_s1 + $0x38] sm:$0xff]  ;;  %v903_v58 = vmax.f32 %v901_v36, %v902_v48  ;;  %v4556_v7 = vmax.f32 %v950_v46, %v4515_v19  ;;  %v958_v36 = vmax.f32 %v4520_v6, %v4525_v13  ;;  %v4566_v60 = vld [vmem:[%s7061_s1 + $0xb0] sm:$0xff] }
  0xa1   :  { %7522 = vst [vmem:[#allocation136_spill] sm:$0xff] %v4505_v43  ;;  %v4531_v43 = vmax.f32 %v937_v41, %v4503_v27  ;;  %v4543_v37 = vpop.eup %2825  ;;  %563 = vmatpush.msrb.mxu1 %v4527_v51  ;;  %v927_v1 = vmax.f32 %v925_v49, %v926_v29  ;;  %2669 = vmatmul.msk.f32.vlgmr.msrb.gmra.mxu0 %vm444_vm0, %v7530_v20 }
  0xa2   :  { %7523 = vst [vmem:[#allocation137_spill] sm:$0xff] %v4509_v59  ;;  %v914_v59 = vmax.f32 %v912_v26, %v913_v34  ;;  %v4548_v41 = vpop.eup %2827  ;;  %583 = vmatpush.msrb.mxu2 %v4543_v37  ;;  %2670 = vmatmul.msk.f32.vlgmr.msrb.gmra.mxu1 %vm444_vm0, %v7530_v20  ;;  %v904_v49 = vrot.slane %v903_v58, 1  ;;  %v971_v46 = vmax.f32 %v4536_v54, %v4541_v63 }
  0xa3   :  { %7524 = vst [vmem:[#allocation138_spill] sm:$0xff] %v4520_v6  ;;  %603 = vmatpush.msrb.mxu3 %v4548_v41  ;;  %2671 = vmatmul.msk.f32.vlgmr.msrb.gmra.mxu2 %vm444_vm0, %v7530_v20  ;;  %v928_v48 = vrot.slane %v927_v1, 2  ;;  %v4574_v34 = vsub.f32 %v4340_v32, %v4551_v40  ;;  %v4578_v29 = vsub.f32 %v4293_v61, %v4551_v40  ;;  %v939_v6 = vrot.slane %v4531_v43, 4 }
  0xa4   :  { %7525 = vst [vmem:[#allocation139_spill] sm:$0xff] %v4525_v13  ;;  %v915_v26 = vrot.slane %v914_v59, 2  ;;  %2672 = vmatmul.msk.f32.vlgmr.msrb.gmra.mxu3 %vm444_vm0, %v7530_v20  ;;  %v4582_v16 = vsub.f32 %v4200_v4, %v4551_v40  ;;  %v4595_v13 = vmax.f32 %v958_v36, %v4566_v60  ;;  %v952_v36 = vrot.slane %v4556_v7, 4 }
  0xa5   :  { %7526 = vst [vmem:[#allocation140_spill] sm:$0xff] %v4527_v51  ;;  %v1160_v32 = vmul.f32 1.442695, %v4574_v34 }
  0xa6   :  { %7527 = vst [vmem:[#allocation141_spill] sm:$0xff] %v4536_v54  ;;  %v916_v51 = vmax.f32 %v914_v59, %v915_v26  ;;  %v929_v54 = vmax.f32 %v927_v1, %v928_v48  ;;  %v1128_v61 = vmul.f32 1.442695, %v4582_v16 }
  0xa7   :  { %7528 = vst [vmem:[#allocation142_spill] sm:$0xff] %v4541_v63  ;;  %v1144_v63 = vmul.f32 1.442695, %v4578_v29  ;;  %2829 = vpow2.f32 %v1160_v32 }
  0xa8   :  { %7529 = vst [vmem:[#allocation143_spill] sm:$0xff] %v4543_v37  ;;  %v4588_v37 = vmax.f32 %v903_v58, %v904_v49  ;;  %v930_v58 = vrot.slane %v929_v54, 1 }
  0xa9   :  { %7531 = vst [vmem:[#allocation144_spill] sm:$0xff] %v4548_v41  ;;  %v4586_v41 = vsub.f32 %v4152_v52, %v4551_v40  ;;  %v917_v52 = vrot.slane %v916_v51, 1  ;;  %2831 = vpow2.f32 %v1144_v63 }
  0xaa   :  { %7532 = vst [vmem:[#allocation145_spill] sm:$0xff] %v4582_v16  ;;  %v4599_v4 = vsub.f32 %v4404_v17, %v4588_v37  ;;  %v4603_v59 = vsub.f32 %v4364_v45, %v4588_v37  ;;  %v4607_v1 = vsub.f32 %v4318_v23, %v4588_v37  ;;  %v4614_v17 = vmax.f32 %v929_v54, %v930_v58  ;;  %v4637_v54 = vld [vmem:[%s7061_s1 + $0xb8] sm:$0xff] }
  0xab   :  { %v1112_v49 = vmul.f32 1.442695, %v4586_v41  ;;  %v4612_v48 = vmax.f32 %v916_v51, %v917_v52  ;;  %2833 = vpow2.f32 %v1128_v61  ;;  %v4620_v23 = vsub.f32 %v4280_v10, %v4588_v37 }
  0xac   :  { %v1162_v26 = vmul.f32 1.442695, %v4599_v4  ;;  %v1146_v16 = vmul.f32 1.442695, %v4603_v59  ;;  %v1130_v45 = vmul.f32 1.442695, %v4607_v1  ;;  %v4628_v51 = vsub.f32 %v4475_v39, %v4614_v17 }
  0xad   :  { %v4624_v32 = vsub.f32 %v4470_v15, %v4612_v48  ;;  %v4632_v63 = vsub.f32 %v4442_v50, %v4612_v48  ;;  %v4641_v10 = vsub.f32 %v4447_v28, %v4614_v17  ;;  %v4645_v15 = vsub.f32 %v4409_v25, %v4612_v48 }
  0xae   :  { %2835 = vpow2.f32 %v1162_v26  ;;  %7534 = vst [vmem:[#allocation147_spill] sm:$0xff] %v4628_v51  ;;  %v4649_v39 = vsub.f32 %v4414_v62, %v4614_v17  ;;  %v1166_v61 = vmul.f32 1.442695, %v4628_v51  ;;  %v4658_v58 = vmax.f32 %v4531_v43, %v939_v6 }
  0xaf   :  { %7533 = vst [vmem:[#allocation146_spill] sm:$0xff] %v4624_v32  ;;  %2837 = vpow2.f32 %v1146_v16  ;;  %v1164_v50 = vmul.f32 1.442695, %v4624_v32  ;;  %v1148_v52 = vmul.f32 1.442695, %v4632_v63  ;;  %v4654_v16 = vpop.eup %2829  ;;  %v4661_v25 = vmax.f32 %v971_v46, %v4637_v54 }
  0xb0   :  { %7535 = vst [vmem:[#allocation148_spill] sm:$0xff] %v4632_v63  ;;  %2839 = vpow2.f32 %v1130_v45  ;;  %v1150_v28 = vmul.f32 1.442695, %v4641_v10  ;;  %v4663_v62 = vpop.eup %2831  ;;  %1184 = vmatpush.msra.mxu0 %v4654_v16  ;;  %v1132_v26 = vmul.f32 1.442695, %v4645_v15  ;;  %v4669_v45 = vsub.f32 %v4369_v56, %v4612_v48 }
  0xb1   :  { %7536 = vst [vmem:[#allocation149_spill] sm:$0xff] %v4641_v10  ;;  %2841 = vpow2.f32 %v1112_v49  ;;  %v4673_v49 = vsub.f32 %v4374_v35, %v4614_v17  ;;  %v4675_v6 = vpop.eup %2833  ;;  %v1134_v43 = vmul.f32 1.442695, %v4649_v39  ;;  %v4680_v46 = vsub.f32 %v3909_v57, %v4551_v40 }
  0xb2   :  { %7537 = vst [vmem:[#allocation150_spill] sm:$0xff] %v4645_v15  ;;  %2843 = vpow2.f32 %v1164_v50  ;;  %v4683_v50 = vmax.f32 %v4556_v7, %v952_v36  ;;  %1185 = vmatpush.msra.mxu0 %v4663_v62  ;;  %v1114_v35 = vmul.f32 1.442695, %v4620_v23  ;;  %v4691_v56 = vsub.f32 %v4170_v21, %v4588_v37 }
  0xb3   :  { %7538 = vst [vmem:[#allocation151_spill] sm:$0xff] %v4649_v39  ;;  %2845 = vpow2.f32 %v1166_v61  ;;  %v4695_v61 = vsub.f32 %v3885_v22, %v4551_v40  ;;  %v1116_v7 = vmul.f32 1.442695, %v4669_v45  ;;  %v4703_v36 = vsub.f32 %v4323_v3, %v4612_v48 }
  0xb4   :  { %7539 = vst [vmem:[#allocation152_spill] sm:$0xff] %v4669_v45  ;;  %v4685_v15 = vpop.eup %2835  ;;  %2847 = vpow2.f32 %v1148_v52  ;;  %v4707_v52 = vsub.f32 %v4328_v12, %v4614_v17  ;;  %1186 = vmatpush.msra.mxu0 %v4675_v6  ;;  %v1118_v22 = vmul.f32 1.442695, %v4673_v49  ;;  %v4719_v45 = vsub.f32 %v4235_v24, %v4612_v48  ;;  %v4724_v12 = vld [vmem:[%s7061_s1 + $0xf0] sm:$0xff] }
  0xb5   :  { %7540 = vst [vmem:[#allocation153_spill] sm:$0xff] %v4673_v49  ;;  %v4697_v57 = vpop.eup %2837  ;;  %1204 = vmatpush.msra.mxu1 %v4685_v15  ;;  %2849 = vpow2.f32 %v1150_v28  ;;  %v4715_v28 = vsub.f32 %v3896_v5, %v4588_v37  ;;  %v4732_v5 = vsub.f32 %v4285_v31, %v4614_v17  ;;  %v4736_v24 = vsub.f32 %v3851_v8, %v4551_v40 }
  0xb6   :  { %7541 = vst [vmem:[#allocation154_spill] sm:$0xff] %v4680_v46  ;;  %v4709_v21 = vpop.eup %2839  ;;  %2851 = vpow2.f32 %v1132_v26  ;;  %v1096_v26 = vmul.f32 1.442695, %v4680_v46  ;;  %v1098_v39 = vmul.f32 1.442695, %v4691_v56  ;;  %v4748_v10 = vsub.f32 %v4180_v18, %v4612_v48 }
  0xb7   :  { %7542 = vst [vmem:[#allocation155_spill] sm:$0xff] %v4691_v56  ;;  %v4726_v3 = vpop.eup %2841  ;;  %1205 = vmatpush.msra.mxu1 %v4697_v57  ;;  %2853 = vpow2.f32 %v1134_v43  ;;  %v4744_v43 = vsub.f32 %v3872_v47, %v4588_v37  ;;  %v1100_v8 = vmul.f32 1.442695, %v4703_v36  ;;  %v4759_v47 = vld [vmem:[%s7061_s1 + $0x130] sm:$0xff]  ;;  %v960_v18 = vmax.f32 %v4595_v13, %v4724_v12 }
  0xb8   :  { %7543 = vst [vmem:[#allocation156_spill] sm:$0xff] %v4695_v61  ;;  %v4738_v49 = vpop.eup %2843  ;;  %1187 = vmatpush.msra.mxu0 %v4726_v3  ;;  %2855 = vpow2.f32 %v1114_v35  ;;  %v1080_v35 = vmul.f32 1.442695, %v4695_v61  ;;  %v1102_v56 = vmul.f32 1.442695, %v4707_v52  ;;  %v941_v51 = vrot.slane %v4658_v58, 2 }
  0xb9   :  { %7544 = vst [vmem:[#allocation157_spill] sm:$0xff] %v4703_v36  ;;  %v4750_v31 = vpop.eup %2845  ;;  %1224 = vmatpush.msra.mxu2 %v4738_v49  ;;  %1206 = vmatpush.msra.mxu1 %v4709_v21  ;;  %2857 = vpow2.f32 %v1116_v7  ;;  %v1082_v7 = vmul.f32 1.442695, %v4715_v28  ;;  %v1084_v36 = vmul.f32 1.442695, %v4719_v45 }
  0xba   :  { %7545 = vst [vmem:[#allocation158_spill] sm:$0xff] %v4707_v52  ;;  %v4763_v63 = vpop.eup %2847  ;;  %1244 = vmatpush.msra.mxu3 %v4750_v31  ;;  %2859 = vpow2.f32 %v1118_v22  ;;  %v1086_v46 = vmul.f32 1.442695, %v4732_v5  ;;  %v1064_v13 = vmul.f32 1.442695, %v4736_v24  ;;  %v4778_v22 = vld [vmem:[%s7061_s1 + $0xf8] sm:$0xff] }
  0xbb   :  { %7546 = vst [vmem:[#allocation159_spill] sm:$0xff] %v4715_v28  ;;  %v4769_v61 = vpop.eup %2849  ;;  %1225 = vmatpush.msra.mxu2 %v4763_v63  ;;  %2861 = vpow2.f32 %v1096_v26  ;;  %v1068_v26 = vmul.f32 1.442695, %v4748_v10  ;;  %v4794_v28 = vsub.f32 %v3846_v42, %v4551_v40  ;;  %v961_v42 = vmax.f32 %v960_v18, %v4759_v47  ;;  %v4832_v18 = vld [vmem:[%s7061_s1 + $0x1b0] sm:$0xff] }
  0xbc   :  { %7547 = vst [vmem:[#allocation160_spill] sm:$0xff] %v4719_v45  ;;  %v4780_v52 = vpop.eup %2851  ;;  %1245 = vmatpush.msra.mxu3 %v4769_v61  ;;  %2863 = vpow2.f32 %v1098_v39  ;;  %v1066_v45 = vmul.f32 1.442695, %v4744_v43  ;;  %v4798_v39 = vsub.f32 %v3867_v0, %v4588_v37  ;;  %v954_v0 = vrot.slane %v4683_v50, 2 }
  0xbd   :  { %7548 = vst [vmem:[#allocation161_spill] sm:$0xff] %v4732_v5  ;;  %v4787_v5 = vsub.f32 %v4210_v53, %v4614_v17  ;;  %1226 = vmatpush.msra.mxu2 %v4780_v52  ;;  %2865 = vpow2.f32 %v1100_v8  ;;  %v4804_v53 = vld [vmem:[%s7061_s1 + $0x170] sm:$0xff]  ;;  %v973_v37 = vmax.f32 %v4661_v25, %v4778_v22  ;;  %v4837_v25 = vld [vmem:[%s7061_s1 + $0x178] sm:$0xff] }
  0xbe   :  { %7549 = vst [vmem:[#allocation162_spill] sm:$0xff] %v4736_v24  ;;  %v4789_v24 = vpop.eup %2853  ;;  %2867 = vpow2.f32 %v1102_v56 }
  0xbf   :  { %7550 = vst [vmem:[#allocation163_spill] sm:$0xff] %v4744_v43  ;;  %v942_v43 = vmax.f32 %v4658_v58, %v941_v51  ;;  %v4811_v8 = vpop.eup %2855  ;;  %1246 = vmatpush.msra.mxu3 %v4789_v24  ;;  %2869 = vpow2.f32 %v1080_v35  ;;  %v4823_v51 = vsub.f32 %v4175_v44, %v4612_v48  ;;  %v4827_v58 = vsub.f32 %v4205_v14, %v4614_v17 }
  0xc0   :  { %7551 = vst [vmem:[#allocation164_spill] sm:$0xff] %v4748_v10  ;;  %v4809_v10 = vld [vmem:[%s7061_s1 + $0x138] sm:$0xff]  ;;  %v4818_v40 = vpop.eup %2857  ;;  %1207 = vmatpush.msra.mxu1 %v4811_v8  ;;  %2871 = vpow2.f32 %v1082_v7  ;;  %v955_v44 = vmax.f32 %v4683_v50, %v954_v0  ;;  %v962_v14 = vmax.f32 %v961_v42, %v4804_v53  ;;  %v4855_v7 = vld [vmem:[%s7061_s1 + $0x1f0] sm:$0xff] }
  0xc1   :  { %7552 = vst [vmem:[#allocation165_spill] sm:$0xff] %v4750_v31  ;;  %v943_v56 = vrot.slane %v942_v43, 1  ;;  %v4839_v35 = vpop.eup %2859  ;;  %1227 = vmatpush.msra.mxu2 %v4818_v40  ;;  %v974_v48 = vmax.f32 %v973_v37, %v4809_v10  ;;  %2873 = vpow2.f32 %v1084_v36  ;;  %v4860_v50 = vld [vmem:[%s7061_s1 + $0x1b8] sm:$0xff] }
  0xc2   :  { %7553 = vst [vmem:[#allocation166_spill] sm:$0xff] %v4763_v63  ;;  %v4845_v17 = vpop.eup %2861  ;;  %1247 = vmatpush.msra.mxu3 %v4839_v35  ;;  %2875 = vpow2.f32 %v1086_v46  ;;  %v956_v36 = vrot.slane %v955_v44, 1  ;;  %v963_v42 = vmax.f32 %v962_v14, %v4832_v18  ;;  %v4879_v46 = vld [vmem:[%s7061_s1 + $0x1f8] sm:$0xff] }
  0xc3   :  { %7554 = vst [vmem:[#allocation167_spill] sm:$0xff] %v4769_v61  ;;  %v4850_v61 = vmax.f32 %v942_v43, %v943_v56  ;;  %v4862_v0 = vpop.eup %2863  ;;  %1188 = vmatpush.msra.mxu0 %v4845_v17  ;;  %v975_v43 = vmax.f32 %v974_v48, %v4837_v25  ;;  %2877 = vpow2.f32 %v1064_v13  ;;  %v1050_v56 = vmul.f32 1.442695, %v4798_v39 }
  0xc4   :  { %7555 = vst [vmem:[#allocation168_spill] sm:$0xff] %v4780_v52  ;;  %v1048_v52 = vmul.f32 1.442695, %v4794_v28  ;;  %v4867_v37 = vpop.eup %2865  ;;  %1208 = vmatpush.msra.mxu1 %v4862_v0  ;;  %2879 = vpow2.f32 %v1066_v45  ;;  %v4884_v48 = vmax.f32 %v955_v44, %v956_v36  ;;  %v964_v13 = vmax.f32 %v963_v42, %v4855_v7 }
  0xc5   :  { %7556 = vst [vmem:[#allocation169_spill] sm:$0xff] %v4787_v5  ;;  %v4881_v14 = vpop.eup %2867  ;;  %1228 = vmatpush.msra.mxu2 %v4867_v37  ;;  %2881 = vpow2.f32 %v1068_v26  ;;  %v4898_v45 = vsub.f32 %v4427_v30, %v4850_v61 }
  0xc6   :  { %7557 = vst [vmem:[#allocation170_spill] sm:$0xff] %v4789_v24  ;;  %v1070_v24 = vmul.f32 1.442695, %v4787_v5  ;;  %v1052_v5 = vmul.f32 1.442695, %v4823_v51  ;;  %1248 = vmatpush.msra.mxu3 %v4881_v14  ;;  %v4905_v36 = vsub.f32 %v4515_v19, %v4884_v48  ;;  %v965_v26 = vrot.slane %v964_v13, 4 }
  0xc7   :  { %7558 = vst [vmem:[#allocation171_spill] sm:$0xff] %v4794_v28  ;;  %v4874_v28 = vsub.f32 %v4503_v27, %v4850_v61  ;;  %v1054_v27 = vmul.f32 1.442695, %v4827_v58  ;;  %v4914_v30 = vsub.f32 %v4488_v11, %v4884_v48 }
  0xc8   :  { %7559 = vst [vmem:[#allocation172_spill] sm:$0xff] %v4798_v39  ;;  %v4888_v39 = vpop.eup %2869  ;;  %2883 = vpow2.f32 %v1070_v24  ;;  %v4918_v24 = vsub.f32 %v4432_v2, %v4884_v48  ;;  %v4931_v2 = vsub.f32 %v4388_v55, %v4850_v61  ;;  %v4946_v55 = vsub.f32 %v4348_v33, %v4850_v61 }
  0xc9   :  { %7560 = vst [vmem:[#allocation173_spill] sm:$0xff] %v4818_v40  ;;  %v4900_v44 = vpop.eup %2871  ;;  %1189 = vmatpush.msra.mxu0 %v4888_v39  ;;  %2885 = vpow2.f32 %v1048_v52 }
  0xca   :  { %7561 = vst [vmem:[#allocation174_spill] sm:$0xff] %v4823_v51  ;;  %v976_v51 = vmax.f32 %v975_v43, %v4860_v50  ;;  %v4908_v43 = vpop.eup %2873  ;;  %1209 = vmatpush.msra.mxu1 %v4900_v44  ;;  %2887 = vpow2.f32 %v1050_v56 }
  0xcb   :  { %7562 = vst [vmem:[#allocation175_spill] sm:$0xff] %v4827_v58  ;;  %v4920_v19 = vpop.eup %2875  ;;  %1229 = vmatpush.msra.mxu2 %v4908_v43  ;;  %v966_v58 = vmax.f32 %v964_v13, %v965_v26  ;;  %2889 = vpow2.f32 %v1052_v5  ;;  %v4938_v26 = vsub.f32 %v4393_v9, %v4884_v48  ;;  %v1138_v9 = vmul.f32 1.442695, %v4918_v24 }
  0xcc   :  { %7563 = vst [vmem:[#allocation176_spill] sm:$0xff] %v4839_v35  ;;  %v4894_v35 = vsub.f32 %v4461_v38, %v4850_v61  ;;  %v977_v42 = vmax.f32 %v976_v51, %v4879_v46  ;;  %v1168_v38 = vmul.f32 1.442695, %v4874_v28  ;;  %v1170_v51 = vmul.f32 1.442695, %v4905_v36  ;;  %v4924_v52 = vpop.eup %2877  ;;  %1249 = vmatpush.msra.mxu3 %v4920_v19 }
  0xcd   :  { %7564 = vst [vmem:[#allocation177_spill] sm:$0xff] %v4845_v17  ;;  %1190 = vmatpush.msra.mxu0 %v4924_v52  ;;  %2891 = vpow2.f32 %v1054_v27  ;;  %v967_v56 = vrot.slane %v966_v58, 2 }
  0xce   :  { %7565 = vst [vmem:[#allocation178_spill] sm:$0xff] %v4862_v0  ;;  %v1152_v11 = vmul.f32 1.442695, %v4894_v35  ;;  %2893 = vpow2.f32 %v1168_v38  ;;  %v1120_v38 = vmul.f32 1.442695, %v4931_v2 }
  0xcf   :  { %7566 = vst [vmem:[#allocation179_spill] sm:$0xff] %v4867_v37  ;;  %v4933_v37 = vpop.eup %2879  ;;  %2895 = vpow2.f32 %v1170_v51  ;;  %v1122_v51 = vmul.f32 1.442695, %v4938_v26 }
  0xd0   :  { %7567 = vst [vmem:[#allocation180_spill] sm:$0xff] %v4874_v28  ;;  %v1154_v28 = vmul.f32 1.442695, %v4914_v30  ;;  %v4940_v5 = vpop.eup %2881  ;;  %1210 = vmatpush.msra.mxu1 %v4933_v37  ;;  %2897 = vpow2.f32 %v1152_v11  ;;  %v1104_v11 = vmul.f32 1.442695, %v4946_v55 }
  0xd1   :  { %7568 = vst [vmem:[#allocation181_spill] sm:$0xff] %v4881_v14  ;;  %v978_v14 = vrot.slane %v977_v42, 4  ;;  %1230 = vmatpush.msra.mxu2 %v4940_v5 }
  0xd2   :  { %7569 = vst [vmem:[#allocation182_spill] sm:$0xff] %v4888_v39  ;;  %2899 = vpow2.f32 %v1154_v28 }
  0xd3   :  { %7570 = vst [vmem:[#allocation183_spill] sm:$0xff] %v4894_v35  ;;  %v979_v13 = vmax.f32 %v977_v42, %v978_v14  ;;  %v4948_v35 = vpop.eup %2883  ;;  %v968_v14 = vmax.f32 %v966_v58, %v967_v56 }
  0xd4   :  { %7571 = vst [vmem:[#allocation184_spill] sm:$0xff] %v4898_v45  ;;  %v4952_v42 = vpop.eup %2885  ;;  %1250 = vmatpush.msra.mxu3 %v4948_v35 }
  0xd5   :  { %7572 = vst [vmem:[#allocation185_spill] sm:$0xff] %v4900_v44  ;;  %v980_v27 = vrot.slane %v979_v13, 2  ;;  %1191 = vmatpush.msra.mxu0 %v4952_v42  ;;  %v969_v33 = vrot.slane %v968_v14, 1 }
  0xd6   :  { %7573 = vst [vmem:[#allocation186_spill] sm:$0xff] %v4905_v36  ;;  %2673 = vmatmul.msk.f32.vlgmr.msra.gmra.mxu0 %vm444_vm0, %v7530_v20 }
  0xd7   :  { %7574 = vst [vmem:[#allocation187_spill] sm:$0xff] %v4908_v43  ;;  %v4971_v28 = vmax.f32 %v968_v14, %v969_v33 }
  0xd8   :  { %7575 = vst [vmem:[#allocation188_spill] sm:$0xff] %v4914_v30  ;;  %v1136_v30 = vmul.f32 1.442695, %v4898_v45  ;;  %v4956_v45 = vpop.eup %2887 }
  0xd9   :  { %7576 = vst [vmem:[#allocation189_spill] sm:$0xff] %v4918_v24  ;;  %v4960_v58 = vpop.eup %2889  ;;  %1211 = vmatpush.msra.mxu1 %v4956_v45  ;;  %v4985_v14 = vsub.f32 %v4855_v7, %v4971_v28  ;;  %v4991_v33 = vsub.f32 %v4832_v18, %v4971_v28 }
  0xda   :  { %7577 = vst [vmem:[#allocation190_spill] sm:$0xff] %v4920_v19  ;;  %v981_v19 = vmax.f32 %v979_v13, %v980_v27  ;;  %2901 = vpow2.f32 %v1136_v30  ;;  %v4966_v56 = vpop.eup %2891  ;;  %1231 = vmatpush.msra.mxu2 %v4960_v58  ;;  %2674 = vmatmul.msk.f32.vlgmr.msra.gmra.mxu1 %vm444_vm0, %v7530_v20 }
  0xdb   :  { %7578 = vst [vmem:[#allocation191_spill] sm:$0xff] %v4924_v52  ;;  %2903 = vpow2.f32 %v1138_v9  ;;  %v4973_v27 = vpop.eup %2893  ;;  %1251 = vmatpush.msra.mxu3 %v4966_v56  ;;  %2675 = vmatmul.msk.f32.vlgmr.msra.gmra.mxu2 %vm444_vm0, %v7530_v20 }
  0xdc   :  { %7579 = vst [vmem:[#allocation192_spill] sm:$0xff] %v4931_v2  ;;  %v982_v13 = vrot.slane %v981_v19, 1  ;;  %2905 = vpow2.f32 %v1120_v38  ;;  %v4978_v30 = vpop.eup %2895  ;;  %2676 = vmatmul.msk.f32.vlgmr.msra.gmra.mxu3 %vm444_vm0, %v7530_v20  ;;  %1264 = vmatpush.msrb.mxu0 %v4973_v27  ;;  %v4998_v38 = vsub.f32 %v4804_v53, %v4971_v28 }
  0xdd   :  { %7580 = vst [vmem:[#allocation193_spill] sm:$0xff] %v4933_v37  ;;  %2907 = vpow2.f32 %v1122_v51  ;;  %1284 = vmatpush.msrb.mxu1 %v4978_v30  ;;  %v1156_v51 = vmul.f32 1.442695, %v4991_v33 }
  0xde   :  { %7581 = vst [vmem:[#allocation194_spill] sm:$0xff] %v4938_v26  ;;  %v4987_v9 = vmax.f32 %v981_v19, %v982_v13  ;;  %v5002_v26 = vsub.f32 %v4759_v47, %v4971_v28  ;;  %2909 = vpow2.f32 %v1104_v11  ;;  %v1172_v19 = vmul.f32 1.442695, %v4985_v14  ;;  %v7602_v11 = vld [vmem:[#allocation125_spill] sm:$0xff] }
  0xdf   :  { %7582 = vst [vmem:[#allocation195_spill] sm:$0xff] %v4940_v5 }
  0xe0   :  { %7583 = vst [vmem:[#allocation196_spill] sm:$0xff] %v4946_v55  ;;  %v4993_v55 = vpop.eup %2897  ;;  %v5009_v18 = vsub.f32 %v4879_v46, %v4987_v9  ;;  %v5015_v53 = vsub.f32 %v4860_v50, %v4987_v9  ;;  %v5022_v47 = vsub.f32 %v4837_v25, %v4987_v9  ;;  %v5026_v46 = vsub.f32 %v4809_v10, %v4987_v9 }
  0xe1   :  { %7584 = vst [vmem:[#allocation197_spill] sm:$0xff] %v4948_v35  ;;  %v5004_v7 = vpop.eup %2899  ;;  %1265 = vmatpush.msrb.mxu0 %v4993_v55  ;;  %2911 = vpow2.f32 %v1172_v19  ;;  %v1140_v25 = vmul.f32 1.442695, %v4998_v38 }
  0xe2   :  { %7585 = vst [vmem:[#allocation198_spill] sm:$0xff] %v4952_v42  ;;  %v5017_v13 = vpop.eup %2901  ;;  %1285 = vmatpush.msrb.mxu1 %v5004_v7  ;;  %v1174_v50 = vmul.f32 1.442695, %v5009_v18  ;;  %v1158_v2 = vmul.f32 1.442695, %v5015_v53  ;;  %2913 = vpow2.f32 %v1156_v51 }
  0xe3   :  { %7586 = vst [vmem:[#allocation199_spill] sm:$0xff] %v4956_v45  ;;  %1266 = vmatpush.msrb.mxu0 %v5017_v13  ;;  %v1142_v10 = vmul.f32 1.442695, %v5022_v47 }
  0xe4   :  { %7587 = vst [vmem:[#allocation200_spill] sm:$0xff] %v4960_v58  ;;  %2915 = vpow2.f32 %v1174_v50 }
  0xe5   :  { %7588 = vst [vmem:[#allocation201_spill] sm:$0xff] %v4966_v56  ;;  %2917 = vpow2.f32 %v1158_v2 }
  0xe6   :  { %7589 = vst [vmem:[#allocation202_spill] sm:$0xff] %v4973_v27  ;;  %2919 = vpow2.f32 %v1140_v25 }
  0xe7   :  { %7590 = vst [vmem:[#allocation203_spill] sm:$0xff] %v4978_v30  ;;  %2921 = vpow2.f32 %v1142_v10  ;;  %v7618_v10 = vld [vmem:[#allocation115_spill] sm:$0xff] }
  0xe8   :  { %7591 = vst [vmem:[#allocation204_spill] sm:$0xff] %v4985_v14  ;;  %v5030_v14 = vsub.f32 %v7602_v11, %v4884_v48  ;;  %v5044_v11 = vsub.f32 %v4724_v12, %v4971_v28  ;;  %v7610_v12 = vld [vmem:[#allocation121_spill] sm:$0xff] }
  0xe9   :  { %7592 = vst [vmem:[#allocation205_spill] sm:$0xff] %v4991_v33  ;;  %v5032_v33 = vpop.eup %2903 }
  0xea   :  { %7593 = vst [vmem:[#allocation206_spill] sm:$0xff] %v4993_v55  ;;  %v5038_v56 = vpop.eup %2905  ;;  %1286 = vmatpush.msrb.mxu1 %v5032_v33  ;;  %v1106_v50 = vmul.f32 1.442695, %v5030_v14  ;;  %v1108_v2 = vmul.f32 1.442695, %v5044_v11 }
  0xeb   :  { %7594 = vst [vmem:[#allocation207_spill] sm:$0xff] %v4998_v38  ;;  %v5046_v19 = vpop.eup %2907  ;;  %1267 = vmatpush.msrb.mxu0 %v5038_v56  ;;  %v5052_v38 = vsub.f32 %v4778_v22, %v4987_v9 }
  0xec   :  { %7595 = vst [vmem:[#allocation208_spill] sm:$0xff] %v5002_v26  ;;  %v5054_v51 = vpop.eup %2909  ;;  %1287 = vmatpush.msrb.mxu1 %v5046_v19 }
  0xed   :  { %7596 = vst [vmem:[#allocation209_spill] sm:$0xff] %v5004_v7  ;;  %1268 = vmatpush.msrb.mxu0 %v5054_v51  ;;  %v1110_v25 = vmul.f32 1.442695, %v5052_v38 }
  0xee   :  { %7597 = vst [vmem:[#allocation210_spill] sm:$0xff] %v5009_v18  ;;  %v5060_v18 = vsub.f32 %v7610_v12, %v4850_v61  ;;  %v5078_v12 = vsub.f32 %v4637_v54, %v4987_v9 }
  0xef   :  { %7598 = vst [vmem:[#allocation211_spill] sm:$0xff] %v5015_v53  ;;  %v1124_v53 = vmul.f32 1.442695, %v5002_v26  ;;  %v7612_v26 = vld [vmem:[#allocation122_spill] sm:$0xff] }
  0xf0   :  { %7599 = vst [vmem:[#allocation212_spill] sm:$0xff] %v5017_v13  ;;  %v5066_v22 = vsub.f32 %v7612_v26, %v4884_v48  ;;  %v1088_v26 = vmul.f32 1.442695, %v5060_v18 }
  0xf1   :  { %7600 = vst [vmem:[#allocation213_spill] sm:$0xff] %v5022_v47  ;;  %v1126_v47 = vmul.f32 1.442695, %v5026_v46  ;;  %2923 = vpow2.f32 %v1124_v53 }
  0xf2   :  { %7601 = vst [vmem:[#allocation214_spill] sm:$0xff] %v5026_v46  ;;  %v5073_v46 = vpop.eup %2911  ;;  %v1090_v53 = vmul.f32 1.442695, %v5066_v22 }
  0xf3   :  { %7603 = vst [vmem:[#allocation125_spill] sm:$0xff] %v5030_v14  ;;  %v5080_v14 = vpop.eup %2913  ;;  %1304 = vmatpush.msrb.mxu2 %v5073_v46  ;;  %2925 = vpow2.f32 %v1126_v47 }
  0xf4   :  { %7604 = vst [vmem:[#allocation215_spill] sm:$0xff] %v5032_v33  ;;  %2927 = vpow2.f32 %v1106_v50 }
  0xf5   :  { %7605 = vst [vmem:[#allocation216_spill] sm:$0xff] %v5038_v56  ;;  %1305 = vmatpush.msrb.mxu2 %v5080_v14  ;;  %2929 = vpow2.f32 %v1108_v2 }
  0xf6   :  { %7606 = vst [vmem:[#allocation217_spill] sm:$0xff] %v5044_v11  ;;  %v5088_v11 = vpop.eup %2915  ;;  %2931 = vpow2.f32 %v1110_v25 }
  0xf7   :  { %7607 = vst [vmem:[#allocation218_spill] sm:$0xff] %v5046_v19  ;;  %v5071_v19 = vsub.f32 %v4566_v60, %v4971_v28  ;;  %v5086_v60 = vsub.f32 %v7618_v10, %v4850_v61  ;;  %1324 = vmatpush.msrb.mxu3 %v5088_v11  ;;  %v7624_v10 = vld [vmem:[#allocation139_spill] sm:$0xff]  ;;  %2933 = vpow2.f32 %v1088_v26 }
  0xf8   :  { %7608 = vst [vmem:[#allocation219_spill] sm:$0xff] %v5052_v38  ;;  %v7621_v38 = vld [vmem:[#allocation117_spill] sm:$0xff]  ;;  %2935 = vpow2.f32 %v1090_v53 }
  0xf9   :  { %7609 = vst [vmem:[#allocation220_spill] sm:$0xff] %v5054_v51  ;;  %v5093_v54 = vsub.f32 %v7621_v38, %v4884_v48  ;;  %v5095_v51 = vpop.eup %2917  ;;  %v1092_v47 = vmul.f32 1.442695, %v5071_v19  ;;  %v7627_v38 = vld [vmem:[#allocation142_spill] sm:$0xff]  ;;  %v1072_v2 = vmul.f32 1.442695, %v5086_v60 }
  0xfa   :  { %7611 = vst [vmem:[#allocation121_spill] sm:$0xff] %v5060_v18  ;;  %v5102_v18 = vsub.f32 %v7624_v10, %v4971_v28  ;;  %v5104_v50 = vpop.eup %2919  ;;  %1325 = vmatpush.msrb.mxu3 %v5095_v51  ;;  %v7630_v10 = vld [vmem:[#allocation113_spill] sm:$0xff] }
  0xfb   :  { %7613 = vst [vmem:[#allocation122_spill] sm:$0xff] %v5066_v22  ;;  %v1094_v22 = vmul.f32 1.442695, %v5078_v12  ;;  %v5111_v56 = vpop.eup %2921  ;;  %1306 = vmatpush.msrb.mxu2 %v5104_v50  ;;  %2937 = vpow2.f32 %v1092_v47 }
  0xfc   :  { %7614 = vst [vmem:[#allocation221_spill] sm:$0xff] %v5071_v19  ;;  %v5118_v19 = vsub.f32 %v7630_v10, %v4850_v61  ;;  %v5120_v25 = vpop.eup %2923  ;;  %1326 = vmatpush.msrb.mxu3 %v5111_v56  ;;  %v1076_v26 = vmul.f32 1.442695, %v5102_v18  ;;  %v7636_v61 = vld [vmem:[#allocation138_spill] sm:$0xff] }
  0xfd   :  { %7615 = vst [vmem:[#allocation222_spill] sm:$0xff] %v5073_v46  ;;  %v5109_v46 = vsub.f32 %v7627_v38, %v4987_v9  ;;  %v7633_v38 = vld [vmem:[#allocation116_spill] sm:$0xff]  ;;  %1307 = vmatpush.msrb.mxu2 %v5120_v25  ;;  %v5134_v10 = vsub.f32 %v7636_v61, %v4971_v28  ;;  %2939 = vpow2.f32 %v1094_v22 }
  0xfe   :  { %7616 = vst [vmem:[#allocation223_spill] sm:$0xff] %v5078_v12  ;;  %v1074_v12 = vmul.f32 1.442695, %v5093_v54  ;;  %2941 = vpow2.f32 %v1072_v2  ;;  %v1056_v47 = vmul.f32 1.442695, %v5118_v19 }
  0xff   :  { %7617 = vst [vmem:[#allocation224_spill] sm:$0xff] %v5080_v14  ;;  %v5125_v14 = vsub.f32 %v7633_v38, %v4884_v48  ;;  %v7639_v48 = vld [vmem:[#allocation141_spill] sm:$0xff] }
 0x100   :  { %7619 = vst [vmem:[#allocation115_spill] sm:$0xff] %v5086_v60  ;;  %v5141_v38 = vsub.f32 %v7639_v48, %v4987_v9  ;;  %2943 = vpow2.f32 %v1074_v12  ;;  %v1060_v9 = vmul.f32 1.442695, %v5134_v10 }
 0x101   :  { %7620 = vst [vmem:[#allocation225_spill] sm:$0xff] %v5088_v11  ;;  %v5127_v11 = vpop.eup %2925  ;;  %v1058_v22 = vmul.f32 1.442695, %v5125_v14  ;;  %2945 = vpow2.f32 %v1076_v26 }
 0x102   :  { %7622 = vst [vmem:[#allocation117_spill] sm:$0xff] %v5093_v54  ;;  %v5136_v53 = vpop.eup %2927  ;;  %v1078_v54 = vmul.f32 1.442695, %v5109_v46  ;;  %1327 = vmatpush.msrb.mxu3 %v5127_v11  ;;  %v1062_v2 = vmul.f32 1.442695, %v5141_v38 }
 0x103   :  { %7623 = vst [vmem:[#allocation226_spill] sm:$0xff] %v5095_v51  ;;  %v5143_v60 = vpop.eup %2929  ;;  %1288 = vmatpush.msrb.mxu1 %v5136_v53 }
 0x104   :  { %7625 = vst [vmem:[#allocation139_spill] sm:$0xff] %v5102_v18  ;;  %v5148_v28 = vpop.eup %2931  ;;  %1308 = vmatpush.msrb.mxu2 %v5143_v60  ;;  %2947 = vpow2.f32 %v1078_v54  ;;  %v485_v18 = vpop.f32.mrf.mxu1 }
 0x105   :  { %7626 = vst [vmem:[#allocation227_spill] sm:$0xff] %v5104_v50  ;;  %v5152_v61 = vpop.eup %2933  ;;  %1328 = vmatpush.msrb.mxu3 %v5148_v28  ;;  %2949 = vpow2.f32 %v1056_v47 }
 0x106   :  { %7628 = vst [vmem:[#allocation142_spill] sm:$0xff] %v5109_v46  ;;  %v5156_v48 = vpop.eup %2935  ;;  %1269 = vmatpush.msrb.mxu0 %v5152_v61  ;;  %2951 = vpow2.f32 %v1058_v22 }
 0x107   :  { %7629 = vst [vmem:[#allocation228_spill] sm:$0xff] %v5111_v56  ;;  %v5160_v46 = vpop.eup %2937  ;;  %1289 = vmatpush.msrb.mxu1 %v5156_v48  ;;  %2953 = vpow2.f32 %v1060_v9 }
 0x108   :  { %7631 = vst [vmem:[#allocation113_spill] sm:$0xff] %v5118_v19  ;;  %v5163_v12 = vpop.eup %2939  ;;  %1309 = vmatpush.msrb.mxu2 %v5160_v46  ;;  %2955 = vpow2.f32 %v1062_v2 }
 0x109   :  { %7632 = vst [vmem:[#allocation229_spill] sm:$0xff] %v5120_v25  ;;  %v5166_v26 = vpop.eup %2941  ;;  %1329 = vmatpush.msrb.mxu3 %v5163_v12 }
 0x10a   :  { %7634 = vst [vmem:[#allocation116_spill] sm:$0xff] %v5125_v14  ;;  %1270 = vmatpush.msrb.mxu0 %v5166_v26 }
 0x10b   :  { %7635 = vst [vmem:[#allocation230_spill] sm:$0xff] %v5127_v11 }
 0x10c   :  { %7637 = vst [vmem:[#allocation138_spill] sm:$0xff] %v5134_v10  ;;  %v5169_v10 = vpop.eup %2943 }
 0x10d   :  { %7638 = vst [vmem:[#allocation231_spill] sm:$0xff] %v5136_v53  ;;  %v5172_v54 = vpop.eup %2945  ;;  %1290 = vmatpush.msrb.mxu1 %v5169_v10 }
 0x10e   :  { %7640 = vst [vmem:[#allocation141_spill] sm:$0xff] %v5141_v38  ;;  %v5175_v47 = vpop.eup %2947  ;;  %1310 = vmatpush.msrb.mxu2 %v5172_v54 }
 0x10f   :  { %7641 = vst [vmem:[#allocation232_spill] sm:$0xff] %v5143_v60  ;;  %v5178_v38 = vpop.eup %2949  ;;  %1330 = vmatpush.msrb.mxu3 %v5175_v47 }
 0x110   :  { %7642 = vst [vmem:[#allocation233_spill] sm:$0xff] %v5148_v28  ;;  %v5181_v22 = vpop.eup %2951  ;;  %1271 = vmatpush.msrb.mxu0 %v5178_v38 }
 0x111   :  { %7643 = vst [vmem:[#allocation234_spill] sm:$0xff] %v5152_v61  ;;  %v5184_v9 = vpop.eup %2953  ;;  %1291 = vmatpush.msrb.mxu1 %v5181_v22  ;;  %2677 = vmatmul.msk.f32.vlgmr.msrb.gmra.mxu0 %vm444_vm0, %v7530_v20 }
 0x112   :  { %7644 = vst [vmem:[#allocation235_spill] sm:$0xff] %v5156_v48  ;;  %v5189_v2 = vpop.eup %2955  ;;  %1311 = vmatpush.msrb.mxu2 %v5184_v9  ;;  %2678 = vmatmul.msk.f32.vlgmr.msrb.gmra.mxu1 %vm444_vm0, %v7530_v20 }
 0x113   :  { %7645 = vst [vmem:[#allocation236_spill] sm:$0xff] %v5160_v46  ;;  %1331 = vmatpush.msrb.mxu3 %v5189_v2  ;;  %2679 = vmatmul.msk.f32.vlgmr.msrb.gmra.mxu2 %vm444_vm0, %v7530_v20  ;;  %v5201_v46 = vperm.slane %v485_v18, 0 }
 0x114   :  { %7646 = vst [vmem:[#allocation237_spill] sm:$0xff] %v5163_v12  ;;  %2680 = vmatmul.msk.f32.vlgmr.msrb.gmra.mxu3 %vm444_vm0, %v7530_v20 }
 0x115   :  { %7647 = vst [vmem:[#allocation238_spill] sm:$0xff] %v5166_v26  ;;  %v640_v33 = vand.u32 2147483647, %v5201_v46  ;;  %v642_v35 = vand.u32 2147483648, %v5201_v46  ;;  %vm636_vm2 = vweird.f32 %v5201_v46 }
 0x116   :  { %7648 = vst [vmem:[#allocation239_spill] sm:$0xff] %v5169_v10 }
 0x117   :  { %7649 = vst [vmem:[#allocation240_spill] sm:$0xff] %v5172_v54  ;;  %v505_v54 = vpop.f32.mrf.mxu2  ;;  %vm5267_vm4 = vcmp.eq.f32.partialorder %v640_v33, 8.507059e+37 }
 0x118   :  { %7650 = vst [vmem:[#allocation241_spill] sm:$0xff] %v5175_v47  ;;  %v465_v47 = vpop.f32.mrf.mxu0  ;;  %v5203_v28 = vperm.slane %v505_v54, 0 }
 0x119   :  { %7651 = vst [vmem:[#allocation242_spill] sm:$0xff] %v5178_v38  ;;  %v5199_v12 = vperm.slane %v465_v47, 0 }
 0x11a   :  { %7652 = vst [vmem:[#allocation243_spill] sm:$0xff] %v5181_v22  ;;  %vm651_vm6 = vweird.f32 %v5203_v28  ;;  %v657_v33 = vand.u32 2147483648, %v5203_v28 }
 0x11b   :  { %7653 = vst [vmem:[#allocation244_spill] sm:$0xff] %v5184_v9  ;;  %v525_v9 = vpop.f32.mrf.mxu3  ;;  %2957 = vrcp.f32 %v5199_v12  ;;  %v625_v58 = vand.u32 2147483647, %v5199_v12  ;;  %v627_v24 = vand.u32 2147483648, %v5199_v12  ;;  %vm621_vm1 = vweird.f32 %v5199_v12 }
 0x11c   :  { %7654 = vst [vmem:[#allocation245_spill] sm:$0xff] %v5189_v2  ;;  %v5206_v60 = vperm.slane %v525_v9, 0  ;;  %2959 = vrcp.f32 %v5201_v46  ;;  %v658_v39 = vor.u32 1.1754944e-38, %v657_v33 }
 0x11d   :  { %2961 = vrcp.f32 %v5203_v28  ;;  %v628_v36 = vor.u32 1.1754944e-38, %v627_v24  ;;  %vm5262_vm3 = vcmp.eq.f32.partialorder %v625_v58, 8.507059e+37  ;;  %v655_v58 = vand.u32 2147483647, %v5203_v28 }
 0x11e   :  { %2963 = vrcp.f32 %v5206_v60  ;;  %vm666_vm9 = vweird.f32 %v5206_v60 }
 0x11f   :  { %v5213_v14 = vpop.f32.mrf.mxu1  ;;  %2965 = vlog2.f32 %v465_v47  ;;  %vm5319_vm13 = vcmp.eq.f32.partialorder %v655_v58, 8.507059e+37 }
 0x120   :  { %v5210_v2 = vpop.f32.mrf.mxu0  ;;  %v5227_v10 = vperm.slane %v5213_v14, 0  ;;  %2967 = vlog2.f32 %v485_v18 }
 0x121   :  { %v5215_v22 = vpop.eup %2957  ;;  %v5220_v38 = vperm.slane %v5210_v2, 0 }
 0x122   :  { %v5217_v19 = vpop.eup %2959  ;;  %v617_v56 = vmul.f32 %v5215_v22, %v5199_v12  ;;  %vm622_vm5 = vweird.f32 %v5215_v22 }
 0x123   :  { %v5224_v25 = vpop.eup %2961  ;;  %v632_v48 = vmul.f32 %v5217_v19, %v5201_v46  ;;  %2969 = vrcp.f32 %v5220_v38  ;;  %vm637_vm7 = vweird.f32 %v5217_v19  ;;  %vm5290_vm10 = vmor %vm621_vm1, %vm622_vm5  ;;  %v687_v27 = vand.u32 2147483648, %v5220_v38 }
 0x124   :  { %v5241_v51 = vpop.eup %2963  ;;  %v647_v53 = vmul.f32 %v5224_v25, %v5203_v28  ;;  %2971 = vrcp.f32 %v5227_v10  ;;  %v618_v47 = vsub.f32 1.0, %v617_v56  ;;  %vm652_vm8 = vweird.f32 %v5224_v25  ;;  %vm5303_vm11 = vmor %vm636_vm2, %vm637_vm7 }
 0x125   :  { %v662_v18 = vmul.f32 %v5241_v51, %v5206_v60  ;;  %v633_v13 = vsub.f32 1.0, %v632_v48  ;;  %v2966_v5 = vpop.eup %2965  ;;  %vm5315_vm12 = vmor %vm651_vm6, %vm652_vm8  ;;  %vm667_vm14 = vweird.f32 %v5241_v51  ;;  %vm681_vm2 = vweird.f32 %v5220_v38 }
 0x126   :  { %v5222_v11 = vpop.f32.mrf.mxu2  ;;  %v648_v7 = vsub.f32 1.0, %v647_v53  ;;  %v2968_v55 = vpop.eup %2967  ;;  %v619_v43 = vmul.f32 %v5215_v22, %v618_v47  ;;  %v793_v20 = vmul.f32 0.6931472, %v2966_v5  ;;  %vm5341_vm15 = vmor %vm666_vm9, %vm667_vm14  ;;  %v688_v12 = vor.u32 1.1754944e-38, %v687_v27 }
 0x127   :  { %v5229_v26 = vpop.f32.mrf.mxu3  ;;  %v5234_v50 = vperm.slane %v5222_v11, 0  ;;  %v663_v48 = vsub.f32 1.0, %v662_v18  ;;  %v634_v53 = vmul.f32 %v5217_v19, %v633_v13  ;;  %v795_v45 = vmul.f32 0.6931472, %v2968_v55 }
 0x128   :  { %v5239_v61 = vperm.slane %v5229_v26, 0  ;;  %v649_v24 = vmul.f32 %v5224_v25, %v648_v7  ;;  %v620_v5 = vadd.f32 %v5215_v22, %v619_v43  ;;  %v5328_v28 = vperm.slane %v793_v20, 0 }
 0x129   :  { %2973 = vrcp.f32 %v5234_v50  ;;  %v5255_v56 = vpop.eup %2969  ;;  %v664_v7 = vmul.f32 %v5241_v51, %v663_v48  ;;  %v635_v40 = vadd.f32 %v5217_v19, %v634_v53  ;;  %v672_v48 = vand.u32 2147483648, %v5206_v60 }
 0x12a   :  { %2975 = vrcp.f32 %v5239_v61  ;;  %v5260_v30 = vpop.eup %2971  ;;  %v677_v37 = vmul.f32 %v5255_v56, %v5220_v38  ;;  %v650_v43 = vadd.f32 %v5224_v25, %v649_v24  ;;  %v624_v17 = vsel %vm5290_vm10, %v5215_v22, %v620_v5  ;;  %v7703_v24 = vld [vmem:[#allocation36_spill] sm:$0xff] }
 0x12b   :  { %2977 = vlog2.f32 %v505_v54  ;;  %v692_v52 = vmul.f32 %v5260_v30, %v5227_v10  ;;  %v5331_v31 = vadd.f32 %v5241_v51, %v664_v7  ;;  %v639_v58 = vsel %vm5303_vm11, %v5217_v19, %v635_v40 }
 0x12c   :  { %2979 = vlog2.f32 %v525_v9  ;;  %v643_v9 = vor.u32 1.1754944e-38, %v642_v35  ;;  %v670_v35 = vand.u32 2147483647, %v5206_v60  ;;  %v678_v33 = vsub.f32 1.0, %v677_v37 }
 0x12d   :  { %2981 = vlog2.f32 %v5210_v2  ;;  %v693_v32 = vsub.f32 1.0, %v692_v52  ;;  %v654_v2 = vsel %vm5315_vm12, %v5224_v25, %v650_v43  ;;  %v673_v40 = vor.u32 1.1754944e-38, %v672_v48 }
 0x12e   :  { %2983 = vlog2.f32 %v5213_v14  ;;  %vm5346_vm1 = vcmp.eq.f32.partialorder %v670_v35, 8.507059e+37  ;;  %v5350_v37 = vperm.slane %v795_v45, 0  ;;  %v5359_v60 = vsel %vm5262_vm3, %v628_v36, %v624_v17 }
 0x12f   :  { %v5271_v47 = vpop.eup %2973  ;;  %2985 = vlog2.f32 %v5222_v11  ;;  %7673 = vst [vmem:[#allocation248_spill] sm:$0xff] %v5359_v60  ;;  %v5367_v25 = vsel %vm5319_vm13, %v658_v39, %v654_v2  ;;  %v694_v45 = vmul.f32 %v5260_v30, %v693_v32  ;;  %vm682_vm3 = vweird.f32 %v5255_v56  ;;  %v7705_v2 = vld [vmem:[#allocation38_spill] sm:$0xff] }
 0x130   :  { %v5275_v18 = vpop.eup %2975  ;;  %v707_v44 = vmul.f32 %v5271_v47, %v5234_v50  ;;  %7675 = vst [vmem:[#allocation250_spill] sm:$0xff] %v5367_v25  ;;  %v685_v39 = vand.u32 2147483647, %v5220_v38  ;;  %vm697_vm5 = vweird.f32 %v5260_v30  ;;  %v700_v32 = vand.u32 2147483647, %v5227_v10  ;;  %vm5389_vm6 = vmor %vm681_vm2, %vm682_vm3 }
 0x131   :  { %v2978_v13 = vpop.eup %2977  ;;  %v722_v53 = vmul.f32 %v5275_v18, %v5239_v61  ;;  %2987 = vlog2.f32 %v5229_v26  ;;  %v695_v5 = vadd.f32 %v5260_v30, %v694_v45  ;;  %vm711_vm7 = vweird.f32 %v5234_v50 }
 0x132   :  { %v2980_v55 = vpop.eup %2979  ;;  %v797_v63 = vmul.f32 0.6931472, %v2978_v13  ;;  %v708_v20 = vsub.f32 1.0, %v707_v44  ;;  %v5363_v44 = vsel %vm5267_vm4, %v643_v9, %v639_v58  ;;  %vm696_vm4 = vweird.f32 %v5227_v10 }
 0x133   :  { %v799_v0 = vmul.f32 0.6931472, %v2980_v55  ;;  %v723_v22 = vsub.f32 1.0, %v722_v53  ;;  %7674 = vst [vmem:[#allocation249_spill] sm:$0xff] %v5363_v44  ;;  %v2982_v14 = vpop.eup %2981  ;;  %vm712_vm8 = vweird.f32 %v5271_v47  ;;  %vm5396_vm9 = vmor %vm696_vm4, %vm697_vm5  ;;  %vm726_vm10 = vweird.f32 %v5239_v61  ;;  %v7699_v55 = vld [vmem:[#allocation58_spill] sm:$0xff] }
 0x134   :  { %v5353_v52 = vperm.slane %v797_v63, 0  ;;  %v669_v63 = vsel %vm5341_vm15, %v5241_v51, %v5331_v31  ;;  %v709_v17 = vmul.f32 %v5271_v47, %v708_v20  ;;  %v2984_v31 = vpop.eup %2983  ;;  %v801_v11 = vmul.f32 0.6931472, %v2982_v14  ;;  %vm5407_vm12 = vmor %vm711_vm7, %vm712_vm8 }
 0x135   :  { %v5355_v19 = vperm.slane %v799_v0, 0  ;;  %v679_v0 = vmul.f32 %v5255_v56, %v678_v33  ;;  %v724_v36 = vmul.f32 %v5275_v18, %v723_v22  ;;  %v702_v51 = vand.u32 2147483648, %v5227_v10  ;;  %v2986_v54 = vpop.eup %2985 }
 0x136   :  { %7671 = vst [vmem:[#allocation246_spill] sm:$0xff] %v5353_v52  ;;  %v710_v10 = vadd.f32 %v5271_v47, %v709_v17  ;;  %vm727_vm11 = vweird.f32 %v5275_v18  ;;  %v803_v38 = vmul.f32 0.6931472, %v2984_v31  ;;  %v715_v7 = vand.u32 2147483647, %v5234_v50 }
 0x137   :  { %7672 = vst [vmem:[#allocation247_spill] sm:$0xff] %v5355_v19  ;;  %v680_v9 = vadd.f32 %v5255_v56, %v679_v0  ;;  %v725_v26 = vadd.f32 %v5275_v18, %v724_v36  ;;  %v717_v43 = vand.u32 2147483648, %v5234_v50  ;;  %v732_v48 = vand.u32 2147483648, %v5239_v61  ;;  %vm5420_vm15 = vmor %vm726_vm10, %vm727_vm11  ;;  %v2988_v42 = vpop.eup %2987 }
 0x138   :  { %v703_v53 = vor.u32 1.1754944e-38, %v702_v51  ;;  %v805_v46 = vmul.f32 0.6931472, %v2986_v54  ;;  %v730_v58 = vand.u32 2147483647, %v5239_v61  ;;  %vm686_vm13 = vcmp.eq.f32.partialorder %v685_v39, 8.507059e+37 }
 0x139   :  { %v684_v33 = vsel %vm5389_vm6, %v5255_v56, %v680_v9  ;;  %v699_v50 = vsel %vm5396_vm9, %v5260_v30, %v695_v5  ;;  %vm701_vm14 = vcmp.eq.f32.partialorder %v700_v32, 8.507059e+37  ;;  %v5426_v20 = vsel %vm5346_vm1, %v673_v40, %v669_v63  ;;  %v7696_v51 = vld [vmem:[#allocation49_spill] sm:$0xff] }
 0x13a   :  { %7684 = vst [vmem:[#allocation251_spill] sm:$0xff] %v5426_v20  ;;  %v5428_v22 = vperm.slane %v801_v11, 0  ;;  %v714_v56 = vsel %vm5407_vm12, %v5271_v47, %v710_v10  ;;  %v729_v30 = vsel %vm5420_vm15, %v5275_v18, %v725_v26  ;;  %v5436_v61 = vperm.slane %v803_v38, 0  ;;  %v7692_v18 = vld [vmem:[#allocation48_spill] sm:$0xff] }
 0x13b   :  { %vm716_vm2 = vcmp.eq.f32.partialorder %v715_v7, 8.507059e+37  ;;  %v718_v14 = vor.u32 1.1754944e-38, %v717_v43  ;;  %v733_v0 = vor.u32 1.1754944e-38, %v732_v48  ;;  %v5438_v45 = vsel %vm686_vm13, %v688_v12, %v684_v33  ;;  %v7694_v11 = vld [vmem:[#allocation56_spill] sm:$0xff]  ;;  %v7704_v33 = vld [vmem:[#allocation42_spill] sm:$0xff] }
 0x13c   :  { %7685 = vst [vmem:[#allocation252_spill] sm:$0xff] %v5428_v22  ;;  %v5440_v13 = vsel %vm701_vm14, %v703_v53, %v699_v50  ;;  %v5442_v40 = vperm.slane %v805_v46, 0  ;;  %vm731_vm1 = vcmp.eq.f32.partialorder %v730_v58, 8.507059e+37  ;;  %v5448_v47 = vmul.f32 0.6931472, %v2988_v42  ;;  %v7715_v7 = vld [vmem:[#allocation20_spill] sm:$0xff] }
 0x13d   :  { %7686 = vst [vmem:[#allocation253_spill] sm:$0xff] %v5436_v61  ;;  %v5444_v63 = vsel %vm716_vm2, %v718_v14, %v714_v56  ;;  %v5446_v17 = vsel %vm731_vm1, %v733_v0, %v729_v30  ;;  %v5452_v39 = vmul.f32 %v7692_v18, %v5367_v25  ;;  %v5458_v32 = vmul.f32 %v7694_v11, %v5426_v20  ;;  %v7706_v56 = vld [vmem:[#allocation46_spill] sm:$0xff]  ;;  %v7707_v14 = vld [vmem:[#allocation39_spill] sm:$0xff] }
 0x13e   :  { %7687 = vst [vmem:[#allocation254_spill] sm:$0xff] %v5438_v45  ;;  %v5462_v54 = vmul.f32 %v7696_v51, %v5367_v25  ;;  %v5470_v10 = vmul.f32 %v7699_v55, %v5426_v20  ;;  %v5483_v46 = vmul.f32 %v7703_v24, %v5359_v60  ;;  %v5488_v50 = vmul.f32 %v7704_v33, %v5363_v44  ;;  %v7710_v51 = vld [vmem:[#allocation65_spill] sm:$0xff] }
 0x13f   :  { %7688 = vst [vmem:[#allocation255_spill] sm:$0xff] %v5440_v13  ;;  %v5492_v42 = vmul.f32 %v7705_v2, %v5359_v60  ;;  %v5496_v30 = vmul.f32 %v7706_v56, %v5363_v44  ;;  %v5500_v0 = vmul.f32 %v7707_v14, %v5359_v60  ;;  %v5512_v55 = vmul.f32 %v7710_v51, %v5363_v44  ;;  %v7711_v2 = vld [vmem:[#allocation68_spill] sm:$0xff] }
 0x140   :  { %7689 = vst [vmem:[#allocation256_spill] sm:$0xff] %v5442_v40  ;;  %v5520_v56 = vmul.f32 %v7711_v2, %v5359_v60  ;;  %v872_v5 = vsub.f32 %v7715_v7, %v5328_v28 }
 0x141   :  { %7690 = vst [vmem:[#allocation257_spill] sm:$0xff] %v5444_v63 }
 0x142   :  { %7691 = vst [vmem:[#allocation258_spill] sm:$0xff] %v5446_v17 }
 0x143   :  { %7693 = vst [vmem:[#allocation48_spill] sm:$0xff] %v5452_v39 }
 0x144   :  { %7695 = vst [vmem:[#allocation56_spill] sm:$0xff] %v5458_v32 }
 0x145   :  { %7697 = vst [vmem:[#allocation49_spill] sm:$0xff] %v5462_v54 }
 0x146   :  { %7700 = vst [vmem:[#allocation58_spill] sm:$0xff] %v5470_v10 }
 0x147   :  { %7712 = vst [vmem:[#allocation36_spill] sm:$0xff] %v5520_v56 }
 0x153   :  { %v1193_v36 = vpop.f32.mrf.mxu0 }
 0x154   :  { %v5454_v27 = vperm.slane %v1193_v36, 0  ;;  %2989 = vlog2.f32 %v1193_v36  ;;  %v7708_v36 = vld [vmem:[#allocation52_spill] sm:$0xff] }
 0x155   :  { %v5504_v18 = vmul.f32 %v7708_v36, %v5363_v44 }
 0x156   :  { %v1355_v26 = vand.u32 2147483648, %v5454_v27  ;;  %v1353_v12 = vand.u32 2147483647, %v5454_v27  ;;  %vm1349_vm3 = vweird.f32 %v5454_v27 }
 0x157   :  { %v1213_v31 = vpop.f32.mrf.mxu1 }
 0x158   :  { %v5464_v9 = vperm.slane %v1213_v31, 0  ;;  %2991 = vlog2.f32 %v1213_v31  ;;  %v7709_v31 = vld [vmem:[#allocation64_spill] sm:$0xff]  ;;  %v5515_v33 = vor.u32 1.1754944e-38, %v1355_v26  ;;  %vm5522_vm5 = vcmp.eq.f32.partialorder %v1353_v12, 8.507059e+37 }
 0x159   :  { %2993 = vrcp.f32 %v5454_v27  ;;  %v5508_v11 = vmul.f32 %v7709_v31, %v5359_v60  ;;  %v7716_v26 = vld [vmem:[#allocation24_spill] sm:$0xff] }
 0x15a   :  { %2995 = vrcp.f32 %v5464_v9  ;;  %v1370_v53 = vand.u32 2147483648, %v5464_v9  ;;  %v1368_v58 = vand.u32 2147483647, %v5464_v9  ;;  %v2990_v24 = vpop.eup %2989  ;;  %vm1364_vm4 = vweird.f32 %v5464_v9 }
 0x15b   :  { %v1521_v31 = vmul.f32 0.6931472, %v2990_v24  ;;  %v873_v17 = vsub.f32 %v7716_v26, %v5350_v37  ;;  %v7719_v24 = vld [vmem:[#allocation21_spill] sm:$0xff] }
 0x15c   :  { %v1371_v48 = vor.u32 1.1754944e-38, %v1370_v53  ;;  %vm5530_vm6 = vcmp.eq.f32.partialorder %v1368_v58, 8.507059e+37  ;;  %v864_v53 = vsub.f32 %v7719_v24, %v5328_v28  ;;  %v7720_v26 = vld [vmem:[#allocation25_spill] sm:$0xff]  ;;  %v7721_v58 = vld [vmem:[#allocation22_spill] sm:$0xff] }
 0x15d   :  { %v865_v45 = vsub.f32 %v7720_v26, %v5350_v37  ;;  %v5545_v25 = vperm.slane %v1521_v31, 0  ;;  %v7723_v31 = vld [vmem:[#allocation23_spill] sm:$0xff] }
 0x15e   :  { %v2992_v14 = vpop.eup %2991  ;;  %v1233_v51 = vpop.f32.mrf.mxu2 }
 0x15f   :  { %v2994_v40 = vpop.eup %2993  ;;  %v1523_v2 = vmul.f32 0.6931472, %v2992_v14  ;;  %v5534_v61 = vperm.slane %v1233_v51, 0  ;;  %2997 = vlog2.f32 %v1233_v51  ;;  %v1253_v12 = vpop.f32.mrf.mxu3  ;;  %v7722_v51 = vld [vmem:[#allocation26_spill] sm:$0xff] }
 0x160   :  { %v2996_v13 = vpop.eup %2995  ;;  %v1345_v22 = vmul.f32 %v2994_v40, %v5454_v27  ;;  %v5539_v7 = vperm.slane %v1253_v12, 0  ;;  %vm1350_vm7 = vweird.f32 %v2994_v40 }
 0x161   :  { %v1360_v14 = vmul.f32 %v2996_v13, %v5464_v9  ;;  %2999 = vrcp.f32 %v5534_v61  ;;  %v5551_v43 = vperm.slane %v1523_v2, 0  ;;  %v1385_v54 = vand.u32 2147483648, %v5534_v61  ;;  %vm5563_vm9 = vmor %vm1349_vm3, %vm1350_vm7 }
 0x162   :  { %v1346_v10 = vsub.f32 1.0, %v1345_v22  ;;  %vm1365_vm8 = vweird.f32 %v2996_v13  ;;  %3001 = vrcp.f32 %v5539_v7  ;;  %v1383_v56 = vand.u32 2147483647, %v5534_v61 }
 0x163   :  { %v1361_v60 = vsub.f32 1.0, %v1360_v14  ;;  %v1400_v44 = vand.u32 2147483648, %v5539_v7  ;;  %v1398_v38 = vand.u32 2147483647, %v5539_v7  ;;  %3003 = vlog2.f32 %v1253_v12  ;;  %vm5572_vm10 = vmor %vm1364_vm4, %vm1365_vm8 }
 0x164   :  { %v1347_v20 = vmul.f32 %v2994_v40, %v1346_v10  ;;  %v1600_v10 = vsub.f32 %v4574_v34, %v5545_v25  ;;  %vm1379_vm11 = vweird.f32 %v5534_v61  ;;  %v1386_v27 = vor.u32 1.1754944e-38, %v1385_v54 }
 0x165   :  { %v2998_v19 = vpop.eup %2997  ;;  %v1362_v14 = vmul.f32 %v2996_v13, %v1361_v60  ;;  %v1601_v60 = vsub.f32 %v4599_v4, %v5551_v43  ;;  %v1401_v12 = vor.u32 1.1754944e-38, %v1400_v44  ;;  %v1592_v34 = vsub.f32 %v4578_v29, %v5545_v25 }
 0x166   :  { %v1348_v26 = vadd.f32 %v2994_v40, %v1347_v20  ;;  %v1525_v22 = vmul.f32 0.6931472, %v2998_v19  ;;  %v1728_v39 = vsub.f32 %v872_v5, %v1600_v10  ;;  %vm5584_vm13 = vcmp.eq.f32.partialorder %v1383_v56, 8.507059e+37 }
 0x167   :  { %v3000_v52 = vpop.eup %2999  ;;  %v1363_v35 = vadd.f32 %v2996_v13, %v1362_v14  ;;  %vm1394_vm14 = vweird.f32 %v5539_v7  ;;  %v1593_v4 = vsub.f32 %v4603_v59, %v5551_v43  ;;  %v1729_v54 = vsub.f32 %v873_v17, %v1601_v60 }
 0x168   :  { %v1352_v20 = vsel %vm5563_vm9, %v2994_v40, %v1348_v26  ;;  %v1375_v9 = vmul.f32 %v3000_v52, %v5534_v61  ;;  %vm1380_vm12 = vweird.f32 %v3000_v52  ;;  %v3002_v19 = vpop.eup %3001  ;;  %v5598_v40 = vperm.slane %v1525_v22, 0 }
 0x169   :  { %v5594_v29 = vsel %vm5522_vm5, %v5515_v33, %v1352_v20  ;;  %v1367_v44 = vsel %vm5572_vm10, %v2996_v13, %v1363_v35  ;;  %v1390_v26 = vmul.f32 %v3002_v19, %v5539_v7  ;;  %vm5605_vm15 = vcmp.eq.f32.partialorder %v1398_v38, 8.507059e+37  ;;  %v3004_v33 = vpop.eup %3003  ;;  %vm1381_vm1 = vmor %vm1379_vm11, %vm1380_vm12 }
 0x16a   :  { %v5602_v5 = vsel %vm5530_vm6, %v1371_v48, %v1367_v44  ;;  %v1376_v56 = vsub.f32 1.0, %v1375_v9  ;;  %v1720_v36 = vsub.f32 %v864_v53, %v1592_v34  ;;  %v1512_v32 = vmul.f32 %v4654_v16, %v5594_v29 }
 0x16b   :  { %v1513_v13 = vmul.f32 %v4685_v15, %v5602_v5  ;;  %v1504_v63 = vmul.f32 %v4663_v62, %v5594_v29  ;;  %v1505_v17 = vmul.f32 %v4697_v57, %v5602_v5  ;;  %v1391_v48 = vsub.f32 1.0, %v1390_v26 }
 0x16c   :  { %v1377_v35 = vmul.f32 %v3000_v52, %v1376_v56  ;;  %v1527_v38 = vmul.f32 0.6931472, %v3004_v33  ;;  %v1721_v22 = vsub.f32 %v865_v45, %v1593_v4  ;;  %v1664_v2 = vsub.f32 %v5483_v46, %v1512_v32  ;;  %v7739_v33 = vld [vmem:[#allocation147_spill] sm:$0xff]  ;;  %v7740_v32 = vld [vmem:[#allocation30_spill] sm:$0xff] }
 0x16d   :  { %v1665_v53 = vsub.f32 %v5488_v50, %v1513_v13  ;;  %v1656_v14 = vsub.f32 %v5492_v42, %v1504_v63  ;;  %v1657_v16 = vsub.f32 %v5496_v30, %v1505_v17  ;;  %v1392_v15 = vmul.f32 %v3002_v19, %v1391_v48  ;;  %v7733_v42 = vld [vmem:[#allocation145_spill] sm:$0xff]  ;;  %v7742_v63 = vld [vmem:[#allocation48_spill] sm:$0xff] }
 0x16e   :  { %v1378_v10 = vadd.f32 %v3000_v52, %v1377_v35  ;;  %vm1395_vm2 = vweird.f32 %v3002_v19  ;;  %v1496_v62 = vmul.f32 %v4675_v6, %v5594_v29  ;;  %v1792_v57 = vmul.f32 %v1728_v39, %v1664_v2  ;;  %v7743_v17 = vld [vmem:[#allocation28_spill] sm:$0xff]  ;;  %v7744_v35 = vld [vmem:[#allocation246_spill] sm:$0xff] }
 0x16f   :  { %v1793_v45 = vmul.f32 %v1729_v54, %v1665_v53  ;;  %v1784_v60 = vmul.f32 %v1720_v36, %v1656_v14  ;;  %v1785_v46 = vmul.f32 %v1721_v22, %v1657_v16  ;;  %v1393_v50 = vadd.f32 %v3002_v19, %v1392_v15  ;;  %vm1396_vm3 = vmor %vm1394_vm14, %vm1395_vm2  ;;  %v7746_v22 = vld [vmem:[#allocation177_spill] sm:$0xff]  ;;  %v7747_v53 = vld [vmem:[#allocation56_spill] sm:$0xff] }
 0x170   :  { %v1382_v34 = vsel %vm1381_vm1, %v3000_v52, %v1378_v10  ;;  %v1584_v20 = vsub.f32 %v7733_v42, %v5545_v25  ;;  %v1648_v30 = vsub.f32 %v5500_v0, %v1496_v62  ;;  %v5635_v6 = vperm.slane %v1527_v38, 0  ;;  %1808 = vmatpush.msra.mxu0 %v1792_v57  ;;  %v7748_v16 = vld [vmem:[#allocation32_spill] sm:$0xff]  ;;  %v7749_v10 = vld [vmem:[#allocation247_spill] sm:$0xff]  ;;  %v7751_v57 = vld [vmem:[#allocation154_spill] sm:$0xff] }
 0x171   :  { %v5631_v9 = vsel %vm5584_vm13, %v1386_v27, %v1382_v34  ;;  %1828 = vmatpush.msra.mxu1 %v1793_v45  ;;  %v1497_v52 = vmul.f32 %v4709_v21, %v5602_v5  ;;  %v1585_v61 = vsub.f32 %v4607_v1, %v5551_v43  ;;  %v1397_v39 = vsel %vm1396_vm3, %v3002_v19, %v1393_v50 }
 0x172   :  { %v7734_v0 = vsub.f32 %v7721_v58, %v5328_v28  ;;  %v1488_v27 = vmul.f32 %v4726_v3, %v5594_v29  ;;  %v1576_v7 = vsub.f32 %v4586_v41, %v5545_v25  ;;  %v5649_v4 = vperm.slane %v5448_v47, 0  ;;  %1809 = vmatpush.msra.mxu0 %v1784_v60  ;;  %v7752_v60 = vld [vmem:[#allocation249_spill] sm:$0xff] }
 0x173   :  { %v5653_v21 = vsel %vm5605_vm15, %v1401_v12, %v1397_v39  ;;  %1829 = vmatpush.msra.mxu1 %v1785_v46  ;;  %v1649_v1 = vsub.f32 %v5504_v18, %v1497_v52  ;;  %v7735_v58 = vsub.f32 %v7722_v51, %v5350_v37  ;;  %v7736_v41 = vsub.f32 %v7723_v31, %v5328_v28  ;;  %v7737_v51 = vld [vmem:[#allocation146_spill] sm:$0xff]  ;;  %v7738_v31 = vld [vmem:[#allocation165_spill] sm:$0xff] }
 0x174   :  { %v1712_v24 = vsub.f32 %v7734_v0, %v1584_v20  ;;  %v1640_v3 = vsub.f32 %v5508_v11, %v1488_v27  ;;  %v1489_v54 = vmul.f32 %v4811_v8, %v5602_v5  ;;  %v1577_v56 = vsub.f32 %v4620_v23, %v5551_v43  ;;  %v7753_v46 = vld [vmem:[#allocation69_spill] sm:$0xff]  ;;  %v7754_v39 = vld [vmem:[#allocation178_spill] sm:$0xff] }
 0x175   :  { %v1713_v19 = vsub.f32 %v7735_v58, %v1585_v61  ;;  %v1704_v47 = vsub.f32 %v7736_v41, %v1576_v7  ;;  %v1514_v18 = vmul.f32 %v4738_v49, %v5631_v9  ;;  %v1602_v26 = vsub.f32 %v7737_v51, %v5598_v40  ;;  %v7756_v7 = vld [vmem:[#allocation36_spill] sm:$0xff]  ;;  %v7757_v58 = vld [vmem:[#allocation33_spill] sm:$0xff] }
 0x176   :  { %v1776_v44 = vmul.f32 %v1712_v24, %v1648_v30  ;;  %v1641_v11 = vsub.f32 %v5512_v55, %v1489_v54  ;;  %v1515_v36 = vmul.f32 %v7738_v31, %v5653_v21  ;;  %v1603_v8 = vsub.f32 %v7739_v33, %v5635_v6  ;;  %v7755_v24 = vld [vmem:[#allocation27_spill] sm:$0xff]  ;;  %v7761_v31 = vld [vmem:[#allocation248_spill] sm:$0xff] }
 0x177   :  { %v1777_v12 = vmul.f32 %v1713_v19, %v1649_v1  ;;  %v1768_v59 = vmul.f32 %v1704_v47, %v1640_v3  ;;  %v7741_v23 = vsub.f32 %v7740_v32, %v5350_v37  ;;  %v1666_v49 = vsub.f32 %v7742_v63, %v1514_v18  ;;  %v7759_v18 = vld [vmem:[#allocation155_spill] sm:$0xff] }
 0x178   :  { %1810 = vmatpush.msra.mxu0 %v1776_v44  ;;  %v7745_v48 = vsub.f32 %v7743_v17, %v7744_v35  ;;  %v1480_v55 = vmul.f32 %v7746_v22, %v5594_v29  ;;  %v1667_v14 = vsub.f32 %v7747_v53, %v1515_v36  ;;  %v7750_v15 = vsub.f32 %v7748_v16, %v7749_v10  ;;  %v7762_v36 = vld [vmem:[#allocation72_spill] sm:$0xff] }
 0x179   :  { %1830 = vmatpush.msra.mxu1 %v1777_v12  ;;  %v1705_v13 = vsub.f32 %v7741_v23, %v1577_v56  ;;  %v1568_v45 = vsub.f32 %v7751_v57, %v5545_v25  ;;  %v753_v34 = vmul.f32 %v7753_v46, %v7752_v60  ;;  %v1481_v0 = vmul.f32 %v7754_v39, %v5602_v5  ;;  %v7758_v12 = vld [vmem:[#allocation40_spill] sm:$0xff] }
 0x17a   :  { %v1730_v38 = vsub.f32 %v7745_v48, %v1602_v26  ;;  %1811 = vmatpush.msra.mxu0 %v1768_v59  ;;  %v1731_v62 = vsub.f32 %v7750_v15, %v1603_v8  ;;  %v840_v27 = vsub.f32 %v7755_v24, %v5328_v28  ;;  %v1632_v1 = vsub.f32 %v7756_v7, %v1480_v55  ;;  %v7760_v59 = vld [vmem:[#allocation166_spill] sm:$0xff]  ;;  %v7763_v8 = vld [vmem:[#allocation44_spill] sm:$0xff]  ;;  %v7771_v24 = vld [vmem:[#allocation149_spill] sm:$0xff] }
 0x17b   :  { %v1769_v20 = vmul.f32 %v1705_v13, %v1641_v11  ;;  %v867_v19 = vsub.f32 %v7757_v58, %v7749_v10  ;;  %v841_v56 = vsub.f32 %v7758_v12, %v5350_v37  ;;  %v1569_v51 = vsub.f32 %v7759_v18, %v5551_v43  ;;  %v7772_v7 = vld [vmem:[#allocation182_spill] sm:$0xff] }
 0x17c   :  { %v1794_v30 = vmul.f32 %v1730_v38, %v1666_v49  ;;  %v1795_v61 = vmul.f32 %v1731_v62, %v1667_v14  ;;  %v1696_v54 = vsub.f32 %v840_v27, %v1568_v45  ;;  %v1633_v26 = vsub.f32 %v753_v34, %v1481_v0 }
 0x17d   :  { %1831 = vmatpush.msra.mxu1 %v1769_v20  ;;  %v1506_v11 = vmul.f32 %v7760_v59, %v5631_v9  ;;  %v5718_v33 = vmul.f32 %v7762_v36, %v7761_v31  ;;  %v832_v32 = vsub.f32 %v7763_v8, %v5328_v28  ;;  %v1697_v63 = vsub.f32 %v841_v56, %v1569_v51  ;;  %v7769_v20 = vld [vmem:[#allocation49_spill] sm:$0xff]  ;;  %v7790_v8 = vld [vmem:[#allocation59_spill] sm:$0xff] }
 0x17e   :  { %1848 = vmatpush.msra.mxu2 %v1794_v30  ;;  %1868 = vmatpush.msra.mxu3 %v1795_v61  ;;  %v1760_v13 = vmul.f32 %v1696_v54, %v1632_v1  ;;  %v7770_v61 = vld [vmem:[#allocation167_spill] sm:$0xff]  ;;  %v1595_v27 = vsub.f32 %v7771_v24, %v5635_v6  ;;  %v1472_v1 = vmul.f32 %v7772_v7, %v5594_v29 }
 0x17f   :  { %v1761_v45 = vmul.f32 %v1697_v63, %v1633_v26  ;;  %v1658_v30 = vsub.f32 %v7769_v20, %v1506_v11  ;;  %v1507_v39 = vmul.f32 %v7770_v61, %v5653_v21 }
 0x180   :  { %1812 = vmatpush.msra.mxu0 %v1760_v13 }
 0x181   :  { %1832 = vmatpush.msra.mxu1 %v1761_v45 }
 0x18e   :  { %v1273_v2 = vpop.f32.mrf.mxu0 }
 0x18f   :  { %v5693_v50 = vperm.slane %v1273_v2, 0  ;;  %3005 = vlog2.f32 %v1273_v2  ;;  %v1293_v42 = vpop.f32.mrf.mxu1  ;;  %v7766_v2 = vld [vmem:[#allocation148_spill] sm:$0xff] }
 0x190   :  { %v5695_v52 = vperm.slane %v1293_v42, 0  ;;  %3007 = vlog2.f32 %v1293_v42  ;;  %v1594_v53 = vsub.f32 %v7766_v2, %v5598_v40  ;;  %v7779_v2 = vld [vmem:[#allocation58_spill] sm:$0xff] }
 0x191   :  { %3009 = vrcp.f32 %v5693_v50  ;;  %v1413_v44 = vand.u32 2147483647, %v5693_v50  ;;  %v1415_v3 = vand.u32 2147483648, %v5693_v50  ;;  %vm1409_vm4 = vweird.f32 %v5693_v50 }
 0x192   :  { %3011 = vrcp.f32 %v5695_v52  ;;  %v1430_v41 = vand.u32 2147483648, %v5695_v52  ;;  %v1428_v47 = vand.u32 2147483647, %v5695_v52  ;;  %vm1424_vm5 = vweird.f32 %v5695_v52 }
 0x193   :  { %vm5724_vm6 = vcmp.eq.f32.partialorder %v1413_v44, 8.507059e+37  ;;  %v1416_v48 = vor.u32 1.1754944e-38, %v1415_v3 }
 0x194   :  { %v5728_v22 = vor.u32 1.1754944e-38, %v1430_v41  ;;  %vm5732_vm7 = vcmp.eq.f32.partialorder %v1428_v47, 8.507059e+37 }
 0x195   :  { %v3006_v23 = vpop.eup %3005 }
 0x196   :  { %v3008_v49 = vpop.eup %3007  ;;  %v1529_v38 = vmul.f32 0.6931472, %v3006_v23  ;;  %v1313_v55 = vpop.f32.mrf.mxu2  ;;  %v7775_v23 = vld [vmem:[#allocation29_spill] sm:$0xff] }
 0x197   :  { %v3010_v14 = vpop.eup %3009  ;;  %v1531_v15 = vmul.f32 0.6931472, %v3008_v49  ;;  %v5736_v62 = vperm.slane %v1313_v55, 0  ;;  %3013 = vlog2.f32 %v1313_v55  ;;  %v1333_v57 = vpop.f32.mrf.mxu3  ;;  %v7776_v13 = vsub.f32 %v7775_v23, %v7744_v35 }
 0x198   :  { %v3012_v46 = vpop.eup %3011  ;;  %v1405_v34 = vmul.f32 %v3010_v14, %v5693_v50  ;;  %v5739_v42 = vperm.slane %v1333_v57, 0  ;;  %vm1410_vm8 = vweird.f32 %v3010_v14  ;;  %v5750_v3 = vperm.slane %v1529_v38, 0 }
 0x199   :  { %v1420_v0 = vmul.f32 %v3012_v46, %v5695_v52  ;;  %3015 = vrcp.f32 %v5736_v62  ;;  %v1445_v41 = vand.u32 2147483648, %v5736_v62  ;;  %vm1425_vm9 = vweird.f32 %v3012_v46  ;;  %vm5761_vm10 = vmor %vm1409_vm4, %vm1410_vm8  ;;  %v7780_v52 = vld [vmem:[#allocation156_spill] sm:$0xff] }
 0x19a   :  { %v1406_v44 = vsub.f32 1.0, %v1405_v34  ;;  %v5753_v54 = vperm.slane %v1531_v15, 0  ;;  %3017 = vrcp.f32 %v5739_v42  ;;  %v1443_v56 = vand.u32 2147483647, %v5736_v62  ;;  %vm5770_vm11 = vmor %vm1424_vm5, %vm1425_vm9 }
 0x19b   :  { %v1421_v47 = vsub.f32 1.0, %v1420_v0  ;;  %v1458_v18 = vand.u32 2147483647, %v5739_v42  ;;  %v1460_v51 = vand.u32 2147483648, %v5739_v42  ;;  %v1446_v36 = vor.u32 1.1754944e-38, %v1445_v41 }
 0x19c   :  { %v1407_v12 = vmul.f32 %v3010_v14, %v1406_v44  ;;  %3019 = vlog2.f32 %v1333_v57  ;;  %v1722_v63 = vsub.f32 %v7776_v13, %v1594_v53  ;;  %vm1439_vm12 = vweird.f32 %v5736_v62  ;;  %v7789_v13 = vld [vmem:[#allocation250_spill] sm:$0xff] }
 0x19d   :  { %v3014_v26 = vpop.eup %3013  ;;  %v1422_v11 = vmul.f32 %v3012_v46, %v1421_v47  ;;  %v5775_v55 = vor.u32 1.1754944e-38, %v1460_v51  ;;  %v1659_v15 = vsub.f32 %v7779_v2, %v1507_v39  ;;  %v1723_v53 = vsub.f32 %v867_v19, %v1595_v27  ;;  %v7787_v47 = vld [vmem:[#allocation185_spill] sm:$0xff] }
 0x19e   :  { %v1408_v49 = vadd.f32 %v3010_v14, %v1407_v12  ;;  %v1533_v50 = vmul.f32 0.6931472, %v3014_v26  ;;  %v1786_v34 = vmul.f32 %v1722_v63, %v1658_v30  ;;  %v1560_v20 = vsub.f32 %v7780_v52, %v5545_v25  ;;  %v7788_v26 = vld [vmem:[#allocation159_spill] sm:$0xff] }
 0x19f   :  { %v3016_v45 = vpop.eup %3015  ;;  %v1423_v57 = vadd.f32 %v3012_v46, %v1422_v11  ;;  %vm5786_vm14 = vcmp.eq.f32.partialorder %v1443_v56, 8.507059e+37  ;;  %vm1454_vm15 = vweird.f32 %v5739_v42  ;;  %v1624_v27 = vsub.f32 %v5718_v33, %v1472_v1  ;;  %v7785_v33 = vld [vmem:[#allocation73_spill] sm:$0xff]  ;;  %v7791_v63 = vld [vmem:[#allocation31_spill] sm:$0xff] }
 0x1a0   :  { %v1412_v61 = vsel %vm5761_vm10, %v3010_v14, %v1408_v49  ;;  %v1435_v0 = vmul.f32 %v3016_v45, %v5736_v62  ;;  %vm1440_vm13 = vweird.f32 %v3016_v45  ;;  %v5790_v39 = vperm.slane %v1533_v50, 0  ;;  %v3018_v30 = vpop.eup %3017  ;;  %1849 = vmatpush.msra.mxu2 %v1786_v34 }
 0x1a1   :  { %v5795_v58 = vsel %vm5724_vm6, %v1416_v48, %v1412_v61  ;;  %v1427_v19 = vsel %vm5770_vm11, %v3012_v46, %v1423_v57  ;;  %v1787_v14 = vmul.f32 %v1723_v53, %v1659_v15  ;;  %v1450_v41 = vmul.f32 %v3018_v30, %v5739_v42  ;;  %vm1441_vm3 = vmor %vm1439_vm12, %vm1440_vm13  ;;  %v7792_v57 = vld [vmem:[#allocation168_spill] sm:$0xff]  ;;  %v7793_v53 = vld [vmem:[#allocation150_spill] sm:$0xff] }
 0x1a2   :  { %v5803_v7 = vsel %vm5732_vm7, %v5728_v22, %v1427_v19  ;;  %v1436_v44 = vsub.f32 1.0, %v1435_v0  ;;  %vm1455_vm2 = vweird.f32 %v3018_v30  ;;  %vm5806_vm1 = vcmp.eq.f32.partialorder %v1458_v18, 8.507059e+37  ;;  %v3020_v48 = vpop.eup %3019  ;;  %v7786_v22 = vld [vmem:[#allocation45_spill] sm:$0xff]  ;;  %v7795_v61 = vld [vmem:[#allocation62_spill] sm:$0xff] }
 0x1a3   :  { %1869 = vmatpush.msra.mxu3 %v1787_v14  ;;  %v1688_v46 = vsub.f32 %v832_v32, %v1560_v20  ;;  %v745_v1 = vmul.f32 %v7785_v33, %v7752_v60  ;;  %v833_v16 = vsub.f32 %v7786_v22, %v5350_v37  ;;  %v1473_v12 = vmul.f32 %v7787_v47, %v5602_v5  ;;  %v7794_v20 = vld [vmem:[#allocation251_spill] sm:$0xff]  ;;  %v7796_v19 = vld [vmem:[#allocation34_spill] sm:$0xff]  ;;  %vm1456_vm4 = vmor %vm1454_vm15, %vm1455_vm2 }
 0x1a4   :  { %v1437_v56 = vmul.f32 %v3016_v45, %v1436_v44  ;;  %v1451_v18 = vsub.f32 1.0, %v1450_v41  ;;  %v1535_v51 = vmul.f32 0.6931472, %v3020_v48  ;;  %v1561_v59 = vsub.f32 %v7788_v26, %v5551_v43  ;;  %v7797_v48 = vld [vmem:[#allocation170_spill] sm:$0xff]  ;;  %v7798_v22 = vld [vmem:[#allocation151_spill] sm:$0xff] }
 0x1a5   :  { %v1752_v11 = vmul.f32 %v1688_v46, %v1624_v27  ;;  %v1625_v23 = vsub.f32 %v745_v1, %v1473_v12  ;;  %v770_v32 = vmul.f32 %v7790_v8, %v7789_v13  ;;  %v858_v49 = vsub.f32 %v7791_v63, %v7744_v35  ;;  %v7799_v12 = vld [vmem:[#allocation80_spill] sm:$0xff]  ;;  %v7801_v26 = vld [vmem:[#allocation191_spill] sm:$0xff] }
 0x1a6   :  { %v1438_v38 = vadd.f32 %v3016_v45, %v1437_v56  ;;  %v1452_v50 = vmul.f32 %v3018_v30, %v1451_v18  ;;  %v5825_v2 = vperm.slane %v1535_v51, 0  ;;  %v1689_v15 = vsub.f32 %v833_v16, %v1561_v59  ;;  %v7800_v18 = vld [vmem:[#allocation51_spill] sm:$0xff] }
 0x1a7   :  { %1813 = vmatpush.msra.mxu0 %v1752_v11  ;;  %v1498_v34 = vmul.f32 %v7792_v57, %v5631_v9  ;;  %v1586_v52 = vsub.f32 %v7793_v53, %v5598_v40  ;;  %v771_v0 = vmul.f32 %v7795_v61, %v7794_v20  ;;  %v859_v14 = vsub.f32 %v7796_v19, %v7749_v10  ;;  %v7807_v57 = vld [vmem:[#allocation66_spill] sm:$0xff]  ;;  %v7808_v61 = vld [vmem:[#allocation35_spill] sm:$0xff]  ;;  %v7809_v19 = vld [vmem:[#allocation173_spill] sm:$0xff] }
 0x1a8   :  { %v1442_v27 = vsel %vm1441_vm3, %v3016_v45, %v1438_v38  ;;  %v1453_v44 = vadd.f32 %v3018_v30, %v1452_v50  ;;  %v1753_v41 = vmul.f32 %v1689_v15, %v1625_v23  ;;  %v1499_v62 = vmul.f32 %v7797_v48, %v5653_v21  ;;  %v7803_v23 = vld [vmem:[#allocation82_spill] sm:$0xff]  ;;  %v7806_v50 = vld [vmem:[#allocation163_spill] sm:$0xff] }
 0x1a9   :  { %v5842_v46 = vsel %vm5786_vm14, %v1446_v36, %v1442_v27  ;;  %v1650_v33 = vsub.f32 %v770_v32, %v1498_v34  ;;  %v1714_v1 = vsub.f32 %v858_v49, %v1586_v52  ;;  %v1587_v16 = vsub.f32 %v7798_v22, %v5635_v6  ;;  %v7804_v32 = vld [vmem:[#allocation53_spill] sm:$0xff]  ;;  %v7811_v48 = vld [vmem:[#allocation67_spill] sm:$0xff] }
 0x1aa   :  { %v1457_v47 = vsel %vm1456_vm4, %v3018_v30, %v1453_v44  ;;  %1833 = vmatpush.msra.mxu1 %v1753_v41  ;;  %v1651_v45 = vsub.f32 %v771_v0, %v1499_v62  ;;  %v736_v56 = vmul.f32 %v7799_v12, %v7761_v31  ;;  %v824_v24 = vsub.f32 %v7800_v18, %v5328_v28  ;;  %v7802_v30 = vld [vmem:[#allocation162_spill] sm:$0xff]  ;;  %v7805_v49 = vld [vmem:[#allocation193_spill] sm:$0xff]  ;;  %v7810_v44 = vld [vmem:[#allocation152_spill] sm:$0xff] }
 0x1ab   :  { %v5856_v36 = vsel %vm5806_vm1, %v5775_v55, %v1457_v47  ;;  %v1778_v42 = vmul.f32 %v1714_v1, %v1650_v33  ;;  %v1715_v51 = vsub.f32 %v859_v14, %v1587_v16  ;;  %v1464_v59 = vmul.f32 %v7801_v26, %v5594_v29  ;;  %v7812_v33 = vld [vmem:[#allocation37_spill] sm:$0xff]  ;;  %v7813_v47 = vld [vmem:[#allocation176_spill] sm:$0xff] }
 0x1ac   :  { %v1552_v11 = vsub.f32 %v7802_v30, %v5545_v25  ;;  %v737_v8 = vmul.f32 %v7803_v23, %v7752_v60  ;;  %v825_v63 = vsub.f32 %v7804_v32, %v5350_v37  ;;  %v1465_v38 = vmul.f32 %v7805_v49, %v5602_v5  ;;  %v7814_v12 = vld [vmem:[#allocation153_spill] sm:$0xff]  ;;  %v7817_v23 = vld [vmem:[#allocation198_spill] sm:$0xff]  ;;  %v7818_v32 = vld [vmem:[#allocation171_spill] sm:$0xff] }
 0x1ad   :  { %1850 = vmatpush.msra.mxu2 %v1778_v42  ;;  %v1779_v55 = vmul.f32 %v1715_v51, %v1651_v45  ;;  %v1616_v17 = vsub.f32 %v736_v56, %v1464_v59  ;;  %v1553_v15 = vsub.f32 %v7806_v50, %v5551_v43  ;;  %v762_v34 = vmul.f32 %v7807_v57, %v7789_v13  ;;  %v7815_v42 = vld [vmem:[#allocation88_spill] sm:$0xff]  ;;  %v7816_v26 = vld [vmem:[#allocation57_spill] sm:$0xff]  ;;  %v7821_v50 = vld [vmem:[#allocation199_spill] sm:$0xff] }
 0x1ae   :  { %v1680_v53 = vsub.f32 %v824_v24, %v1552_v11  ;;  %v1617_v52 = vsub.f32 %v737_v8, %v1465_v38  ;;  %v850_v0 = vsub.f32 %v7808_v61, %v7744_v35  ;;  %v1490_v14 = vmul.f32 %v7809_v19, %v5631_v9  ;;  %v7819_v38 = vld [vmem:[#allocation91_spill] sm:$0xff] }
 0x1af   :  { %1870 = vmatpush.msra.mxu3 %v1779_v55  ;;  %v1681_v27 = vsub.f32 %v825_v63, %v1553_v15  ;;  %v1578_v41 = vsub.f32 %v7810_v44, %v5598_v40  ;;  %v763_v62 = vmul.f32 %v7811_v48, %v7794_v20  ;;  %v851_v1 = vsub.f32 %v7812_v33, %v7749_v10  ;;  %v7825_v19 = vld [vmem:[#allocation179_spill] sm:$0xff] }
 0x1b0   :  { %v1744_v22 = vmul.f32 %v1680_v53, %v1616_v17  ;;  %v1642_v16 = vsub.f32 %v762_v34, %v1490_v14  ;;  %v1491_v45 = vmul.f32 %v7813_v47, %v5653_v21  ;;  %v1579_v56 = vsub.f32 %v7814_v12, %v5635_v6  ;;  %v7820_v17 = vld [vmem:[#allocation60_spill] sm:$0xff] }
 0x1b1   :  { %v1745_v18 = vmul.f32 %v1681_v27, %v1617_v52  ;;  %v1706_v24 = vsub.f32 %v850_v0, %v1578_v41  ;;  %v630_v51 = vmul.f32 %v7815_v42, %v7761_v31  ;;  %v816_v59 = vsub.f32 %v7816_v26, %v5328_v28  ;;  %v7822_v53 = vld [vmem:[#allocation172_spill] sm:$0xff]  ;;  %v7824_v0 = vld [vmem:[#allocation41_spill] sm:$0xff]  ;;  %v7827_v41 = vld [vmem:[#allocation71_spill] sm:$0xff] }
 0x1b2   :  { %1814 = vmatpush.msra.mxu0 %v1744_v22  ;;  %v1643_v30 = vsub.f32 %v763_v62, %v1491_v45  ;;  %v1707_v11 = vsub.f32 %v851_v1, %v1579_v56  ;;  %v1358_v8 = vmul.f32 %v7817_v23, %v5594_v29  ;;  %v1544_v63 = vsub.f32 %v7818_v32, %v5545_v25  ;;  %v7823_v25 = vld [vmem:[#allocation70_spill] sm:$0xff]  ;;  %v7826_v27 = vld [vmem:[#allocation157_spill] sm:$0xff]  ;;  %v7828_v62 = vld [vmem:[#allocation43_spill] sm:$0xff] }
 0x1b3   :  { %1834 = vmatpush.msra.mxu1 %v1745_v18  ;;  %v1770_v49 = vmul.f32 %v1706_v24, %v1642_v16  ;;  %v645_v55 = vmul.f32 %v7819_v38, %v7752_v60  ;;  %v817_v31 = vsub.f32 %v7820_v17, %v5350_v37  ;;  %v1373_v28 = vmul.f32 %v7821_v50, %v5602_v5  ;;  %v7829_v1 = vld [vmem:[#allocation181_spill] sm:$0xff]  ;;  %v7830_v16 = vld [vmem:[#allocation158_spill] sm:$0xff]  ;;  %v7833_v42 = vld [vmem:[#allocation252_spill] sm:$0xff] }
 0x1b4   :  { %v1771_v15 = vmul.f32 %v1707_v11, %v1643_v30  ;;  %v1608_v57 = vsub.f32 %v630_v51, %v1358_v8  ;;  %v1672_v34 = vsub.f32 %v816_v59, %v1544_v63  ;;  %v1545_v29 = vsub.f32 %v7822_v53, %v5551_v43  ;;  %v7831_v56 = vld [vmem:[#allocation254_spill] sm:$0xff]  ;;  %v7832_v18 = vld [vmem:[#allocation97_spill] sm:$0xff]  ;;  %v7837_v32 = vld [vmem:[#allocation180_spill] sm:$0xff] }
 0x1b5   :  { %1851 = vmatpush.msra.mxu2 %v1770_v49  ;;  %v1609_v52 = vsub.f32 %v645_v55, %v1373_v28  ;;  %v754_v61 = vmul.f32 %v7823_v25, %v7789_v13  ;;  %v842_v60 = vsub.f32 %v7824_v0, %v7744_v35  ;;  %v1482_v37 = vmul.f32 %v7825_v19, %v5631_v9  ;;  %v7834_v51 = vld [vmem:[#allocation74_spill] sm:$0xff]  ;;  %v7838_v38 = vld [vmem:[#allocation255_spill] sm:$0xff]  ;;  %v7844_v0 = vld [vmem:[#allocation76_spill] sm:$0xff] }
 0x1b6   :  { %1871 = vmatpush.msra.mxu3 %v1771_v15  ;;  %v1736_v14 = vmul.f32 %v1672_v34, %v1608_v57  ;;  %v1673_v5 = vsub.f32 %v817_v31, %v1545_v29  ;;  %v1570_v44 = vsub.f32 %v7826_v27, %v5598_v40  ;;  %v755_v43 = vmul.f32 %v7827_v41, %v7794_v20  ;;  %v7836_v23 = vld [vmem:[#allocation202_spill] sm:$0xff]  ;;  %v7840_v31 = vld [vmem:[#allocation253_spill] sm:$0xff]  ;;  %v7841_v50 = vld [vmem:[#allocation79_spill] sm:$0xff] }
 0x1b7   :  { %v1634_v48 = vsub.f32 %v754_v61, %v1482_v37  ;;  %v843_v33 = vsub.f32 %v7828_v62, %v7749_v10  ;;  %v1483_v22 = vmul.f32 %v7829_v1, %v5653_v21  ;;  %v1571_v47 = vsub.f32 %v7830_v16, %v5635_v6  ;;  %v7839_v55 = vld [vmem:[#allocation98_spill] sm:$0xff]  ;;  %v7842_v15 = vld [vmem:[#allocation203_spill] sm:$0xff]  ;;  %v7847_v41 = vld [vmem:[#allocation160_spill] sm:$0xff] }
 0x1b8   :  { %1815 = vmatpush.msra.mxu0 %v1736_v14  ;;  %v1737_v45 = vmul.f32 %v1673_v5, %v1609_v52  ;;  %v1698_v12 = vsub.f32 %v842_v60, %v1570_v44  ;;  %v788_v24 = vmul.f32 %v7832_v18, %v7831_v56  ;;  %v876_v26 = vsub.f32 %v7834_v51, %v7833_v42  ;;  %v7843_v52 = vld [vmem:[#allocation186_spill] sm:$0xff]  ;;  %v7845_v19 = vld [vmem:[#allocation47_spill] sm:$0xff] }
 0x1b9   :  { %v1635_v59 = vsub.f32 %v755_v43, %v1483_v22  ;;  %v1699_v30 = vsub.f32 %v843_v33, %v1571_v47  ;;  %v7835_v11 = vmov 1.0   ;;  %v1516_v8 = vmul.f32 %v7836_v23, %v5795_v58  ;;  %v7846_v14 = vld [vmem:[#allocation187_spill] sm:$0xff]  ;;  %v7849_v1 = vld [vmem:[#allocation50_spill] sm:$0xff] }
 0x1ba   :  { %2681 = vmatmul.msk.f32.vlgmr.msra.gmra.mxu0 %vm444_vm0, %v7835_v11  ;;  %v1604_v63 = vsub.f32 %v7837_v32, %v5750_v3  ;;  %1835 = vmatpush.msra.mxu1 %v1737_v45  ;;  %v1762_v49 = vmul.f32 %v1698_v12, %v1634_v48  ;;  %v789_v17 = vmul.f32 %v7839_v55, %v7838_v38  ;;  %v7848_v48 = vld [vmem:[#allocation78_spill] sm:$0xff]  ;;  %v7851_v45 = vld [vmem:[#allocation161_spill] sm:$0xff]  ;;  %v7852_v51 = vld [vmem:[#allocation99_spill] sm:$0xff] }
 0x1bb   :  { %v877_v28 = vsub.f32 %v7841_v50, %v7840_v31  ;;  %v1517_v57 = vmul.f32 %v7842_v15, %v5803_v7  ;;  %v1763_v34 = vmul.f32 %v1699_v30, %v1635_v59  ;;  %2682 = vmatmul.msk.f32.vlgmr.msra.gmra.mxu1 %vm444_vm0, %v7835_v11  ;;  %v1668_v53 = vsub.f32 %v788_v24, %v1516_v8  ;;  %v7850_v16 = vld [vmem:[#allocation190_spill] sm:$0xff]  ;;  %v7853_v59 = vld [vmem:[#allocation75_spill] sm:$0xff]  ;;  %v7857_v15 = vld [vmem:[#allocation81_spill] sm:$0xff] }
 0x1bc   :  { %v1732_v29 = vsub.f32 %v876_v26, %v1604_v63  ;;  %v1605_v25 = vsub.f32 %v7843_v52, %v5753_v54  ;;  %1852 = vmatpush.msra.mxu2 %v1762_v49  ;;  %v746_v60 = vmul.f32 %v7844_v0, %v7789_v13  ;;  %v834_v37 = vsub.f32 %v7845_v19, %v7744_v35  ;;  %v7854_v32 = vld [vmem:[#allocation206_spill] sm:$0xff]  ;;  %v7855_v49 = vld [vmem:[#allocation183_spill] sm:$0xff]  ;;  %v7860_v19 = vld [vmem:[#allocation84_spill] sm:$0xff] }
 0x1bd   :  { %v1669_v61 = vsub.f32 %v789_v17, %v1517_v57  ;;  %v1474_v5 = vmul.f32 %v7846_v14, %v5631_v9  ;;  %1872 = vmatpush.msra.mxu3 %v1763_v34  ;;  %v1562_v43 = vsub.f32 %v7847_v41, %v5598_v40  ;;  %v747_v62 = vmul.f32 %v7848_v48, %v7794_v20  ;;  %v7856_v50 = vld [vmem:[#allocation103_spill] sm:$0xff]  ;;  %v7858_v34 = vld [vmem:[#allocation209_spill] sm:$0xff]  ;;  %v7861_v14 = vld [vmem:[#allocation54_spill] sm:$0xff] }
 0x1be   :  { %v1796_v27 = vmul.f32 %v1732_v29, %v1668_v53  ;;  %v1733_v44 = vsub.f32 %v877_v28, %v1605_v25  ;;  %v835_v22 = vsub.f32 %v7849_v1, %v7749_v10  ;;  %v1475_v47 = vmul.f32 %v7850_v16, %v5653_v21  ;;  %v7863_v48 = vld [vmem:[#allocation164_spill] sm:$0xff]  ;;  %v7865_v16 = vld [vmem:[#allocation55_spill] sm:$0xff] }
 0x1bf   :  { %v1626_v33 = vsub.f32 %v746_v60, %v1474_v5  ;;  %v1563_v12 = vsub.f32 %v7851_v45, %v5635_v6  ;;  %v1690_v24 = vsub.f32 %v834_v37, %v1562_v43  ;;  %v780_v26 = vmul.f32 %v7852_v51, %v7831_v56  ;;  %v7866_v45 = vld [vmem:[#allocation197_spill] sm:$0xff] }
 0x1c0   :  { %1888 = vmatpush.msrb.mxu0 %v1796_v27  ;;  %v1797_v18 = vmul.f32 %v1733_v44, %v1669_v61  ;;  %v868_v30 = vsub.f32 %v7853_v59, %v7833_v42  ;;  %v1627_v23 = vsub.f32 %v747_v62, %v1475_v47  ;;  %v1508_v63 = vmul.f32 %v7854_v32, %v5795_v58  ;;  %v7859_v61 = vld [vmem:[#allocation188_spill] sm:$0xff]  ;;  %v7862_v27 = vld [vmem:[#allocation195_spill] sm:$0xff]  ;;  %v7868_v59 = vld [vmem:[#allocation105_spill] sm:$0xff] }
 0x1c1   :  { %v1691_v8 = vsub.f32 %v835_v22, %v1563_v12  ;;  %v1596_v55 = vsub.f32 %v7855_v49, %v5750_v3  ;;  %v1754_v17 = vmul.f32 %v1690_v24, %v1626_v33  ;;  %v781_v28 = vmul.f32 %v7856_v50, %v7838_v38  ;;  %v7864_v33 = vld [vmem:[#allocation85_spill] sm:$0xff]  ;;  %v7870_v49 = vld [vmem:[#allocation212_spill] sm:$0xff] }
 0x1c2   :  { %1908 = vmatpush.msrb.mxu1 %v1797_v18  ;;  %v869_v57 = vsub.f32 %v7857_v15, %v7840_v31  ;;  %v1509_v53 = vmul.f32 %v7858_v34, %v5803_v7  ;;  %v1660_v52 = vsub.f32 %v780_v26, %v1508_v63  ;;  %v1597_v0 = vsub.f32 %v7859_v61, %v5753_v54  ;;  %v7867_v18 = vld [vmem:[#allocation169_spill] sm:$0xff]  ;;  %v7872_v15 = vld [vmem:[#allocation106_spill] sm:$0xff]  ;;  %v7873_v34 = vld [vmem:[#allocation83_spill] sm:$0xff] }
 0x1c3   :  { %v1755_v29 = vmul.f32 %v1691_v8, %v1627_v23  ;;  %v1724_v25 = vsub.f32 %v868_v30, %v1596_v55  ;;  %1853 = vmatpush.msra.mxu2 %v1754_v17  ;;  %v738_v37 = vmul.f32 %v7860_v19, %v7789_v13  ;;  %v826_v5 = vsub.f32 %v7861_v14, %v7744_v35  ;;  %v7869_v23 = vld [vmem:[#allocation77_spill] sm:$0xff]  ;;  %v7871_v17 = vld [vmem:[#allocation184_spill] sm:$0xff] }
 0x1c4   :  { %v1661_v60 = vsub.f32 %v781_v28, %v1509_v53  ;;  %v1466_v44 = vmul.f32 %v7862_v27, %v5631_v9  ;;  %v1725_v43 = vsub.f32 %v869_v57, %v1597_v0  ;;  %v1554_v62 = vsub.f32 %v7863_v48, %v5598_v40  ;;  %v7876_v14 = vld [vmem:[#allocation93_spill] sm:$0xff] }
 0x1c5   :  { %1873 = vmatpush.msra.mxu3 %v1755_v29  ;;  %v1788_v41 = vmul.f32 %v1724_v25, %v1660_v52  ;;  %v739_v1 = vmul.f32 %v7864_v33, %v7794_v20  ;;  %v827_v47 = vsub.f32 %v7865_v16, %v7749_v10  ;;  %v1467_v12 = vmul.f32 %v7866_v45, %v5653_v21  ;;  %v7874_v29 = vld [vmem:[#allocation215_spill] sm:$0xff]  ;;  %v7877_v27 = vld [vmem:[#allocation61_spill] sm:$0xff]  ;;  %v7879_v33 = vld [vmem:[#allocation174_spill] sm:$0xff] }
 0x1c6   :  { %v1618_v22 = vsub.f32 %v738_v37, %v1466_v44  ;;  %v1555_v24 = vsub.f32 %v7867_v18, %v5635_v6  ;;  %v1789_v51 = vmul.f32 %v1725_v43, %v1661_v60  ;;  %v1682_v26 = vsub.f32 %v826_v5, %v1554_v62  ;;  %v7875_v60 = vld [vmem:[#allocation189_spill] sm:$0xff]  ;;  %v7881_v45 = vld [vmem:[#allocation63_spill] sm:$0xff] }
 0x1c7   :  { %1889 = vmatpush.msrb.mxu0 %v1788_v41  ;;  %v772_v30 = vmul.f32 %v7868_v59, %v7831_v56  ;;  %v860_v8 = vsub.f32 %v7869_v23, %v7833_v42  ;;  %v1619_v32 = vsub.f32 %v739_v1, %v1467_v12  ;;  %v1500_v55 = vmul.f32 %v7870_v49, %v5795_v58  ;;  %v7878_v41 = vld [vmem:[#allocation200_spill] sm:$0xff] }
 0x1c8   :  { %v1683_v63 = vsub.f32 %v827_v47, %v1555_v24  ;;  %v1588_v50 = vsub.f32 %v7871_v17, %v5750_v3  ;;  %1909 = vmatpush.msrb.mxu1 %v1789_v51  ;;  %v1746_v28 = vmul.f32 %v1682_v26, %v1618_v22  ;;  %v773_v57 = vmul.f32 %v7872_v15, %v7838_v38  ;;  %v7880_v22 = vld [vmem:[#allocation94_spill] sm:$0xff]  ;;  %v7884_v26 = vld [vmem:[#allocation111_spill] sm:$0xff] }
 0x1c9   :  { %v861_v53 = vsub.f32 %v7873_v34, %v7840_v31  ;;  %v1501_v52 = vmul.f32 %v7874_v29, %v5803_v7  ;;  %v1652_v61 = vsub.f32 %v772_v30, %v1500_v55  ;;  %v1589_v19 = vsub.f32 %v7875_v60, %v5753_v54  ;;  %v7889_v55 = vld [vmem:[#allocation87_spill] sm:$0xff]  ;;  %v7894_v60 = vld [vmem:[#allocation256_spill] sm:$0xff] }
 0x1ca   :  { %v1747_v25 = vmul.f32 %v1683_v63, %v1619_v32  ;;  %v1716_v0 = vsub.f32 %v860_v8, %v1588_v50  ;;  %1854 = vmatpush.msra.mxu2 %v1746_v28  ;;  %v660_v5 = vmul.f32 %v7876_v14, %v7789_v13  ;;  %v818_v44 = vsub.f32 %v7877_v27, %v7744_v35  ;;  %v7882_v13 = vld [vmem:[#allocation201_spill] sm:$0xff]  ;;  %v7883_v35 = vld [vmem:[#allocation175_spill] sm:$0xff]  ;;  %v7886_v8 = vld [vmem:[#allocation216_spill] sm:$0xff] }
 0x1cb   :  { %v1653_v37 = vsub.f32 %v773_v57, %v1501_v52  ;;  %v1388_v43 = vmul.f32 %v7878_v41, %v5631_v9  ;;  %v1717_v62 = vsub.f32 %v861_v53, %v1589_v19  ;;  %v1546_v1 = vsub.f32 %v7879_v33, %v5598_v40  ;;  %v7885_v40 = vld [vmem:[#allocation86_spill] sm:$0xff]  ;;  %v7887_v32 = vld [vmem:[#allocation192_spill] sm:$0xff]  ;;  %v7895_v19 = vld [vmem:[#allocation89_spill] sm:$0xff] }
 0x1cc   :  { %1874 = vmatpush.msra.mxu3 %v1747_v25  ;;  %v1780_v48 = vmul.f32 %v1716_v0, %v1652_v61  ;;  %v675_v16 = vmul.f32 %v7880_v22, %v7794_v20  ;;  %v819_v12 = vsub.f32 %v7881_v45, %v7749_v10  ;;  %v1403_v18 = vmul.f32 %v7882_v13, %v5653_v21  ;;  %v7890_v50 = vld [vmem:[#allocation218_spill] sm:$0xff]  ;;  %v7892_v25 = vld [vmem:[#allocation257_spill] sm:$0xff]  ;;  %v7893_v61 = vld [vmem:[#allocation108_spill] sm:$0xff] }
 0x1cd   :  { %v1610_v47 = vsub.f32 %v660_v5, %v1388_v43  ;;  %v1547_v24 = vsub.f32 %v7883_v35, %v5635_v6  ;;  %v1781_v9 = vmul.f32 %v1717_v62, %v1653_v37  ;;  %v1674_v51 = vsub.f32 %v818_v44, %v1546_v1  ;;  %v7888_v6 = vld [vmem:[#allocation112_spill] sm:$0xff]  ;;  %v7891_v53 = vld [vmem:[#allocation194_spill] sm:$0xff] }
 0x1ce   :  { %1890 = vmatpush.msrb.mxu0 %v1780_v48  ;;  %v764_v59 = vmul.f32 %v7884_v26, %v7831_v56  ;;  %v852_v30 = vsub.f32 %v7885_v40, %v7833_v42  ;;  %v1611_v20 = vsub.f32 %v675_v16, %v1403_v18  ;;  %v1492_v10 = vmul.f32 %v7886_v8, %v5795_v58  ;;  %v7896_v14 = vld [vmem:[#allocation222_spill] sm:$0xff]  ;;  %v7897_v41 = vld [vmem:[#allocation204_spill] sm:$0xff] }
 0x1cf   :  { %v1675_v23 = vsub.f32 %v819_v12, %v1547_v24  ;;  %v1580_v21 = vsub.f32 %v7887_v32, %v5750_v3  ;;  %1910 = vmatpush.msrb.mxu1 %v1781_v9  ;;  %v1738_v63 = vmul.f32 %v1674_v51, %v1610_v47  ;;  %v765_v49 = vmul.f32 %v7888_v6, %v7838_v38  ;;  %v7898_v62 = vld [vmem:[#allocation258_spill] sm:$0xff]  ;;  %v7900_v22 = vld [vmem:[#allocation100_spill] sm:$0xff]  ;;  %v7901_v47 = vld [vmem:[#allocation225_spill] sm:$0xff] }
 0x1d0   :  { %v853_v17 = vsub.f32 %v7889_v55, %v7840_v31  ;;  %v1493_v28 = vmul.f32 %v7890_v50, %v5803_v7  ;;  %v1644_v57 = vsub.f32 %v764_v59, %v1492_v10  ;;  %v1581_v29 = vsub.f32 %v7891_v53, %v5753_v54  ;;  %v7899_v33 = vld [vmem:[#allocation118_spill] sm:$0xff]  ;;  %v7903_v24 = vld [vmem:[#allocation124_spill] sm:$0xff] }
 0x1d1   :  { %v1739_v15 = vmul.f32 %v1675_v23, %v1611_v20  ;;  %v1708_v34 = vsub.f32 %v852_v30, %v1580_v21  ;;  %1855 = vmatpush.msra.mxu2 %v1738_v63  ;;  %v790_v0 = vmul.f32 %v7893_v61, %v7892_v25  ;;  %v878_v37 = vsub.f32 %v7895_v19, %v7894_v60  ;;  %v7902_v18 = vld [vmem:[#allocation210_spill] sm:$0xff]  ;;  %v7904_v26 = vld [vmem:[#allocation96_spill] sm:$0xff] }
 0x1d2   :  { %v1645_v52 = vsub.f32 %v765_v49, %v1493_v28  ;;  %v1518_v5 = vmul.f32 %v7896_v14, %v5842_v46  ;;  %2683 = vmatmul.msk.f32.vlgmr.msra.gmra.mxu2 %vm444_vm0, %v7835_v11  ;;  %v1709_v44 = vsub.f32 %v853_v17, %v1581_v29  ;;  %v1606_v43 = vsub.f32 %v7897_v41, %v5790_v39  ;;  %v7905_v40 = vld [vmem:[#allocation220_spill] sm:$0xff]  ;;  %v7907_v32 = vld [vmem:[#allocation126_spill] sm:$0xff]  ;;  %v7909_v17 = vld [vmem:[#allocation231_spill] sm:$0xff] }
 0x1d3   :  { %1875 = vmatpush.msra.mxu3 %v1739_v15  ;;  %v1772_v27 = vmul.f32 %v1708_v34, %v1644_v57  ;;  %v791_v1 = vmul.f32 %v7899_v33, %v7898_v62  ;;  %v879_v16 = vsub.f32 %v7900_v22, %v5649_v4  ;;  %v1519_v45 = vmul.f32 %v7901_v47, %v5856_v36  ;;  %v7906_v20 = vld [vmem:[#allocation196_spill] sm:$0xff]  ;;  %v7910_v28 = vld [vmem:[#allocation125_spill] sm:$0xff]  ;;  %v7912_v29 = vld [vmem:[#allocation90_spill] sm:$0xff] }
 0x1d4   :  { %2684 = vmatmul.msk.f32.vlgmr.msra.gmra.mxu3 %vm444_vm0, %v7835_v11  ;;  %v1670_v48 = vsub.f32 %v790_v0, %v1518_v5  ;;  %v1773_v12 = vmul.f32 %v1709_v44, %v1645_v52  ;;  %v1734_v13 = vsub.f32 %v878_v37, %v1606_v43  ;;  %v1607_v35 = vsub.f32 %v7902_v18, %v5825_v2  ;;  %v7908_v63 = vld [vmem:[#allocation12_spill] sm:$0xff]  ;;  %v7911_v34 = vld [vmem:[#allocation109_spill] sm:$0xff]  ;;  %v7915_v41 = vld [vmem:[#allocation119_spill] sm:$0xff] }
 0x1d5   :  { %1891 = vmatpush.msrb.mxu0 %v1772_v27  ;;  %v756_v9 = vmul.f32 %v7903_v24, %v7831_v56  ;;  %v1671_v51 = vsub.f32 %v791_v1, %v1519_v45  ;;  %v844_v59 = vsub.f32 %v7904_v26, %v7833_v42  ;;  %v1484_v30 = vmul.f32 %v7905_v40, %v5795_v58  ;;  %v7913_v61 = vld [vmem:[#allocation224_spill] sm:$0xff]  ;;  %v7914_v5 = vld [vmem:[#allocation205_spill] sm:$0xff]  ;;  %v7917_v1 = vld [vmem:[#allocation226_spill] sm:$0xff] }
 0x1d6   :  { %v1572_v23 = vsub.f32 %v7906_v20, %v5750_v3  ;;  %1911 = vmatpush.msrb.mxu1 %v1773_v12  ;;  %v1798_v8 = vmul.f32 %v1734_v13, %v1670_v48  ;;  %v1735_v10 = vsub.f32 %v879_v16, %v1607_v35  ;;  %v757_v21 = vmul.f32 %v7907_v32, %v7838_v38  ;;  %v7916_v48 = vld [vmem:[#allocation101_spill] sm:$0xff]  ;;  %v7918_v45 = vld [vmem:[#allocation211_spill] sm:$0xff]  ;;  %v7920_v24 = vld [vmem:[#allocation8_spill] sm:$0xff] }
 0x1d7   :  { %v845_v6 = vsub.f32 %v7908_v63, %v7840_v31  ;;  %v1636_v49 = vsub.f32 %v756_v9, %v1484_v30  ;;  %v1485_v50 = vmul.f32 %v7909_v17, %v5803_v7  ;;  %v1573_v15 = vsub.f32 %v7910_v28, %v5753_v54  ;;  %v7919_v13 = vld [vmem:[#allocation129_spill] sm:$0xff]  ;;  %v7927_v28 = vld [vmem:[#allocation110_spill] sm:$0xff] }
 0x1d8   :  { %v1700_v55 = vsub.f32 %v844_v59, %v1572_v23  ;;  %1928 = vmatpush.msrb.mxu2 %v1798_v8  ;;  %v1799_v57 = vmul.f32 %v1735_v10, %v1671_v51  ;;  %v782_v53 = vmul.f32 %v7911_v34, %v7892_v25  ;;  %v870_v52 = vsub.f32 %v7912_v29, %v7894_v60  ;;  %v7921_v51 = vld [vmem:[#allocation234_spill] sm:$0xff]  ;;  %v7922_v59 = vld [vmem:[#allocation121_spill] sm:$0xff]  ;;  %v7924_v10 = vld [vmem:[#allocation11_spill] sm:$0xff] }
 0x1d9   :  { %v1510_v0 = vmul.f32 %v7913_v61, %v5842_v46  ;;  %v1637_v37 = vsub.f32 %v757_v21, %v1485_v50  ;;  %v1701_v14 = vsub.f32 %v845_v6, %v1573_v15  ;;  %v1598_v27 = vsub.f32 %v7914_v5, %v5790_v39  ;;  %v7923_v23 = vld [vmem:[#allocation130_spill] sm:$0xff]  ;;  %v7925_v6 = vld [vmem:[#allocation235_spill] sm:$0xff]  ;;  %v7931_v5 = vld [vmem:[#allocation120_spill] sm:$0xff] }
 0x1da   :  { %v1764_v19 = vmul.f32 %v1700_v55, %v1636_v49  ;;  %1948 = vmatpush.msrb.mxu3 %v1799_v57  ;;  %v783_v43 = vmul.f32 %v7915_v41, %v7898_v62  ;;  %v871_v33 = vsub.f32 %v7916_v48, %v5649_v4  ;;  %v1511_v22 = vmul.f32 %v7917_v1, %v5856_v36  ;;  %v7926_v55 = vld [vmem:[#allocation122_spill] sm:$0xff]  ;;  %v7928_v57 = vld [vmem:[#allocation92_spill] sm:$0xff] }
 0x1db   :  { %v1662_v44 = vsub.f32 %v782_v53, %v1510_v0  ;;  %v1765_v16 = vmul.f32 %v1701_v14, %v1637_v37  ;;  %v1726_v47 = vsub.f32 %v870_v52, %v1598_v27  ;;  %v1599_v12 = vsub.f32 %v7918_v45, %v5825_v2  ;;  %v7929_v53 = vld [vmem:[#allocation227_spill] sm:$0xff] }
 0x1dc   :  { %1892 = vmatpush.msrb.mxu0 %v1764_v19  ;;  %v748_v18 = vmul.f32 %v7919_v13, %v7831_v56  ;;  %v1663_v35 = vsub.f32 %v783_v43, %v1511_v22  ;;  %v836_v9 = vsub.f32 %v7920_v24, %v7833_v42  ;;  %v1476_v26 = vmul.f32 %v7921_v51, %v5795_v58  ;;  %v7930_v19 = vld [vmem:[#allocation207_spill] sm:$0xff]  ;;  %v7933_v43 = vld [vmem:[#allocation228_spill] sm:$0xff]  ;;  %v7934_v22 = vld [vmem:[#allocation213_spill] sm:$0xff] }
 0x1dd   :  { %v1564_v40 = vsub.f32 %v7922_v59, %v5750_v3  ;;  %1912 = vmatpush.msrb.mxu1 %v1765_v16  ;;  %v1790_v30 = vmul.f32 %v1726_v47, %v1662_v44  ;;  %v1727_v20 = vsub.f32 %v871_v33, %v1599_v12  ;;  %v749_v8 = vmul.f32 %v7923_v23, %v7838_v38  ;;  %v7932_v44 = vld [vmem:[#allocation102_spill] sm:$0xff]  ;;  %v7935_v47 = vld [vmem:[#allocation133_spill] sm:$0xff]  ;;  %v7936_v13 = vld [vmem:[#allocation7_spill] sm:$0xff] }
 0x1de   :  { %v837_v32 = vsub.f32 %v7924_v10, %v7840_v31  ;;  %v1628_v21 = vsub.f32 %v748_v18, %v1476_v26  ;;  %v1477_v49 = vmul.f32 %v7925_v6, %v5803_v7  ;;  %v1565_v17 = vsub.f32 %v7926_v55, %v5753_v54  ;;  %v7943_v55 = vld [vmem:[#allocation114_spill] sm:$0xff] }
 0x1df   :  { %v1692_v63 = vsub.f32 %v836_v9, %v1564_v40  ;;  %1929 = vmatpush.msrb.mxu2 %v1790_v30  ;;  %v1791_v50 = vmul.f32 %v1727_v20, %v1663_v35  ;;  %v774_v15 = vmul.f32 %v7927_v28, %v7892_v25  ;;  %v862_v34 = vsub.f32 %v7928_v57, %v7894_v60  ;;  %v7937_v35 = vld [vmem:[#allocation238_spill] sm:$0xff]  ;;  %v7938_v9 = vld [vmem:[#allocation115_spill] sm:$0xff] }
 0x1e0   :  { %v1502_v29 = vmul.f32 %v7929_v53, %v5842_v46  ;;  %v1629_v61 = vsub.f32 %v749_v8, %v1477_v49  ;;  %v1693_v0 = vsub.f32 %v837_v32, %v1565_v17  ;;  %v1590_v37 = vsub.f32 %v7930_v19, %v5790_v39  ;;  %v7939_v40 = vld [vmem:[#allocation134_spill] sm:$0xff]  ;;  %v7941_v32 = vld [vmem:[#allocation239_spill] sm:$0xff] }
 0x1e1   :  { %v1756_v52 = vmul.f32 %v1692_v63, %v1628_v21  ;;  %1949 = vmatpush.msrb.mxu3 %v1791_v50  ;;  %v775_v27 = vmul.f32 %v7931_v5, %v7898_v62  ;;  %v863_v41 = vsub.f32 %v7932_v44, %v5649_v4  ;;  %v1503_v48 = vmul.f32 %v7933_v43, %v5856_v36  ;;  %v7940_v20 = vld [vmem:[#allocation10_spill] sm:$0xff]  ;;  %v7942_v63 = vld [vmem:[#allocation117_spill] sm:$0xff]  ;;  %v7944_v50 = vld [vmem:[#allocation95_spill] sm:$0xff] }
 0x1e2   :  { %v1654_v14 = vsub.f32 %v774_v15, %v1502_v29  ;;  %v1757_v33 = vmul.f32 %v1693_v0, %v1629_v61  ;;  %v1718_v1 = vsub.f32 %v862_v34, %v1590_v37  ;;  %v1591_v16 = vsub.f32 %v7934_v22, %v5825_v2  ;;  %v7945_v15 = vld [vmem:[#allocation229_spill] sm:$0xff]  ;;  %v7947_v19 = vld [vmem:[#allocation123_spill] sm:$0xff] }
 0x1e3   :  { %1893 = vmatpush.msrb.mxu0 %v1756_v52  ;;  %v740_v45 = vmul.f32 %v7935_v47, %v7831_v56  ;;  %v1655_v12 = vsub.f32 %v775_v27, %v1503_v48  ;;  %v828_v18 = vsub.f32 %v7936_v13, %v7833_v42  ;;  %v1468_v24 = vmul.f32 %v7937_v35, %v5795_v58  ;;  %v7946_v52 = vld [vmem:[#allocation208_spill] sm:$0xff]  ;;  %v7949_v27 = vld [vmem:[#allocation230_spill] sm:$0xff] }
 0x1e4   :  { %v1556_v51 = vsub.f32 %v7938_v9, %v5750_v3  ;;  %1913 = vmatpush.msrb.mxu1 %v1757_v33  ;;  %v1782_v26 = vmul.f32 %v1718_v1, %v1654_v14  ;;  %v1719_v59 = vsub.f32 %v863_v41, %v1591_v16  ;;  %v741_v30 = vmul.f32 %v7939_v40, %v7838_v38  ;;  %v7948_v14 = vld [vmem:[#allocation104_spill] sm:$0xff]  ;;  %v7950_v48 = vld [vmem:[#allocation214_spill] sm:$0xff]  ;;  %v7951_v1 = vld [vmem:[#allocation137_spill] sm:$0xff] }
 0x1e5   :  { %v829_v23 = vsub.f32 %v7940_v20, %v7840_v31  ;;  %v1620_v8 = vsub.f32 %v740_v45, %v1468_v24  ;;  %v1469_v21 = vmul.f32 %v7941_v32, %v5803_v7  ;;  %v1557_v6 = vsub.f32 %v7942_v63, %v5753_v54  ;;  %v7952_v47 = vld [vmem:[#allocation6_spill] sm:$0xff]  ;;  %v7957_v20 = vld [vmem:[#allocation243_spill] sm:$0xff]  ;;  %v7960_v32 = vld [vmem:[#allocation16_spill] sm:$0xff] }
 0x1e6   :  { %v1684_v10 = vsub.f32 %v828_v18, %v1556_v51  ;;  %1930 = vmatpush.msrb.mxu2 %v1782_v26  ;;  %v1783_v49 = vmul.f32 %v1719_v59, %v1655_v12  ;;  %v766_v17 = vmul.f32 %v7943_v55, %v7892_v25  ;;  %v854_v28 = vsub.f32 %v7944_v50, %v7894_v60  ;;  %v7953_v12 = vld [vmem:[#allocation242_spill] sm:$0xff]  ;;  %v7954_v18 = vld [vmem:[#allocation113_spill] sm:$0xff]  ;;  %v7955_v51 = vld [vmem:[#allocation140_spill] sm:$0xff] }
 0x1e7   :  { %v1494_v57 = vmul.f32 %v7945_v15, %v5842_v46  ;;  %v1621_v53 = vsub.f32 %v741_v30, %v1469_v21  ;;  %v1685_v29 = vsub.f32 %v829_v23, %v1557_v6  ;;  %v1582_v61 = vsub.f32 %v7946_v52, %v5790_v39  ;;  %v7956_v59 = vld [vmem:[#allocation9_spill] sm:$0xff]  ;;  %v7958_v23 = vld [vmem:[#allocation116_spill] sm:$0xff]  ;;  %v7966_v52 = vld [vmem:[#allocation219_spill] sm:$0xff] }
 0x1e8   :  { %v1748_v34 = vmul.f32 %v1684_v10, %v1620_v8  ;;  %1950 = vmatpush.msrb.mxu3 %v1783_v49  ;;  %v767_v37 = vmul.f32 %v7947_v19, %v7898_v62  ;;  %v855_v5 = vsub.f32 %v7948_v14, %v5649_v4  ;;  %v1495_v44 = vmul.f32 %v7949_v27, %v5856_v36  ;;  %v7962_v55 = vld [vmem:[#allocation217_spill] sm:$0xff]  ;;  %v7968_v14 = vld [vmem:[#allocation15_spill] sm:$0xff]  ;;  %v7969_v27 = vld [vmem:[#allocation236_spill] sm:$0xff] }
 0x1e9   :  { %v1646_v0 = vsub.f32 %v766_v17, %v1494_v57  ;;  %v1749_v41 = vmul.f32 %v1685_v29, %v1621_v53  ;;  %v1710_v43 = vsub.f32 %v854_v28, %v1582_v61  ;;  %v1583_v33 = vsub.f32 %v7950_v48, %v5825_v2  ;;  %v7964_v28 = vld [vmem:[#allocation107_spill] sm:$0xff]  ;;  %v7965_v57 = vld [vmem:[#allocation233_spill] sm:$0xff] }
 0x1ea   :  { %1894 = vmatpush.msrb.mxu0 %v1748_v34  ;;  %v690_v22 = vmul.f32 %v7951_v1, %v7831_v56  ;;  %v1647_v16 = vsub.f32 %v767_v37, %v1495_v44  ;;  %v820_v45 = vsub.f32 %v7952_v47, %v7833_v42  ;;  %v1418_v13 = vmul.f32 %v7953_v12, %v5795_v58  ;;  %v7971_v1 = vld [vmem:[#allocation132_spill] sm:$0xff] }
 0x1eb   :  { %v1548_v35 = vsub.f32 %v7954_v18, %v5750_v3  ;;  %1914 = vmatpush.msrb.mxu1 %v1749_v41  ;;  %v1774_v24 = vmul.f32 %v1710_v43, %v1646_v0  ;;  %v1711_v9 = vsub.f32 %v855_v5, %v1583_v33  ;;  %v705_v26 = vmul.f32 %v7955_v51, %v7838_v38  ;;  %v7959_v3 = vld [vmem:[#allocation127_spill] sm:$0xff]  ;;  %v7961_v38 = vld [vmem:[#allocation232_spill] sm:$0xff]  ;;  %v7970_v41 = vld [vmem:[#allocation221_spill] sm:$0xff] }
 0x1ec   :  { %v821_v40 = vsub.f32 %v7956_v59, %v7840_v31  ;;  %v1612_v56 = vsub.f32 %v690_v22, %v1418_v13  ;;  %v1433_v42 = vmul.f32 %v7957_v20, %v5803_v7  ;;  %v1549_v58 = vsub.f32 %v7958_v23, %v5753_v54  ;;  %v7963_v54 = vld [vmem:[#allocation128_spill] sm:$0xff]  ;;  %v7967_v0 = vld [vmem:[#allocation131_spill] sm:$0xff]  ;;  %v7973_v13 = vld [vmem:[#allocation237_spill] sm:$0xff] }
 0x1ed   :  { %v1676_v30 = vsub.f32 %v820_v45, %v1548_v35  ;;  %1931 = vmatpush.msrb.mxu2 %v1774_v24  ;;  %v1775_v8 = vmul.f32 %v1711_v9, %v1647_v16  ;;  %v758_v10 = vmul.f32 %v7959_v3, %v7892_v25  ;;  %v846_v21 = vsub.f32 %v7960_v32, %v7894_v60  ;;  %v7972_v16 = vld [vmem:[#allocation19_spill] sm:$0xff]  ;;  %v7976_v59 = vld [vmem:[#allocation14_spill] sm:$0xff] }
 0x1ee   :  { %v1486_v63 = vmul.f32 %v7961_v38, %v5842_v46  ;;  %v1613_v6 = vsub.f32 %v705_v26, %v1433_v42  ;;  %v1677_v49 = vsub.f32 %v821_v40, %v1549_v58  ;;  %v1574_v7 = vsub.f32 %v7962_v55, %v5790_v39  ;;  %v7974_v35 = vld [vmem:[#allocation223_spill] sm:$0xff]  ;;  %v7982_v55 = vld [vmem:[#allocation142_spill] sm:$0xff] }
 0x1ef   :  { %v1740_v31 = vmul.f32 %v1676_v30, %v1612_v56  ;;  %1951 = vmatpush.msrb.mxu3 %v1775_v8  ;;  %v759_v50 = vmul.f32 %v7963_v54, %v7898_v62  ;;  %v847_v15 = vsub.f32 %v7964_v28, %v5649_v4  ;;  %v1487_v34 = vmul.f32 %v7965_v57, %v5856_v36  ;;  %v7975_v51 = vld [vmem:[#allocation135_spill] sm:$0xff]  ;;  %v7977_v56 = vld [vmem:[#allocation240_spill] sm:$0xff]  ;;  %v3070_v54 = vld [vmem:[%s7061_s1 + $0x1c0] sm:$0xff] }
 0x1f0   :  { %v1638_v17 = vsub.f32 %v758_v10, %v1486_v63  ;;  %v1741_v53 = vmul.f32 %v1677_v49, %v1613_v6  ;;  %v1702_v29 = vsub.f32 %v846_v21, %v1574_v7  ;;  %v1575_v61 = vsub.f32 %v7966_v52, %v5825_v2  ;;  %v7978_v58 = vld [vmem:[#allocation139_spill] sm:$0xff]  ;;  %v7979_v10 = vld [vmem:[#allocation136_spill] sm:$0xff]  ;;  %v7980_v21 = vld [vmem:[#allocation18_spill] sm:$0xff] }
 0x1f1   :  { %1895 = vmatpush.msrb.mxu0 %v1740_v31  ;;  %v750_v19 = vmul.f32 %v7967_v0, %v7892_v25  ;;  %v1639_v37 = vsub.f32 %v759_v50, %v1487_v34  ;;  %v838_v5 = vsub.f32 %v7968_v14, %v7894_v60  ;;  %v1478_v44 = vmul.f32 %v7969_v27, %v5842_v46  ;;  %v7981_v63 = vld [vmem:[#allocation241_spill] sm:$0xff]  ;;  %v3072_v57 = vld [vmem:[%s7061_s1 + $0x1c8] sm:$0xff]  ;;  %v7985_v14 = vld [vmem:[#allocation244_spill] sm:$0xff] }
 0x1f2   :  { %2685 = vmatmul.msk.f32.vlgmr.msrb.gmra.mxu0 %vm444_vm0, %v7835_v11  ;;  %v1566_v43 = vsub.f32 %v7970_v41, %v5790_v39  ;;  %1915 = vmatpush.msrb.mxu1 %v1741_v53  ;;  %v1766_v48 = vmul.f32 %v1702_v29, %v1638_v17  ;;  %v1703_v33 = vsub.f32 %v847_v15, %v1575_v61  ;;  %v3069_v17 = vld [vmem:[%s7060_s0 + $0x1c0] sm:$0xff]  ;;  %v3071_v15 = vld [vmem:[%s7060_s0 + $0x1c8] sm:$0xff]  ;;  %v7984_v52 = vld [vmem:[#allocation13_spill] sm:$0xff] }
 0x1f3   :  { %v751_v22 = vmul.f32 %v7971_v1, %v7898_v62  ;;  %v839_v47 = vsub.f32 %v7972_v16, %v5649_v4  ;;  %2686 = vmatmul.msk.f32.vlgmr.msrb.gmra.mxu1 %vm444_vm0, %v7835_v11  ;;  %v1630_v45 = vsub.f32 %v750_v19, %v1478_v44  ;;  %v1479_v18 = vmul.f32 %v7973_v13, %v5856_v36  ;;  %v7983_v53 = vld [vmem:[#allocation143_spill] sm:$0xff]  ;;  %v7986_v44 = vld [vmem:[#allocation138_spill] sm:$0xff] }
 0x1f4   :  { %v1694_v12 = vsub.f32 %v838_v5, %v1566_v43  ;;  %v1567_v24 = vsub.f32 %v7974_v35, %v5825_v2  ;;  %1932 = vmatpush.msrb.mxu2 %v1766_v48  ;;  %v1767_v9 = vmul.f32 %v1703_v33, %v1639_v37  ;;  %v742_v26 = vmul.f32 %v7975_v51, %v7892_v25  ;;  %v7987_v43 = vld [vmem:[#allocation144_spill] sm:$0xff]  ;;  %v7988_v33 = vld [vmem:[#allocation17_spill] sm:$0xff]  ;;  %v3078_v35 = vld [vmem:[%s7061_s1 + $0x140] sm:$0xff] }
 0x1f5   :  { %v830_v40 = vsub.f32 %v7976_v59, %v7894_v60  ;;  %v1470_v30 = vmul.f32 %v7977_v56, %v5842_v46  ;;  %v1631_v42 = vsub.f32 %v751_v22, %v1479_v18  ;;  %v1558_v8 = vsub.f32 %v7978_v58, %v5790_v39  ;;  %v7989_v22 = vld [vmem:[#allocation245_spill] sm:$0xff]  ;;  %v3077_v18 = vld [vmem:[%s7060_s0 + $0x140] sm:$0xff]  ;;  %v3080_v51 = vld [vmem:[%s7061_s1 + $0x148] sm:$0xff] }
 0x1f6   :  { %v1758_v20 = vmul.f32 %v1694_v12, %v1630_v45  ;;  %v1695_v23 = vsub.f32 %v839_v47, %v1567_v24  ;;  %1952 = vmatpush.msrb.mxu3 %v1767_v9  ;;  %v743_v32 = vmul.f32 %v7979_v10, %v7898_v62  ;;  %v831_v38 = vsub.f32 %v7980_v21, %v5649_v4  ;;  %v3075_v12 = vld [vmem:[%s7060_s0 + $0x188] sm:$0xff]  ;;  %v3081_v59 = vld [vmem:[%s7060_s0 + $0x100] sm:$0xff] }
 0x1f7   :  { %v1622_v3 = vsub.f32 %v742_v26, %v1470_v30  ;;  %v1471_v31 = vmul.f32 %v7981_v63, %v5856_v36  ;;  %v1686_v49 = vsub.f32 %v830_v40, %v1558_v8  ;;  %v1559_v7 = vsub.f32 %v7982_v55, %v5825_v2  ;;  %v3079_v9 = vld [vmem:[%s7060_s0 + $0x148] sm:$0xff]  ;;  %v3082_v40 = vld [vmem:[%s7061_s1 + $0x100] sm:$0xff]  ;;  %v3085_v63 = vld [vmem:[%s7060_s0 + $0x1d0] sm:$0xff] }
 0x1f8   :  { %1933 = vmatpush.msrb.mxu2 %v1758_v20  ;;  %v1759_v6 = vmul.f32 %v1695_v23, %v1631_v42  ;;  %v2024_v50 = vsub.f32 %v3069_v17, %v3070_v54  ;;  %v2025_v34 = vsub.f32 %v3071_v15, %v3072_v57  ;;  %v720_v29 = vmul.f32 %v7983_v53, %v7892_v25  ;;  %v3083_v10 = vld [vmem:[%s7060_s0 + $0x108] sm:$0xff]  ;;  %v3088_v55 = vld [vmem:[%s7061_s1 + $0x1d8] sm:$0xff]  ;;  %v3089_v54 = vld [vmem:[%s7060_s0 + $0xc0] sm:$0xff] }
 0x1f9   :  { %v1623_v28 = vsub.f32 %v743_v32, %v1471_v31  ;;  %v822_v61 = vsub.f32 %v7984_v52, %v7894_v60  ;;  %v1750_v0 = vmul.f32 %v1686_v49, %v1622_v3  ;;  %v1687_v19 = vsub.f32 %v831_v38, %v1559_v7  ;;  %v3084_v32 = vld [vmem:[%s7061_s1 + $0x108] sm:$0xff]  ;;  %v3086_v31 = vld [vmem:[%s7061_s1 + $0x1d0] sm:$0xff]  ;;  %v3087_v49 = vld [vmem:[%s7060_s0 + $0x1d8] sm:$0xff] }
 0x1fa   :  { %1953 = vmatpush.msrb.mxu3 %v1759_v6  ;;  %v2088_v37 = vmul.f32 %v2024_v50, %v2024_v50  ;;  %v1448_v5 = vmul.f32 %v7985_v14, %v5842_v46  ;;  %v2089_v27 = vmul.f32 %v2025_v34, %v2025_v34  ;;  %v1550_v41 = vsub.f32 %v7986_v44, %v5790_v39  ;;  %v7990_v46 = vld [vmem:[#allocation141_spill] sm:$0xff]  ;;  %v3073_v39 = vld [vmem:[%s7060_s0 + $0x180] sm:$0xff]  ;;  %v3091_v15 = vld [vmem:[%s7060_s0 + $0xc8] sm:$0xff] }
 0x1fb   :  { %v735_v48 = vmul.f32 %v7987_v43, %v7898_v62  ;;  %v823_v25 = vsub.f32 %v7988_v33, %v5649_v4  ;;  %1934 = vmatpush.msrb.mxu2 %v1750_v0  ;;  %v1751_v1 = vmul.f32 %v1687_v19, %v1623_v28  ;;  %v1463_v16 = vmul.f32 %v7989_v22, %v5856_v36  ;;  %v3074_v4 = vld [vmem:[%s7061_s1 + $0x180] sm:$0xff]  ;;  %v3076_v36 = vld [vmem:[%s7061_s1 + $0x188] sm:$0xff]  ;;  %v3093_v52 = vld [vmem:[%s7060_s0 + $0x190] sm:$0xff] }
 0x1fc   :  { %2104 = vmatpush.msra.mxu0 %v2088_v37  ;;  %v1614_v60 = vsub.f32 %v720_v29, %v1448_v5  ;;  %2124 = vmatpush.msra.mxu1 %v2089_v27  ;;  %v1678_v47 = vsub.f32 %v822_v61, %v1550_v41  ;;  %v1551_v45 = vsub.f32 %v7990_v46, %v5825_v2  ;;  %v3090_v50 = vld [vmem:[%s7061_s1 + $0xc0] sm:$0xff]  ;;  %v3092_v57 = vld [vmem:[%s7061_s1 + $0xc8] sm:$0xff]  ;;  %v3094_v61 = vld [vmem:[%s7061_s1 + $0x190] sm:$0xff] }
 0x1fd   :  { %v2016_v62 = vsub.f32 %v3073_v39, %v3074_v4  ;;  %v2017_v13 = vsub.f32 %v3075_v12, %v3076_v36  ;;  %1954 = vmatpush.msrb.mxu3 %v1751_v1  ;;  %v1615_v2 = vsub.f32 %v735_v48, %v1463_v16  ;;  %v2008_v24 = vsub.f32 %v3077_v18, %v3078_v35  ;;  %v3095_v14 = vld [vmem:[%s7060_s0 + $0x198] sm:$0xff]  ;;  %v3097_v41 = vld [vmem:[%s7060_s0 + $0x80] sm:$0xff]  ;;  %v3099_v33 = vld [vmem:[%s7060_s0 + $0x88] sm:$0xff] }
 0x1fe   :  { %v2009_v26 = vsub.f32 %v3079_v9, %v3080_v51  ;;  %v2000_v56 = vsub.f32 %v3081_v59, %v3082_v40  ;;  %v1742_v30 = vmul.f32 %v1678_v47, %v1614_v60  ;;  %v1679_v20 = vsub.f32 %v823_v25, %v1551_v45  ;;  %v3096_v5 = vld [vmem:[%s7061_s1 + $0x198] sm:$0xff]  ;;  %v3098_v43 = vld [vmem:[%s7061_s1 + $0x80] sm:$0xff]  ;;  %v3100_v25 = vld [vmem:[%s7061_s1 + $0x88] sm:$0xff] }
 0x1ff   :  { %v2080_v42 = vmul.f32 %v2016_v62, %v2016_v62  ;;  %v2081_v23 = vmul.f32 %v2017_v13, %v2017_v13  ;;  %v2072_v58 = vmul.f32 %v2008_v24, %v2008_v24  ;;  %v2001_v21 = vsub.f32 %v3083_v10, %v3084_v32  ;;  %v3101_v22 = vld [vmem:[%s7060_s0 + $0x150] sm:$0xff]  ;;  %v3103_v46 = vld [vmem:[%s7060_s0 + $0x158] sm:$0xff]  ;;  %v3105_v12 = vld [vmem:[%s7060_s0 + $0x40] sm:$0xff] }
 0x200   :  { %v2073_v8 = vmul.f32 %v2009_v26, %v2009_v26  ;;  %v2064_v3 = vmul.f32 %v2000_v56, %v2000_v56  ;;  %1935 = vmatpush.msrb.mxu2 %v1742_v30  ;;  %v1743_v38 = vmul.f32 %v1679_v20, %v1615_v2  ;;  %v2026_v6 = vsub.f32 %v3085_v63, %v3086_v31  ;;  %v3102_v16 = vld [vmem:[%s7061_s1 + $0x150] sm:$0xff]  ;;  %v3104_v45 = vld [vmem:[%s7061_s1 + $0x158] sm:$0xff]  ;;  %v3106_v36 = vld [vmem:[%s7061_s1 + $0x40] sm:$0xff] }
 0x201   :  { %2105 = vmatpush.msra.mxu0 %v2080_v42  ;;  %v2027_v7 = vsub.f32 %v3087_v49, %v3088_v55  ;;  %2687 = vmatmul.msk.f32.vlgmr.msrb.gmra.mxu2 %vm444_vm0, %v7835_v11  ;;  %v2065_v17 = vmul.f32 %v2001_v21, %v2001_v21  ;;  %v1992_v28 = vsub.f32 %v3089_v54, %v3090_v50  ;;  %v3107_v35 = vld [vmem:[%s7060_s0 + $0x48] sm:$0xff]  ;;  %v3109_v26 = vld [vmem:[%s7060_s0 + $0x110] sm:$0xff]  ;;  %v3111_v56 = vld [vmem:[%s7060_s0 + $0x118] sm:$0xff] }
 0x202   :  { %2125 = vmatpush.msra.mxu1 %v2081_v23  ;;  %v1993_v34 = vsub.f32 %v3091_v15, %v3092_v57  ;;  %1955 = vmatpush.msrb.mxu3 %v1743_v38  ;;  %v2090_v53 = vmul.f32 %v2026_v6, %v2026_v6  ;;  %v2018_v0 = vsub.f32 %v3093_v52, %v3094_v61  ;;  %v3108_v24 = vld [vmem:[%s7061_s1 + $0x48] sm:$0xff]  ;;  %v3110_v59 = vld [vmem:[%s7061_s1 + $0x110] sm:$0xff]  ;;  %v3112_v30 = vld [vmem:[%s7061_s1 + $0x118] sm:$0xff] }
 0x203   :  { %2106 = vmatpush.msra.mxu0 %v2072_v58  ;;  %v2091_v29 = vmul.f32 %v2027_v7, %v2027_v7  ;;  %2688 = vmatmul.msk.f32.vlgmr.msrb.gmra.mxu3 %vm444_vm0, %v7835_v11  ;;  %v2056_v19 = vmul.f32 %v1992_v28, %v1992_v28  ;;  %v2019_v27 = vsub.f32 %v3095_v14, %v3096_v5  ;;  %v3113_v42 = vld [vmem:[%s7060_s0] sm:$0xff]  ;;  %v3116_v10 = vld [vmem:[%s7061_s1 + $0x8] sm:$0xff]  ;;  %v3117_v21 = vld [vmem:[%s7060_s0 + $0xd0] sm:$0xff] }
 0x204   :  { %2126 = vmatpush.msra.mxu1 %v2073_v8  ;;  %v2057_v37 = vmul.f32 %v1993_v34, %v1993_v34  ;;  %2144 = vmatpush.msra.mxu2 %v2090_v53  ;;  %v2082_v44 = vmul.f32 %v2018_v0, %v2018_v0  ;;  %v1984_v48 = vsub.f32 %v3097_v41, %v3098_v43  ;;  %v3114_v23 = vld [vmem:[%s7061_s1] sm:$0xff]  ;;  %v3118_v38 = vld [vmem:[%s7061_s1 + $0xd0] sm:$0xff]  ;;  %v3120_v54 = vld [vmem:[%s7061_s1 + $0xd8] sm:$0xff] }
 0x205   :  { %2107 = vmatpush.msra.mxu0 %v2064_v3  ;;  %v1985_v1 = vsub.f32 %v3099_v33, %v3100_v25  ;;  %2164 = vmatpush.msra.mxu3 %v2091_v29  ;;  %v2083_v60 = vmul.f32 %v2019_v27, %v2019_v27  ;;  %v2010_v47 = vsub.f32 %v3101_v22, %v3102_v16  ;;  %v3115_v3 = vld [vmem:[%s7060_s0 + $0x8] sm:$0xff]  ;;  %v3121_v28 = vld [vmem:[%s7060_s0 + $0x1e0] sm:$0xff]  ;;  %v3125_v52 = vld [vmem:[%s7060_s0 + $0x90] sm:$0xff] }
 0x206   :  { %2127 = vmatpush.msra.mxu1 %v2065_v17  ;;  %v2011_v39 = vsub.f32 %v3103_v46, %v3104_v45  ;;  %2145 = vmatpush.msra.mxu2 %v2082_v44  ;;  %v2048_v4 = vmul.f32 %v1984_v48, %v1984_v48  ;;  %v1976_v13 = vsub.f32 %v3105_v12, %v3106_v36  ;;  %v3119_v17 = vld [vmem:[%s7060_s0 + $0xd8] sm:$0xff]  ;;  %v3122_v15 = vld [vmem:[%s7061_s1 + $0x1e0] sm:$0xff]  ;;  %v3123_v34 = vld [vmem:[%s7060_s0 + $0x1e8] sm:$0xff] }
 0x207   :  { %2108 = vmatpush.msra.mxu0 %v2056_v19  ;;  %v2049_v62 = vmul.f32 %v1985_v1, %v1985_v1  ;;  %2165 = vmatpush.msra.mxu3 %v2083_v60  ;;  %v2074_v2 = vmul.f32 %v2010_v47, %v2010_v47  ;;  %v1977_v9 = vsub.f32 %v3107_v35, %v3108_v24  ;;  %v3124_v53 = vld [vmem:[%s7061_s1 + $0x1e8] sm:$0xff]  ;;  %v3126_v61 = vld [vmem:[%s7061_s1 + $0x90] sm:$0xff]  ;;  %v3127_v19 = vld [vmem:[%s7060_s0 + $0x98] sm:$0xff] }
 0x208   :  { %2128 = vmatpush.msra.mxu1 %v2057_v37  ;;  %v2075_v18 = vmul.f32 %v2011_v39, %v2011_v39  ;;  %v2040_v51 = vmul.f32 %v1976_v13, %v1976_v13  ;;  %v2002_v40 = vsub.f32 %v3109_v26, %v3110_v59  ;;  %v2003_v20 = vsub.f32 %v3111_v56, %v3112_v30  ;;  %v3128_v37 = vld [vmem:[%s7061_s1 + $0x98] sm:$0xff]  ;;  %v3129_v44 = vld [vmem:[%s7060_s0 + $0x1a0] sm:$0xff]  ;;  %v3131_v60 = vld [vmem:[%s7060_s0 + $0x1a8] sm:$0xff] }
 0x209   :  { %2109 = vmatpush.msra.mxu0 %v2048_v4  ;;  %v1968_v58 = vsub.f32 %v3113_v42, %v3114_v23  ;;  %2146 = vmatpush.msra.mxu2 %v2074_v2  ;;  %v2041_v8 = vmul.f32 %v1977_v9, %v1977_v9  ;;  %v1969_v32 = vsub.f32 %v3115_v3, %v3116_v10  ;;  %v3130_v41 = vld [vmem:[%s7061_s1 + $0x1a0] sm:$0xff]  ;;  %v3132_v22 = vld [vmem:[%s7061_s1 + $0x1a8] sm:$0xff]  ;;  %v3133_v47 = vld [vmem:[%s7060_s0 + $0x50] sm:$0xff] }
 0x20a   :  { %2129 = vmatpush.msra.mxu1 %v2049_v62  ;;  %v1994_v63 = vsub.f32 %v3117_v21, %v3118_v38  ;;  %2166 = vmatpush.msra.mxu3 %v2075_v18  ;;  %v2066_v31 = vmul.f32 %v2002_v40, %v2002_v40  ;;  %v2067_v6 = vmul.f32 %v2003_v20, %v2003_v20  ;;  %v3134_v46 = vld [vmem:[%s7061_s1 + $0x50] sm:$0xff]  ;;  %v3135_v39 = vld [vmem:[%s7060_s0 + $0x58] sm:$0xff]  ;;  %v3137_v12 = vld [vmem:[%s7060_s0 + $0x160] sm:$0xff] }
 0x20b   :  { %2110 = vmatpush.msra.mxu0 %v2040_v51  ;;  %v2032_v49 = vmul.f32 %v1968_v58, %v1968_v58  ;;  %v2033_v55 = vmul.f32 %v1969_v32, %v1969_v32  ;;  %v1995_v50 = vsub.f32 %v3119_v17, %v3120_v54  ;;  %v2028_v57 = vsub.f32 %v3121_v28, %v3122_v15  ;;  %v3136_v4 = vld [vmem:[%s7061_s1 + $0x58] sm:$0xff]  ;;  %v3138_v36 = vld [vmem:[%s7061_s1 + $0x160] sm:$0xff]  ;;  %v3139_v2 = vld [vmem:[%s7060_s0 + $0x168] sm:$0xff] }
 0x20c   :  { %2130 = vmatpush.msra.mxu1 %v2041_v8  ;;  %v2058_v7 = vmul.f32 %v1994_v63, %v1994_v63  ;;  %2147 = vmatpush.msra.mxu2 %v2066_v31  ;;  %v2029_v29 = vsub.f32 %v3123_v34, %v3124_v53  ;;  %v1986_v0 = vsub.f32 %v3125_v52, %v3126_v61  ;;  %v3140_v18 = vld [vmem:[%s7061_s1 + $0x168] sm:$0xff]  ;;  %v3141_v51 = vld [vmem:[%s7060_s0 + $0x10] sm:$0xff]  ;;  %v3143_v20 = vld [vmem:[%s7060_s0 + $0x18] sm:$0xff] }
 0x20d   :  { %2167 = vmatpush.msra.mxu3 %v2067_v6  ;;  %v1987_v14 = vsub.f32 %v3127_v19, %v3128_v37  ;;  %2111 = vmatpush.msra.mxu0 %v2032_v49  ;;  %v2059_v5 = vmul.f32 %v1995_v50, %v1995_v50  ;;  %v2092_v27 = vmul.f32 %v2028_v57, %v2028_v57  ;;  %v3142_v26 = vld [vmem:[%s7061_s1 + $0x10] sm:$0xff]  ;;  %v3144_v42 = vld [vmem:[%s7061_s1 + $0x18] sm:$0xff]  ;;  %v3145_v8 = vld [vmem:[%s7060_s0 + $0x120] sm:$0xff] }
 0x20e   :  { %2131 = vmatpush.msra.mxu1 %v2033_v55  ;;  %v2020_v43 = vsub.f32 %v3129_v44, %v3130_v41  ;;  %2148 = vmatpush.msra.mxu2 %v2058_v7  ;;  %v2093_v48 = vmul.f32 %v2029_v29, %v2029_v29  ;;  %v2050_v33 = vmul.f32 %v1986_v0, %v1986_v0  ;;  %v3146_v3 = vld [vmem:[%s7061_s1 + $0x120] sm:$0xff]  ;;  %v3147_v32 = vld [vmem:[%s7060_s0 + $0x128] sm:$0xff]  ;;  %v3149_v31 = vld [vmem:[%s7060_s0 + $0x1f0] sm:$0xff] }
 0x20f   :  { %2689 = vmatmul.msk.f32.vlgmr.msra.gmra.mxu0 %vm444_vm0, %v7835_v11  ;;  %v2051_v25 = vmul.f32 %v1987_v14, %v1987_v14  ;;  %2168 = vmatpush.msra.mxu3 %v2059_v5  ;;  %v2021_v16 = vsub.f32 %v3131_v60, %v3132_v22  ;;  %v1978_v45 = vsub.f32 %v3133_v47, %v3134_v46  ;;  %v3148_v21 = vld [vmem:[%s7061_s1 + $0x128] sm:$0xff]  ;;  %v3150_v6 = vld [vmem:[%s7061_s1 + $0x1f0] sm:$0xff]  ;;  %v3151_v55 = vld [vmem:[%s7060_s0 + $0x1f8] sm:$0xff] }
 0x210   :  { %2690 = vmatmul.msk.f32.vlgmr.msra.gmra.mxu1 %vm444_vm0, %v7835_v11  ;;  %v2084_v1 = vmul.f32 %v2020_v43, %v2020_v43  ;;  %2184 = vmatpush.msrb.mxu0 %v2092_v27  ;;  %v1979_v62 = vsub.f32 %v3135_v39, %v3136_v4  ;;  %v2012_v13 = vsub.f32 %v3137_v12, %v3138_v36  ;;  %v3152_v7 = vld [vmem:[%s7061_s1 + $0x1f8] sm:$0xff]  ;;  %v3153_v28 = vld [vmem:[%s7060_s0 + $0xe0] sm:$0xff]  ;;  %v3155_v29 = vld [vmem:[%s7060_s0 + $0xe8] sm:$0xff] }
 0x211   :  { %2204 = vmatpush.msrb.mxu1 %v2093_v48  ;;  %v2013_v35 = vsub.f32 %v3139_v2, %v3140_v18  ;;  %2149 = vmatpush.msra.mxu2 %v2050_v33  ;;  %v2085_v24 = vmul.f32 %v2021_v16, %v2021_v16  ;;  %v2042_v9 = vmul.f32 %v1978_v45, %v1978_v45  ;;  %v3154_v15 = vld [vmem:[%s7061_s1 + $0xe0] sm:$0xff]  ;;  %v3156_v52 = vld [vmem:[%s7061_s1 + $0xe8] sm:$0xff]  ;;  %v3157_v19 = vld [vmem:[%s7060_s0 + $0x1b0] sm:$0xff] }
 0x212   :  { %2169 = vmatpush.msra.mxu3 %v2051_v25  ;;  %v1970_v59 = vsub.f32 %v3141_v51, %v3142_v26  ;;  %2185 = vmatpush.msrb.mxu0 %v2084_v1  ;;  %v2043_v40 = vmul.f32 %v1979_v62, %v1979_v62  ;;  %v2076_v56 = vmul.f32 %v2012_v13, %v2012_v13  ;;  %v3158_v37 = vld [vmem:[%s7061_s1 + $0x1b0] sm:$0xff]  ;;  %v3159_v5 = vld [vmem:[%s7060_s0 + $0x1b8] sm:$0xff]  ;;  %v3161_v43 = vld [vmem:[%s7060_s0 + $0xa0] sm:$0xff] }
 0x213   :  { %v2077_v30 = vmul.f32 %v2013_v35, %v2013_v35  ;;  %v1971_v23 = vsub.f32 %v3143_v20, %v3144_v42  ;;  %2205 = vmatpush.msrb.mxu1 %v2085_v24  ;;  %2150 = vmatpush.msra.mxu2 %v2042_v9  ;;  %v2004_v10 = vsub.f32 %v3145_v8, %v3146_v3  ;;  %v3160_v27 = vld [vmem:[%s7061_s1 + $0x1b8] sm:$0xff]  ;;  %v3162_v48 = vld [vmem:[%s7061_s1 + $0xa0] sm:$0xff]  ;;  %v3163_v25 = vld [vmem:[%s7060_s0 + $0xa8] sm:$0xff] }
 0x214   :  { %v2034_v58 = vmul.f32 %v1970_v59, %v1970_v59  ;;  %v2005_v38 = vsub.f32 %v3147_v32, %v3148_v21  ;;  %2170 = vmatpush.msra.mxu3 %v2043_v40  ;;  %2186 = vmatpush.msrb.mxu0 %v2076_v56  ;;  %v2030_v49 = vsub.f32 %v3149_v31, %v3150_v6  ;;  %v3164_v1 = vld [vmem:[%s7061_s1 + $0xa8] sm:$0xff]  ;;  %v3165_v47 = vld [vmem:[%s7060_s0 + $0x170] sm:$0xff]  ;;  %v3167_v62 = vld [vmem:[%s7060_s0 + $0x178] sm:$0xff] }
 0x215   :  { %v2035_v63 = vmul.f32 %v1971_v23, %v1971_v23  ;;  %v2031_v17 = vsub.f32 %v3151_v55, %v3152_v7  ;;  %2206 = vmatpush.msrb.mxu1 %v2077_v30  ;;  %v2068_v54 = vmul.f32 %v2004_v10, %v2004_v10  ;;  %v1996_v57 = vsub.f32 %v3153_v28, %v3154_v15  ;;  %v3166_v46 = vld [vmem:[%s7061_s1 + $0x170] sm:$0xff]  ;;  %v3168_v12 = vld [vmem:[%s7061_s1 + $0x178] sm:$0xff]  ;;  %v3169_v13 = vld [vmem:[%s7060_s0 + $0x60] sm:$0xff] }
 0x216   :  { %2151 = vmatpush.msra.mxu2 %v2034_v58  ;;  %v2069_v50 = vmul.f32 %v2005_v38, %v2005_v38  ;;  %v2094_v34 = vmul.f32 %v2030_v49, %v2030_v49  ;;  %v1997_v61 = vsub.f32 %v3155_v29, %v3156_v52  ;;  %v2022_v14 = vsub.f32 %v3157_v19, %v3158_v37  ;;  %v3170_v2 = vld [vmem:[%s7061_s1 + $0x60] sm:$0xff]  ;;  %v3171_v24 = vld [vmem:[%s7060_s0 + $0x68] sm:$0xff]  ;;  %v3173_v26 = vld [vmem:[%s7060_s0 + $0x130] sm:$0xff] }
 0x217   :  { %2171 = vmatpush.msra.mxu3 %v2035_v63  ;;  %2691 = vmatmul.msk.f32.vlgmr.msra.gmra.mxu2 %vm444_vm0, %v7835_v11  ;;  %v2095_v53 = vmul.f32 %v2031_v17, %v2031_v17  ;;  %v2060_v0 = vmul.f32 %v1996_v57, %v1996_v57  ;;  %v2023_v44 = vsub.f32 %v3159_v5, %v3160_v27  ;;  %v3172_v9 = vld [vmem:[%s7061_s1 + $0x68] sm:$0xff]  ;;  %v3174_v59 = vld [vmem:[%s7061_s1 + $0x130] sm:$0xff]  ;;  %v3175_v20 = vld [vmem:[%s7060_s0 + $0x138] sm:$0xff] }
 0x218   :  { %2692 = vmatmul.msk.f32.vlgmr.msra.gmra.mxu3 %vm444_vm0, %v7835_v11  ;;  %2187 = vmatpush.msrb.mxu0 %v2068_v54  ;;  %v2061_v41 = vmul.f32 %v1997_v61, %v1997_v61  ;;  %v1988_v33 = vsub.f32 %v3161_v43, %v3162_v48  ;;  %v1989_v60 = vsub.f32 %v3163_v25, %v3164_v1  ;;  %v3176_v42 = vld [vmem:[%s7061_s1 + $0x138] sm:$0xff]  ;;  %v3177_v3 = vld [vmem:[%s7060_s0 + $0x20] sm:$0xff]  ;;  %v3179_v21 = vld [vmem:[%s7060_s0 + $0x28] sm:$0xff] }
 0x219   :  { %2207 = vmatpush.msrb.mxu1 %v2069_v50  ;;  %2224 = vmatpush.msrb.mxu2 %v2094_v34  ;;  %v2086_v22 = vmul.f32 %v2022_v14, %v2022_v14  ;;  %v2087_v16 = vmul.f32 %v2023_v44, %v2023_v44  ;;  %v2014_v45 = vsub.f32 %v3165_v47, %v3166_v46  ;;  %v3178_v10 = vld [vmem:[%s7061_s1 + $0x20] sm:$0xff]  ;;  %v3180_v38 = vld [vmem:[%s7061_s1 + $0x28] sm:$0xff]  ;;  %v3181_v6 = vld [vmem:[%s7060_s0 + $0xf0] sm:$0xff] }
 0x21a   :  { %2244 = vmatpush.msrb.mxu3 %v2095_v53  ;;  %2188 = vmatpush.msrb.mxu0 %v2060_v0  ;;  %v2052_v39 = vmul.f32 %v1988_v33, %v1988_v33  ;;  %v2053_v4 = vmul.f32 %v1989_v60, %v1989_v60  ;;  %v2015_v36 = vsub.f32 %v3167_v62, %v3168_v12  ;;  %v3182_v49 = vld [vmem:[%s7061_s1 + $0xf0] sm:$0xff]  ;;  %v3183_v7 = vld [vmem:[%s7060_s0 + $0xf8] sm:$0xff] }
 0x21b   :  { %2208 = vmatpush.msrb.mxu1 %v2061_v41  ;;  %v1980_v18 = vsub.f32 %v3169_v13, %v3170_v2  ;;  %2225 = vmatpush.msrb.mxu2 %v2086_v22  ;;  %v2078_v35 = vmul.f32 %v2014_v45, %v2014_v45  ;;  %v1981_v51 = vsub.f32 %v3171_v24, %v3172_v9  ;;  %v3184_v17 = vld [vmem:[%s7061_s1 + $0xf8] sm:$0xff]  ;;  %v3185_v15 = vld [vmem:[%s7060_s0 + $0xb0] sm:$0xff] }
 0x21c   :  { %2245 = vmatpush.msrb.mxu3 %v2087_v16  ;;  %v2006_v40 = vsub.f32 %v3173_v26, %v3174_v59  ;;  %2189 = vmatpush.msrb.mxu0 %v2052_v39  ;;  %v2079_v56 = vmul.f32 %v2015_v36, %v2015_v36  ;;  %v2007_v23 = vsub.f32 %v3175_v20, %v3176_v42  ;;  %v3186_v57 = vld [vmem:[%s7061_s1 + $0xb0] sm:$0xff]  ;;  %v3187_v52 = vld [vmem:[%s7060_s0 + $0xb8] sm:$0xff] }
 0x21d   :  { %2209 = vmatpush.msrb.mxu1 %v2053_v4  ;;  %v2044_v30 = vmul.f32 %v1980_v18, %v1980_v18  ;;  %2226 = vmatpush.msrb.mxu2 %v2078_v35  ;;  %v2045_v58 = vmul.f32 %v1981_v51, %v1981_v51  ;;  %v1972_v32 = vsub.f32 %v3177_v3, %v3178_v10  ;;  %v3188_v61 = vld [vmem:[%s7061_s1 + $0xb8] sm:$0xff]  ;;  %v3189_v19 = vld [vmem:[%s7060_s0 + $0x70] sm:$0xff] }
 0x21e   :  { %v2070_v8 = vmul.f32 %v2006_v40, %v2006_v40  ;;  %v1973_v63 = vsub.f32 %v3179_v21, %v3180_v38  ;;  %2246 = vmatpush.msrb.mxu3 %v2079_v56  ;;  %v2071_v31 = vmul.f32 %v2007_v23, %v2007_v23  ;;  %v1998_v55 = vsub.f32 %v3181_v6, %v3182_v49  ;;  %v3190_v37 = vld [vmem:[%s7061_s1 + $0x70] sm:$0xff]  ;;  %v3191_v27 = vld [vmem:[%s7060_s0 + $0x78] sm:$0xff] }
 0x21f   :  { %2190 = vmatpush.msrb.mxu0 %v2044_v30  ;;  %v1999_v54 = vsub.f32 %v3183_v7, %v3184_v17  ;;  %2210 = vmatpush.msrb.mxu1 %v2045_v58  ;;  %v2036_v50 = vmul.f32 %v1972_v32, %v1972_v32  ;;  %v1990_v34 = vsub.f32 %v3185_v15, %v3186_v57  ;;  %v3192_v44 = vld [vmem:[%s7061_s1 + $0x78] sm:$0xff]  ;;  %v3193_v43 = vld [vmem:[%s7060_s0 + $0x30] sm:$0xff] }
 0x220   :  { %2227 = vmatpush.msrb.mxu2 %v2070_v8  ;;  %v2037_v28 = vmul.f32 %v1973_v63, %v1973_v63  ;;  %2247 = vmatpush.msrb.mxu3 %v2071_v31  ;;  %v2062_v53 = vmul.f32 %v1998_v55, %v1998_v55  ;;  %v1991_v0 = vsub.f32 %v3187_v52, %v3188_v61  ;;  %v3194_v48 = vld [vmem:[%s7061_s1 + $0x30] sm:$0xff]  ;;  %v3195_v60 = vld [vmem:[%s7060_s0 + $0x38] sm:$0xff] }
 0x221   :  { %v2063_v29 = vmul.f32 %v1999_v54, %v1999_v54  ;;  %v1982_v14 = vsub.f32 %v3189_v19, %v3190_v37  ;;  %2191 = vmatpush.msrb.mxu0 %v2036_v50  ;;  %v2054_v5 = vmul.f32 %v1990_v34, %v1990_v34  ;;  %v1983_v41 = vsub.f32 %v3191_v27, %v3192_v44  ;;  %v3196_v22 = vld [vmem:[%s7061_s1 + $0x38] sm:$0xff] }
 0x222   :  { %2211 = vmatpush.msrb.mxu1 %v2037_v28  ;;  %v1974_v33 = vsub.f32 %v3193_v43, %v3194_v48  ;;  %2228 = vmatpush.msrb.mxu2 %v2062_v53  ;;  %v2055_v25 = vmul.f32 %v1991_v0, %v1991_v0  ;;  %v1975_v16 = vsub.f32 %v3195_v60, %v3196_v22 }
 0x223   :  { %2248 = vmatpush.msrb.mxu3 %v2063_v29  ;;  %v2046_v1 = vmul.f32 %v1982_v14, %v1982_v14  ;;  %2693 = vmatmul.msk.f32.vlgmr.msrb.gmra.mxu0 %vm444_vm0, %v7835_v11  ;;  %v2047_v47 = vmul.f32 %v1983_v41, %v1983_v41 }
 0x224   :  { %2694 = vmatmul.msk.f32.vlgmr.msrb.gmra.mxu1 %vm444_vm0, %v7835_v11  ;;  %2229 = vmatpush.msrb.mxu2 %v2054_v5  ;;  %v2038_v46 = vmul.f32 %v1974_v33, %v1974_v33  ;;  %v2039_v45 = vmul.f32 %v1975_v16, %v1975_v16 }
 0x225   :  { %2249 = vmatpush.msrb.mxu3 %v2055_v25 }
 0x226   :  { %2230 = vmatpush.msrb.mxu2 %v2046_v1 }
 0x227   :  { %2250 = vmatpush.msrb.mxu3 %v2047_v47 }
 0x228   :  { %2231 = vmatpush.msrb.mxu2 %v2038_v46 }
 0x229   :  { %2251 = vmatpush.msrb.mxu3 %v2039_v45  ;;  %2695 = vmatmul.msk.f32.vlgmr.msrb.gmra.mxu2 %vm444_vm0, %v7835_v11 }
 0x22a   :  { %2696 = vmatmul.msk.f32.vlgmr.msrb.gmra.mxu3 %vm444_vm0, %v7835_v11 }
 0x237   :  { %v1817_v39 = vpop.f32.mrf.mxu0 }
 0x238   :  { %v1837_v4 = vpop.f32.mrf.mxu1  ;;  %v6638_v62 = vmul.f32 0.5, %v1817_v39 }
 0x239   :  { %v6640_v12 = vmul.f32 0.5, %v1837_v4 }
 0x23a   :  { %v2256_v36 = vadd.f32 10.0, %v6638_v62 }
 0x23b   :  { %v2257_v13 = vadd.f32 10.0, %v6640_v12 }
 0x23c   :  { %3021 = vrcp.f32 %v2256_v36  ;;  %v6659_v3 = vmul.f32 %v2256_v36, %v2256_v36  ;;  %vm2269_vm0 = vweird.f32 %v2256_v36  ;;  %v2275_v31 = vand.u32 2147483648, %v2256_v36 }
 0x23d   :  { %3023 = vrcp.f32 %v2257_v13  ;;  %v6667_v38 = vmul.f32 %v2257_v13, %v2257_v13  ;;  %vm2284_vm6 = vweird.f32 %v2257_v13  ;;  %v2273_v49 = vand.u32 2147483647, %v2256_v36 }
 0x23e   :  { %v2290_v55 = vand.u32 2147483648, %v2257_v13  ;;  %v2288_v50 = vand.u32 2147483647, %v2257_v13  ;;  %v2276_v57 = vor.u32 1.1754944e-38, %v2275_v31  ;;  %v2419_v33 = vand.u32 2147483648, %v6659_v3 }
 0x23f   :  { %vm2274_vm10 = vcmp.eq.f32.partialorder %v2273_v49, 8.507059e+37  ;;  %vm2428_vm15 = vweird.f32 %v6667_v38 }
 0x240   :  { %v2291_v52 = vor.u32 1.1754944e-38, %v2290_v55  ;;  %vm2289_vm11 = vcmp.eq.f32.partialorder %v2288_v50, 8.507059e+37  ;;  %v2432_v55 = vand.u32 2147483647, %v6667_v38 }
 0x242   :  { %v3022_v35 = vpop.eup %3021 }
 0x243   :  { %v3024_v24 = vpop.eup %3023  ;;  %v2265_v51 = vmul.f32 %v3022_v35, %v2256_v36  ;;  %vm2270_vm5 = vweird.f32 %v3022_v35 }
 0x244   :  { %v2280_v26 = vmul.f32 %v3024_v24, %v2257_v13  ;;  %vm2285_vm7 = vweird.f32 %v3024_v24  ;;  %vm6676_vm8 = vmor %vm2269_vm0, %vm2270_vm5  ;;  %v2417_v13 = vand.u32 2147483647, %v6659_v3  ;;  %vm6772_vm0 = vcmp.eq.f32.partialorder %v2432_v55, 8.507059e+37 }
 0x245   :  { %v2266_v56 = vsub.f32 1.0, %v2265_v51  ;;  %vm6680_vm9 = vmor %vm2284_vm6, %vm2285_vm7 }
 0x246   :  { %v2281_v30 = vsub.f32 1.0, %v2280_v26 }
 0x247   :  { %v2267_v8 = vmul.f32 %v3022_v35, %v2266_v56  ;;  %v2434_v56 = vand.u32 2147483648, %v6667_v38 }
 0x248   :  { %v2282_v21 = vmul.f32 %v3024_v24, %v2281_v30 }
 0x249   :  { %v2268_v6 = vadd.f32 %v3022_v35, %v2267_v8 }
 0x24a   :  { %v2283_v54 = vadd.f32 %v3024_v24, %v2282_v21 }
 0x24b   :  { %v2272_v29 = vsel %vm6676_vm8, %v3022_v35, %v2268_v6 }
 0x24c   :  { %v2287_v61 = vsel %vm6680_vm9, %v3024_v24, %v2283_v54  ;;  %v2277_v5 = vsel %vm2274_vm10, %v2276_v57, %v2272_v29 }
 0x24d   :  { %v2292_v44 = vsel %vm2289_vm11, %v2291_v52, %v2287_v61  ;;  %v2278_v1 = vmul.f32 0.5, %v2277_v5 }
 0x24e   :  { %v2293_v46 = vmul.f32 0.5, %v2292_v44 }
 0x250   :  { %v2386_v26 = vmul.f32 1.442695, %v2293_v46 }
 0x255   :  { %v1857_v2 = vpop.f32.mrf.mxu2 }
 0x256   :  { %v6644_v18 = vmul.f32 0.5, %v1857_v2  ;;  %v6725_v2 = vor.u32 1.1754944e-38, %v2419_v33 }
 0x257   :  { %v1877_v11 = vpop.f32.mrf.mxu3 }
 0x258   :  { %v6647_v9 = vadd.f32 10.0, %v6644_v18  ;;  %v6649_v59 = vmul.f32 0.5, %v1877_v11  ;;  %v2384_v11 = vmul.f32 1.442695, %v2278_v1 }
 0x25a   :  { %3025 = vrcp.f32 %v6647_v9  ;;  %v6653_v20 = vadd.f32 10.0, %v6649_v59  ;;  %v6708_v60 = vmul.f32 %v6647_v9, %v6647_v9  ;;  %vm2299_vm12 = vweird.f32 %v6647_v9 }
 0x25b   :  { %v2305_v35 = vand.u32 2147483648, %v6647_v9  ;;  %v2303_v51 = vand.u32 2147483647, %v6647_v9 }
 0x25c   :  { %3027 = vrcp.f32 %v6653_v20  ;;  %v6749_v6 = vmul.f32 %v6653_v20, %v6653_v20  ;;  %vm2314_vm1 = vweird.f32 %v6653_v20  ;;  %v2318_v61 = vand.u32 2147483647, %v6653_v20 }
 0x25d   :  { %3029 = vrcp.f32 %v6659_v3  ;;  %v2306_v31 = vor.u32 1.1754944e-38, %v2305_v35  ;;  %vm2304_vm2 = vcmp.eq.f32.partialorder %v2303_v51, 8.507059e+37 }
 0x25e   :  { %vm2319_vm11 = vcmp.eq.f32.partialorder %v2318_v61, 8.507059e+37 }
 0x260   :  { %v6657_v58 = vpop.eup %3025 }
 0x261   :  { %v2295_v63 = vmul.f32 %v6657_v58, %v6647_v9  ;;  %vm2300_vm13 = vweird.f32 %v6657_v58 }
 0x262   :  { %v6685_v15 = vpop.eup %3027  ;;  %vm6734_vm14 = vmor %vm2299_vm12, %vm2300_vm13  ;;  %vm2443_vm13 = vweird.f32 %v6708_v60 }
 0x263   :  { %v2296_v34 = vsub.f32 1.0, %v2295_v63  ;;  %v6692_v0 = vpop.eup %3029  ;;  %v2310_v19 = vmul.f32 %v6685_v15, %v6653_v20  ;;  %vm2315_vm3 = vweird.f32 %v6685_v15 }
 0x264   :  { %v2409_v48 = vmul.f32 %v6692_v0, %v6659_v3  ;;  %vm6785_vm5 = vmor %vm2314_vm1, %vm2315_vm3 }
 0x265   :  { %v2297_v41 = vmul.f32 %v6657_v58, %v2296_v34  ;;  %v2311_v25 = vsub.f32 1.0, %v2310_v19  ;;  %v2320_v19 = vand.u32 2147483648, %v6653_v20 }
 0x266   :  { %v2410_v36 = vsub.f32 1.0, %v2409_v48 }
 0x267   :  { %v2298_v4 = vadd.f32 %v6657_v58, %v2297_v41  ;;  %v2312_v21 = vmul.f32 %v6685_v15, %v2311_v25 }
 0x268   :  { %v2411_v63 = vmul.f32 %v6692_v0, %v2410_v36 }
 0x269   :  { %v2302_v9 = vsel %vm6734_vm14, %v6657_v58, %v2298_v4  ;;  %v6753_v58 = vor.u32 1.1754944e-38, %v2434_v56  ;;  %v2313_v28 = vadd.f32 %v6685_v15, %v2312_v21  ;;  %v2321_v4 = vor.u32 1.1754944e-38, %v2320_v19 }
 0x26a   :  { %v2307_v54 = vsel %vm2304_vm2, %v2306_v31, %v2302_v9  ;;  %v6764_v34 = vadd.f32 %v6692_v0, %v2411_v63 }
 0x26b   :  { %v2308_v52 = vmul.f32 0.5, %v2307_v54 }
 0x26d   :  { %v2388_v56 = vmul.f32 1.442695, %v2308_v52 }
 0x26f   :  { %v1897_v40 = vpop.f32.mrf.mxu0 }
 0x270   :  { %v6655_v42 = vmul.f32 0.5, %v1897_v40  ;;  %v1917_v23 = vpop.f32.mrf.mxu1 }
 0x271   :  { %v6665_v32 = vmul.f32 0.5, %v1917_v23 }
 0x272   :  { %v6663_v10 = vadd.f32 10.0, %v6655_v42 }
 0x273   :  { %v6674_v7 = vadd.f32 10.0, %v6665_v32 }
 0x274   :  { %3031 = vrcp.f32 %v6663_v10  ;;  %vm2329_vm6 = vweird.f32 %v6663_v10 }
 0x275   :  { %3033 = vrcp.f32 %v6667_v38  ;;  %vm2344_vm9 = vweird.f32 %v6674_v7  ;;  %v2348_v51 = vand.u32 2147483647, %v6674_v7 }
 0x276   :  { %3035 = vrcp.f32 %v6674_v7 }
 0x277   :  { %3037 = vrcp.f32 %v6708_v60  ;;  %vm2349_vm2 = vcmp.eq.f32.partialorder %v2348_v51, 8.507059e+37 }
 0x27a   :  { %v6696_v37 = vpop.eup %3031 }
 0x27b   :  { %v6700_v27 = vpop.eup %3033  ;;  %v2325_v16 = vmul.f32 %v6696_v37, %v6663_v10  ;;  %vm2330_vm7 = vweird.f32 %v6696_v37 }
 0x27c   :  { %v6710_v22 = vpop.eup %3035  ;;  %v2424_v45 = vmul.f32 %v6700_v27, %v6667_v38  ;;  %vm2429_vm4 = vweird.f32 %v6700_v27  ;;  %v2333_v38 = vand.u32 2147483647, %v6663_v10  ;;  %vm6819_vm12 = vmor %vm2329_vm6, %vm2330_vm7 }
 0x27d   :  { %v2340_v24 = vmul.f32 %v6710_v22, %v6674_v7  ;;  %v2326_v23 = vsub.f32 1.0, %v2325_v16  ;;  %v6755_v50 = vpop.eup %3037  ;;  %v2317_v16 = vsel %vm6785_vm5, %v6685_v15, %v2313_v28  ;;  %vm6805_vm8 = vmor %vm2428_vm15, %vm2429_vm4  ;;  %vm2345_vm10 = vweird.f32 %v6710_v22 }
 0x27e   :  { %v2425_v40 = vsub.f32 1.0, %v2424_v45  ;;  %v2439_v41 = vmul.f32 %v6755_v50, %v6708_v60  ;;  %v2335_v45 = vand.u32 2147483648, %v6663_v10  ;;  %vm6838_vm14 = vmor %vm2344_vm9, %vm2345_vm10  ;;  %vm2334_vm15 = vcmp.eq.f32.partialorder %v2333_v38, 8.507059e+37 }
 0x27f   :  { %v2341_v49 = vsub.f32 1.0, %v2340_v24  ;;  %v2327_v5 = vmul.f32 %v6696_v37, %v2326_v23  ;;  %v2322_v23 = vsel %vm2319_vm11, %v2321_v4, %v2317_v16  ;;  %vm2444_vm1 = vweird.f32 %v6755_v50 }
 0x280   :  { %v2426_v17 = vmul.f32 %v6700_v27, %v2425_v40  ;;  %v6828_v40 = vmul.f32 %v6674_v7, %v6674_v7  ;;  %v2440_v30 = vsub.f32 1.0, %v2439_v41  ;;  %v2336_v31 = vor.u32 1.1754944e-38, %v2335_v45  ;;  %vm6895_vm7 = vmor %vm2443_vm13, %vm2444_vm1 }
 0x281   :  { %v2342_v33 = vmul.f32 %v6710_v22, %v2341_v49  ;;  %v2328_v36 = vadd.f32 %v6696_v37, %v2327_v5  ;;  %v2323_v61 = vmul.f32 0.5, %v2322_v23  ;;  %vm2458_vm4 = vweird.f32 %v6749_v6 }
 0x282   :  { %v2427_v44 = vadd.f32 %v6700_v27, %v2426_v17  ;;  %v2447_v17 = vand.u32 2147483647, %v6708_v60  ;;  %v2441_v52 = vmul.f32 %v6755_v50, %v2440_v30  ;;  %v2462_v4 = vand.u32 2147483647, %v6749_v6 }
 0x283   :  { %v2332_v49 = vsel %vm6819_vm12, %v6696_v37, %v2328_v36  ;;  %v2390_v16 = vmul.f32 1.442695, %v2323_v61  ;;  %v2464_v36 = vand.u32 2147483648, %v6749_v6  ;;  %vm2413_vm11 = vweird.f32 %v6659_v3 }
 0x284   :  { %v1937_v53 = vpop.f32.mrf.mxu2  ;;  %v2337_v5 = vsel %vm2334_vm15, %v2336_v31, %v2332_v49  ;;  %vm2414_vm12 = vweird.f32 %v6692_v0  ;;  %vm6916_vm13 = vcmp.eq.f32.partialorder %v2462_v4, 8.507059e+37  ;;  %vm2488_vm1 = vweird.f32 %v6828_v40 }
 0x285   :  { %v6698_v14 = vmul.f32 0.5, %v1937_v53  ;;  %v6770_v53 = vmul.f32 %v6663_v10, %v6663_v10  ;;  %v2431_v10 = vsel %vm6805_vm8, %v6700_v27, %v2427_v44  ;;  %v2338_v46 = vmul.f32 0.5, %v2337_v5 }
 0x286   :  { %v1957_v43 = vpop.f32.mrf.mxu3  ;;  %v6863_v19 = vsel %vm6772_vm0, %v6753_v58, %v2431_v10  ;;  %vm6899_vm8 = vcmp.eq.f32.partialorder %v2447_v17, 8.507059e+37  ;;  %v2465_v31 = vor.u32 1.1754944e-38, %v2464_v36 }
 0x287   :  { %v6715_v47 = vadd.f32 10.0, %v6698_v14  ;;  %v6719_v39 = vmul.f32 0.5, %v1957_v43  ;;  %v2449_v43 = vand.u32 2147483648, %v6708_v60  ;;  %v2392_v60 = vmul.f32 1.442695, %v2338_v46 }
 0x288   :  { %vm2473_vm10 = vweird.f32 %v6770_v53  ;;  %v2477_v49 = vand.u32 2147483647, %v6770_v53 }
 0x289   :  { %3039 = vrcp.f32 %v6715_v47  ;;  %v6739_v8 = vadd.f32 10.0, %v6719_v39  ;;  %v6853_v54 = vor.u32 1.1754944e-38, %v2449_v43  ;;  %vm2359_vm3 = vweird.f32 %v6715_v47 }
 0x28a   :  { %3041 = vpow2.f32 %v2384_v11  ;;  %v2343_v11 = vadd.f32 %v6710_v22, %v2342_v33  ;;  %v2363_v58 = vand.u32 2147483647, %v6715_v47  ;;  %v2365_v29 = vand.u32 2147483648, %v6715_v47 }
 0x28b   :  { %3043 = vpow2.f32 %v2386_v26  ;;  %v2350_v26 = vand.u32 2147483648, %v6674_v7  ;;  %v6889_v10 = vmul.f32 %v6715_v47, %v6715_v47 }
 0x28c   :  { %3045 = vrcp.f32 %v6739_v8  ;;  %v2347_v28 = vsel %vm6838_vm14, %v6710_v22, %v2343_v11  ;;  %v2366_v24 = vor.u32 1.1754944e-38, %v2365_v29  ;;  %vm2364_vm6 = vcmp.eq.f32.partialorder %v2363_v58, 8.507059e+37  ;;  %v6961_v4 = vpop.f32.mrf.mxu0 }
 0x28d   :  { %3047 = vrcp.f32 %v6749_v6  ;;  %v2351_v7 = vor.u32 1.1754944e-38, %v2350_v26  ;;  %v6948_v29 = vmul.f32 %v6739_v8, %v6739_v8  ;;  %v2133_v36 = vpop.f32.mrf.mxu1 }
 0x28e   :  { %3049 = vrcp.f32 %v6770_v53 }
 0x28f   :  { %v6761_v57 = vpop.eup %3039  ;;  %3051 = vrcp.f32 %v6828_v40  ;;  %v2352_v43 = vsel %vm2349_vm2, %v2351_v7, %v2347_v28  ;;  %vm2374_vm2 = vweird.f32 %v6739_v8 }
 0x290   :  { %v6790_v25 = vpop.eup %3041  ;;  %v2355_v1 = vmul.f32 %v6761_v57, %v6715_v47  ;;  %3053 = vpow2.f32 %v2388_v56  ;;  %vm2360_vm5 = vweird.f32 %v6761_v57  ;;  %v2353_v26 = vmul.f32 0.5, %v2352_v43 }
 0x291   :  { %v6799_v20 = vpop.eup %3043  ;;  %vm2361_vm0 = vmor %vm2359_vm3, %vm2360_vm5  ;;  %3055 = vpow2.f32 %v2390_v16 }
 0x292   :  { %v6813_v15 = vpop.eup %3045  ;;  %v2356_v21 = vsub.f32 1.0, %v2355_v1  ;;  %v6877_v1 = vadd.f32 %v6755_v50, %v2441_v52  ;;  %3057 = vrcp.f32 %v6889_v10  ;;  %v2394_v7 = vmul.f32 1.442695, %v2353_v26 }
 0x293   :  { %v6817_v35 = vpop.eup %3047  ;;  %v2370_v63 = vmul.f32 %v6813_v15, %v6739_v8  ;;  %vm2375_vm14 = vweird.f32 %v6813_v15  ;;  %3059 = vpow2.f32 %v2392_v60  ;;  %v6999_v60 = vld [vmem:[%s7062_s2] sm:$0xff] }
 0x294   :  { %v2454_v27 = vmul.f32 %v6817_v35, %v6749_v6  ;;  %v6850_v55 = vpop.eup %3049  ;;  %v2357_v44 = vmul.f32 %v6761_v57, %v2356_v21  ;;  %v2446_v47 = vsel %vm6895_vm7, %v6755_v50, %v6877_v1  ;;  %vm2459_vm9 = vweird.f32 %v6817_v35  ;;  %vm6928_vm5 = vmor %vm2374_vm2, %vm2375_vm14 }
 0x295   :  { %v2371_v37 = vsub.f32 1.0, %v2370_v63  ;;  %v2469_v22 = vmul.f32 %v6850_v55, %v6770_v53  ;;  %v6869_v48 = vpop.eup %3051  ;;  %v2479_v50 = vand.u32 2147483648, %v6770_v53  ;;  %vm2474_vm15 = vweird.f32 %v6850_v55 }
 0x296   :  { %v2455_v41 = vsub.f32 1.0, %v2454_v27  ;;  %v2358_v33 = vadd.f32 %v6761_v57, %v2357_v44  ;;  %v2484_v45 = vmul.f32 %v6869_v48, %v6828_v40  ;;  %v6884_v11 = vpop.eup %3053  ;;  %vm2489_vm3 = vweird.f32 %v6869_v48 }
 0x297   :  { %v2470_v30 = vsub.f32 1.0, %v2469_v22  ;;  %v2372_v21 = vmul.f32 %v6813_v15, %v2371_v37  ;;  %v2378_v44 = vand.u32 2147483647, %v6739_v8  ;;  %v3056_v22 = vpop.eup %3055  ;;  %3061 = vpow2.f32 %v2394_v7  ;;  %vm6976_vm7 = vmor %vm2488_vm1, %vm2489_vm3 }
 0x298   :  { %v2362_v38 = vsel %vm2361_vm0, %v6761_v57, %v2358_v33  ;;  %v2456_v51 = vmul.f32 %v6817_v35, %v2455_v41  ;;  %v2485_v23 = vsub.f32 1.0, %v2484_v45  ;;  %v2380_v41 = vand.u32 2147483648, %v6739_v8  ;;  %vm6938_vm0 = vmor %vm2458_vm4, %vm2459_vm9  ;;  %v3058_v1 = vpop.eup %3057 }
 0x299   :  { %v2367_v9 = vsel %vm2364_vm6, %v2366_v24, %v2362_v38  ;;  %v2471_v28 = vmul.f32 %v6850_v55, %v2470_v30  ;;  %v2373_v61 = vadd.f32 %v6813_v15, %v2372_v21  ;;  %v2494_v33 = vand.u32 2147483648, %v6828_v40  ;;  %vm6955_vm4 = vmor %vm2473_vm10, %vm2474_vm15 }
 0x29a   :  { %v2368_v63 = vmul.f32 0.5, %v2367_v9  ;;  %v2457_v27 = vadd.f32 %v6817_v35, %v2456_v51  ;;  %v2486_v52 = vmul.f32 %v6869_v48, %v2485_v23  ;;  %v2492_v45 = vand.u32 2147483647, %v6828_v40  ;;  %v3060_v40 = vpop.eup %3059  ;;  %vm7008_vm15 = vmor %vm2413_vm11, %vm2414_vm12 }
 0x29b   :  { %v2377_v58 = vsel %vm6928_vm5, %v6813_v15, %v2373_v61  ;;  %v2472_v16 = vadd.f32 %v6850_v55, %v2471_v28  ;;  %v2381_v15 = vor.u32 1.1754944e-38, %v2380_v41  ;;  %vm6965_vm6 = vcmp.eq.f32.partialorder %v2417_v13, 8.507059e+37  ;;  %v2153_v13 = vpop.f32.mrf.mxu2  ;;  %v2173_v5 = vpop.f32.mrf.mxu3 }
 0x29c   :  { %v2396_v37 = vmul.f32 1.442695, %v2368_v63  ;;  %v2487_v46 = vadd.f32 %v6869_v48, %v2486_v52  ;;  %v2451_v53 = vsel %vm6899_vm8, %v6853_v54, %v2446_v47  ;;  %v2499_v24 = vmul.f32 %v3058_v1, %v6889_v10 }
 0x29d   :  { %vm2379_vm9 = vcmp.eq.f32.partialorder %v2378_v44, 8.507059e+37  ;;  %v2461_v51 = vsel %vm6938_vm0, %v6817_v35, %v2457_v27  ;;  %vm6984_vm10 = vcmp.eq.f32.partialorder %v2477_v49, 8.507059e+37  ;;  %v2480_v56 = vor.u32 1.1754944e-38, %v2479_v50  ;;  %v3062_v47 = vpop.eup %3061 }
 0x29e   :  { %3063 = vpow2.f32 %v2396_v37  ;;  %v2382_v54 = vsel %vm2379_vm9, %v2381_v15, %v2377_v58  ;;  %v2495_v57 = vor.u32 1.1754944e-38, %v2494_v33  ;;  %v2500_v30 = vsub.f32 1.0, %v2499_v24 }
 0x29f   :  { %3065 = vrcp.f32 %v6948_v29  ;;  %v2383_v23 = vmul.f32 0.5, %v2382_v54  ;;  %v2476_v9 = vsel %vm6955_vm4, %v6850_v55, %v2472_v16  ;;  %v2491_v35 = vsel %vm6976_vm7, %v6869_v48, %v2487_v46 }
 0x2a0   :  { %vm2493_vm8 = vcmp.eq.f32.partialorder %v2492_v45, 8.507059e+37  ;;  %v2509_v21 = vand.u32 2147483648, %v6889_v10  ;;  %v2466_v63 = vsel %vm6916_vm13, %v2465_v31, %v2461_v51  ;;  %v2501_v27 = vmul.f32 %v3058_v1, %v2500_v30 }
 0x2a1   :  { %vm2504_vm14 = vweird.f32 %v3058_v1  ;;  %v2507_v55 = vand.u32 2147483647, %v6889_v10  ;;  %v2437_v49 = vmul.f32 %v6799_v20, %v6863_v19  ;;  %v2452_v50 = vmul.f32 %v6884_v11, %v2451_v53  ;;  %v2193_v11 = vpop.f32.mrf.mxu0 }
 0x2a2   :  { %v2467_v7 = vmul.f32 %v3056_v22, %v2466_v63  ;;  %v2398_v17 = vmul.f32 1.442695, %v2383_v23  ;;  %v2481_v28 = vsel %vm6984_vm10, %v2480_v56, %v2476_v9  ;;  %v2496_v52 = vsel %vm2493_vm8, %v2495_v57, %v2491_v35  ;;  %v2213_v22 = vpop.f32.mrf.mxu1 }
 0x2a3   :  { %v2502_v61 = vadd.f32 %v3058_v1, %v2501_v27  ;;  %vm2503_vm13 = vweird.f32 %v6889_v10  ;;  %v2548_v37 = vperm.slane %v6999_v60, 1  ;;  %v2482_v44 = vmul.f32 %v3060_v40, %v2481_v28 }
 0x2a4   :  { %v3064_v31 = vpop.eup %3063  ;;  %v2497_v41 = vmul.f32 %v3062_v47, %v2496_v52  ;;  %vm2505_vm11 = vmor %vm2503_vm13, %vm2504_vm14  ;;  %v2510_v20 = vor.u32 1.1754944e-38, %v2509_v21  ;;  %v2416_v19 = vsel %vm7008_vm15, %v6692_v0, %v6764_v34  ;;  %vm2508_vm12 = vcmp.eq.f32.partialorder %v2507_v55, 8.507059e+37 }
 0x2a5   :  { %v3066_v3 = vpop.eup %3065  ;;  %v2506_v43 = vsel %vm2505_vm11, %v3058_v1, %v2502_v61  ;;  %v2530_v33 = vmul.f32 %v2437_v49, %v2133_v36  ;;  %v2549_v58 = vperm.slane %v6999_v60, 2  ;;  %3067 = vpow2.f32 %v2398_v17 }
 0x2a6   :  { %v2514_v10 = vmul.f32 %v3066_v3, %v6948_v29  ;;  %v2511_v6 = vsel %vm2508_vm12, %v2510_v20, %v2506_v43  ;;  %v2531_v46 = vmul.f32 %v2452_v50, %v2153_v13  ;;  %v2532_v45 = vmul.f32 %v2467_v7, %v2173_v5 }
 0x2a7   :  { %v2512_v15 = vmul.f32 %v3064_v31, %v2511_v6  ;;  %v2421_v0 = vsel %vm6965_vm6, %v6725_v2, %v2416_v19  ;;  %v2533_v34 = vmul.f32 %v2482_v44, %v2193_v11  ;;  %v2534_v38 = vmul.f32 %v2497_v41, %v2213_v22 }
 0x2a8   :  { %v2515_v53 = vsub.f32 1.0, %v2514_v10  ;;  %v2524_v1 = vand.u32 2147483648, %v6948_v29  ;;  %vm2519_vm2 = vweird.f32 %v3066_v3  ;;  %v2522_v36 = vand.u32 2147483647, %v6948_v29 }
 0x2a9   :  { %v2422_v26 = vmul.f32 %v6790_v25, %v2421_v0  ;;  %v2538_v13 = vadd.f32 %v2530_v33, %v6640_v12  ;;  %v2550_v54 = vperm.slane %v6999_v60, 3  ;;  %v2551_v40 = vperm.slane %v6999_v60, 4 }
 0x2aa   :  { %v2516_v51 = vmul.f32 %v3066_v3, %v2515_v53  ;;  %v2539_v8 = vadd.f32 %v2531_v46, %v6644_v18  ;;  %v2540_v2 = vadd.f32 %v2532_v45, %v6649_v59  ;;  %vm2518_vm1 = vweird.f32 %v6948_v29 }
 0x2ab   :  { %v3068_v57 = vpop.eup %3067  ;;  %v2541_v30 = vadd.f32 %v2533_v34, %v6655_v42  ;;  %v2552_v23 = vperm.slane %v6999_v60, 5  ;;  %v2553_v25 = vperm.slane %v6999_v60, 6  ;;  %vm2520_vm3 = vmor %vm2518_vm1, %vm2519_vm2  ;;  %v2525_v12 = vor.u32 1.1754944e-38, %v2524_v1 }
 0x2ac   :  { %v2233_v16 = vpop.f32.mrf.mxu2  ;;  %v2517_v56 = vadd.f32 %v3066_v3, %v2516_v51  ;;  %v2542_v9 = vadd.f32 %v2534_v38, %v6665_v32  ;;  %vm2523_vm5 = vcmp.eq.f32.partialorder %v2522_v36, 8.507059e+37  ;;  %v2529_v18 = vmul.f32 %v2422_v26, %v6961_v4 }
 0x2ad   :  { %v2535_v24 = vmul.f32 %v2512_v15, %v2233_v16  ;;  %v2253_v59 = vpop.f32.mrf.mxu3  ;;  %v2565_v29 = vmul.f32 %v2549_v58, %v2539_v8  ;;  %v2566_v63 = vmul.f32 %v2550_v54, %v2540_v2  ;;  %v2564_v42 = vmul.f32 %v2548_v37, %v2538_v13 }
 0x2ae   :  { %v2521_v21 = vsel %vm2520_vm3, %v3066_v3, %v2517_v56  ;;  %v2567_v55 = vmul.f32 %v2551_v40, %v2541_v30  ;;  %v2568_v48 = vmul.f32 %v2552_v23, %v2542_v9  ;;  %v2554_v7 = vperm.slane %v6999_v60, 7 }
 0x2af   :  { %v2543_v35 = vadd.f32 %v2535_v24, %v6698_v14  ;;  %v2526_v47 = vsel %vm2523_vm5, %v2525_v12, %v2521_v21  ;;  %v2537_v32 = vadd.f32 %v2529_v18, %v6638_v62  ;;  %v2547_v14 = vperm.slane %v6999_v60, 0 }
 0x2b0   :  { %v2527_v27 = vmul.f32 %v3068_v57, %v2526_v47  ;;  %v2580_v17 = vrot.slane %v2565_v29, 6  ;;  %v2581_v31 = vrot.slane %v2566_v63, 5  ;;  %v2579_v28 = vrot.slane %v2564_v42, 7 }
 0x2b1   :  { %v2569_v49 = vmul.f32 %v2553_v25, %v2543_v35  ;;  %vm2588_vm0 = vcmask 1042434   ;;  %v2582_v52 = vrot.slane %v2567_v55, 4  ;;  %v2583_v61 = vrot.slane %v2568_v48, 3 }
 0x2b2   :  { %v2536_v50 = vmul.f32 %v2527_v27, %v2253_v59  ;;  %v2563_v5 = vmul.f32 %v2547_v14, %v2537_v32  ;;  %vm2586_vm4 = vcmask 1040384   ;;  %vm2592_vm6 = vcmask 1044484  }
 0x2b3   :  { %v2584_v3 = vrot.slane %v2569_v49, 2  ;;  %vm2594_vm7 = vcmask 1046534   ;;  %v2589_v44 = vsel %vm2588_vm0, %v2580_v17, %v2581_v31  ;;  %vm2590_vm9 = vcmask 1041408  }
 0x2b4   :  { %v2544_v4 = vadd.f32 %v2536_v50, %v6719_v39  ;;  %vm2596_vm10 = vcmask 1045508   ;;  %vm2598_vm8 = vcmask 1043456   ;;  %v2587_v62 = vsel %vm2586_vm4, %v2563_v5, %v2579_v28 }
 0x2b5   :  { %v2593_v60 = vsel %vm2592_vm6, %v2582_v52, %v2583_v61  ;;  %v2591_v39 = vsel %vm2590_vm9, %v2587_v62, %v2589_v44 }
 0x2b6   :  { %v2570_v37 = vmul.f32 %v2554_v7, %v2544_v4 }
 0x2b8   :  { %v2585_v41 = vrot.slane %v2570_v37, 1 }
 0x2ba   :  { %v2595_v20 = vsel %vm2594_vm7, %v2584_v3, %v2585_v41 }
 0x2bb   :  { %v2597_v19 = vsel %vm2596_vm10, %v2593_v60, %v2595_v20 }
 0x2bc   :  { %v2599_v11 = vsel %vm2598_vm8, %v2591_v39, %v2597_v19 }
 0x2bd   :  { %v2608_v22 = vperm.slane %v2599_v11, 0  ;;  %v2609_v43 = vperm.slane %v2599_v11, 1  ;;  %v2610_v10 = vperm.slane %v2599_v11, 2  ;;  %v2611_v33 = vperm.slane %v2599_v11, 3 }
 0x2be   :  { %v2612_v46 = vperm.slane %v2599_v11, 4  ;;  %v2613_v53 = vperm.slane %v2599_v11, 5  ;;  %v2614_v38 = vperm.slane %v2599_v11, 6  ;;  %v2615_v51 = vperm.slane %v2599_v11, 7 }
 0x2bf   :  { %v2624_v58 = vsel %vm2586_vm4, %v2608_v22, 0.0  ;;  %v2625_v16 = vsel %vm2586_vm4, %v2609_v43, 0.0  ;;  %v2627_v45 = vsel %vm2586_vm4, %v2610_v10, 0.0  ;;  %v2629_v0 = vsel %vm2586_vm4, %v2611_v33, 0.0 }
 0x2c0   :  { %v2626_v6 = vadd.f32 %v2625_v16, %v2624_v58  ;;  %v2631_v1 = vsel %vm2586_vm4, %v2612_v46, 0.0  ;;  %v2633_v36 = vsel %vm2586_vm4, %v2613_v53, 0.0  ;;  %v2635_v13 = vsel %vm2586_vm4, %v2614_v38, 0.0 }
 0x2c1   :  { %v2637_v40 = vsel %vm2586_vm4, %v2615_v51, 0.0 }
 0x2c2   :  { %v2628_v15 = vadd.f32 %v2627_v45, %v2626_v6 }
 0x2c4   :  { %v2630_v34 = vadd.f32 %v2629_v0, %v2628_v15 }
 0x2c6   :  { %v2632_v24 = vadd.f32 %v2631_v1, %v2630_v34 }
 0x2c8   :  { %v2634_v26 = vadd.f32 %v2633_v36, %v2632_v24 }
 0x2ca   :  { %v2636_v54 = vadd.f32 %v2635_v13, %v2634_v26 }
 0x2cc   :  { %v2638_v8 = vadd.f32 %v2637_v40, %v2636_v54 }
 0x2ce   :  { %2639 = vadd.xlane.f32.xlu0 %v2638_v8 }
 0x341   :  { %v2640_v2 = vpop.xlane.xlu0 %2639 }
 0x342   :  { %v2641_v56 = vrot.slane %v2640_v2, 4 }
 0x344   :  { %v2642_v57 = vadd.f32 %v2641_v56, %v2640_v2 }
 0x346   :  { %v2643_v30 = vrot.slane %v2642_v57, 2 }
 0x348   :  { %v2644_v23 = vadd.f32 %v2643_v30, %v2642_v57 }
 0x34a   :  { %v2645_v25 = vrot.slane %v2644_v23, 1 }
 0x34c   :  { %v2646_v12 = vadd.f32 %v2645_v25, %v2644_v23 }
 0x34e   :  { %2697 = vpush %v2646_v12 }
 0x37f   :  { %s2698_s13 = spop %2697 }
 0x380   :  { %2649 = sst [smem:[#allocation3]] %s2698_s13 }
 0x381   :  { %2658 = dma.smem_to_hbm %s3212_s14, 16, %s2656_s12, [#allocation4]  }
 0x382   :  { %3209 = dma.done.wait [#allocation4], 16  }
 0x383   :  { %3210 = vsyncadd [#allocation4], 4294967280 }
 0x384   :  { %2663 = sfence }
 0x385   :  { %2664 = vsyncpa [#allocation4], 1 }

</bundles_post_ra>
